<compile_context>
chip_gen: v7x
topology: tpu7x:2x2x1
jax: 0.10.0
libtpu: 0.0.40
codegen_flags: <defaults>
</compile_context>

<pallas_src>
import functools

import jax
import jax.numpy as jnp
from jax.experimental import pallas as pl
from jax.experimental.pallas import tpu as pltpu


# --------------------------------------------------------------------------
# small helpers
# --------------------------------------------------------------------------
def _round_up(x, m):
    return ((x + m - 1) // m) * m


_MAX_ROW_TILE = 512  # 512 rows x <=2048 f32 cols -> <=4 MiB per row buffer;
                     # double-buffered tiles stay far below v7x's 64 MiB VMEM.
_EPS = 1e-5


def _row_tile(m):
    return _MAX_ROW_TILE if m > _MAX_ROW_TILE else _round_up(m, 8)


def _pad_rows(x2d, mp):
    m = x2d.shape[0]
    if mp == m:
        return x2d
    return jnp.pad(x2d, ((0, mp - m), (0, 0)))


def _ln(x, g, b):
    mu = jnp.mean(x, axis=-1, keepdims=True)
    var = jnp.mean(jnp.square(x - mu), axis=-1, keepdims=True)
    inv = jax.lax.rsqrt(var + _EPS)
    return (x - mu) * inv * g + b


# --------------------------------------------------------------------------
# Pallas kernels
# --------------------------------------------------------------------------
def _linear_kernel(x_ref, w_ref, b_ref, o_ref):
    # o = x @ w + b
    acc = jnp.dot(x_ref[...], w_ref[...], preferred_element_type=jnp.float32)
    o_ref[...] = (acc + b_ref[...]).astype(o_ref.dtype)


def _masked_linear_kernel(x_ref, keep_ref, w_ref, b_ref, o_ref):
    # o = (x @ w + b) * keep        (value_proj + key_padding_mask zeroing)
    acc = jnp.dot(x_ref[...], w_ref[...], preferred_element_type=jnp.float32)
    o_ref[...] = ((acc + b_ref[...]) * keep_ref[...]).astype(o_ref.dtype)


def _add_linear_kernel(x_ref, y_ref, w_ref, b_ref, o_ref):
    # o = (x + y) @ w + b           (with_pos_embed fused into the projection)
    q = x_ref[...].astype(jnp.float32) + y_ref[...].astype(jnp.float32)
    acc = jnp.dot(q, w_ref[...], preferred_element_type=jnp.float32)
    o_ref[...] = (acc + b_ref[...]).astype(o_ref.dtype)


def _linear_add_ln_kernel(x_ref, w_ref, b_ref, res_ref, g_ref, beta_ref, o_ref):
    # o = LN(res + x @ w + b)       (output_proj + residual + norm1)
    y = jnp.dot(x_ref[...], w_ref[...], preferred_element_type=jnp.float32) + b_ref[...]
    z = res_ref[...].astype(jnp.float32) + y
    o_ref[...] = _ln(z, g_ref[...], beta_ref[...]).astype(o_ref.dtype)


def _ffn_ln_kernel(x_ref, w1_ref, b1_ref, w2_ref, b2_ref, g_ref, beta_ref, o_ref):
    # o = LN(x + relu(x @ w1 + b1) @ w2 + b2)   (FFN + residual + norm2)
    x = x_ref[...].astype(jnp.float32)
    h = jnp.dot(x, w1_ref[...], preferred_element_type=jnp.float32) + b1_ref[...]
    h = jnp.maximum(h, 0.0)
    y = jnp.dot(h, w2_ref[...], preferred_element_type=jnp.float32) + b2_ref[...]
    o_ref[...] = _ln(x + y, g_ref[...], beta_ref[...]).astype(o_ref.dtype)


def _layer_norm_kernel(x_ref, g_ref, b_ref, o_ref):
    x = x_ref[...].astype(jnp.float32)
    o_ref[...] = _ln(x, g_ref[...], b_ref[...]).astype(o_ref.dtype)


def _ref_points_kernel(base_ref, vrtok_ref, vrrep_ref, o_ref):
    # base:(2,S)  vrtok:(1,2,S)  vrrep,o:(1,2L,S) -- tokens on the lane axis.
    # out[0, 2*l + k, s] = (base[k,s] / vr_of_token[k,s]) * valid_ratio[l,k]
    n_rep = o_ref.shape[1] // base_ref.shape[0]
    ref = base_ref[...][None, :, :] / vrtok_ref[...]          # (1, 2, S)
    o_ref[...] = jnp.concatenate([ref] * n_rep, axis=1) * vrrep_ref[...]


# --------------------------------------------------------------------------
# generic row-tiled pallas_call wrapper
# --------------------------------------------------------------------------
def _rowwise_pallas(kernel, args, is_row, out_cols, out_dtype, *,
                    flops, bytes_accessed, transcendentals=0):
    """Run `kernel` over row tiles.  `args` are 2-D arrays; entries with
    is_row=True share the flattened row count and are tiled; others are
    passed whole (weights / biases / norm params)."""
    m = next(a.shape[0] for a, r in zip(args, is_row) if r)
    tm = _row_tile(m)
    mp = _round_up(m, tm)
    padded = [(_pad_rows(a, mp) if r else a) for a, r in zip(args, is_row)]
    in_specs = []
    for a, r in zip(padded, is_row):
        if r:
            in_specs.append(pl.BlockSpec((tm, a.shape[1]), lambda i: (i, 0)))
        else:
            in_specs.append(pl.BlockSpec(a.shape, lambda i: (0, 0)))
    out = pl.pallas_call(
        kernel,
        out_shape=jax.ShapeDtypeStruct((mp, out_cols), out_dtype),
        grid_spec=pltpu.PrefetchScalarGridSpec(
            num_scalar_prefetch=0,
            grid=(mp // tm,),
            in_specs=in_specs,
            out_specs=pl.BlockSpec((tm, out_cols), lambda i: (i, 0)),
        ),
        compiler_params=pltpu.CompilerParams(dimension_semantics=("parallel",)),
        cost_estimate=pl.CostEstimate(flops=flops, transcendentals=transcendentals,
                                      bytes_accessed=bytes_accessed),
    )(*padded)
    return out[:m]


# --------------------------------------------------------------------------
# op wrappers
# --------------------------------------------------------------------------
def pallas_linear(x, w, b):
    """y = x @ w + b."""
    *lead, K = x.shape
    N = w.shape[1]
    x2 = x.reshape(-1, K)
    m = x2.shape[0]
    isz = jnp.dtype(x.dtype).itemsize
    out = _rowwise_pallas(
        _linear_kernel, [x2, w, b], [True, False, False], N, x.dtype,
        flops=2 * m * K * N,
        bytes_accessed=isz * (m * K + K * N + N + m * N))
    return out.reshape(*lead, N)


def pallas_linear_masked(x, keep, w, b):
    """y = (x @ w + b) * keep   (keep: [..., 1] float multiplier per token)."""
    *lead, K = x.shape
    N = w.shape[1]
    x2 = x.reshape(-1, K)
    k2 = keep.reshape(-1, 1).astype(x.dtype)
    m = x2.shape[0]
    isz = jnp.dtype(x.dtype).itemsize
    out = _rowwise_pallas(
        _masked_linear_kernel, [x2, k2, w, b], [True, True, False, False],
        N, x.dtype,
        flops=2 * m * K * N + m * N,
        bytes_accessed=isz * (m * K + m + K * N + N + m * N))
    return out.reshape(*lead, N)


def pallas_add_linear(x, y, w, b):
    """y = (x + y) @ w + b   (query = src + pos fused into the projection)."""
    *lead, K = x.shape
    N = w.shape[1]
    x2 = x.reshape(-1, K)
    y2 = y.reshape(-1, K)
    m = x2.shape[0]
    isz = jnp.dtype(x.dtype).itemsize
    out = _rowwise_pallas(
        _add_linear_kernel, [x2, y2, w, b], [True, True, False, False],
        N, x.dtype,
        flops=2 * m * K * N + m * K,
        bytes_accessed=isz * (2 * m * K + K * N + N + m * N))
    return out.reshape(*lead, N)


def pallas_linear_add_ln(x, w, b, res, g, beta):
    """y = LN(res + x @ w + b)   (output_proj + residual + LayerNorm)."""
    *lead, K = x.shape
    N = w.shape[1]
    x2 = x.reshape(-1, K)
    r2 = res.reshape(-1, N)
    m = x2.shape[0]
    isz = jnp.dtype(res.dtype).itemsize
    out = _rowwise_pallas(
        _linear_add_ln_kernel, [x2, w, b, r2, g, beta],
        [True, False, False, True, False, False], N, res.dtype,
        flops=2 * m * K * N + 10 * m * N, transcendentals=m,
        bytes_accessed=isz * (m * K + K * N + 3 * N + 2 * m * N))
    return out.reshape(*lead, N)


def pallas_ffn_ln(x, w1, b1, w2, b2, g, beta):
    """y = LN(x + relu(x @ w1 + b1) @ w2 + b2)  (dropout = identity at eval)."""
    *lead, D = x.shape
    F = w1.shape[1]
    x2 = x.reshape(-1, D)
    m = x2.shape[0]
    isz = jnp.dtype(x.dtype).itemsize
    out = _rowwise_pallas(
        _ffn_ln_kernel, [x2, w1, b1, w2, b2, g, beta],
        [True, False, False, False, False, False, False], D, x.dtype,
        flops=4 * m * D * F + 10 * m * D, transcendentals=m,
        bytes_accessed=isz * (2 * m * D + 2 * D * F + F + 3 * D))
    return out.reshape(*lead, D)


def pallas_layer_norm(x, gamma, beta):
    """LayerNorm over the last axis (eps = 1e-5, as in torch)."""
    *lead, D = x.shape
    x2 = x.reshape(-1, D)
    m = x2.shape[0]
    isz = jnp.dtype(x.dtype).itemsize
    out = _rowwise_pallas(
        _layer_norm_kernel, [x2, gamma, beta], [True, False, False], D, x.dtype,
        flops=8 * m * D, transcendentals=m,
        bytes_accessed=isz * (2 * m * D + 2 * D))
    return out.reshape(*lead, D)


def get_reference_points(spatial_shapes, valid_ratios):
    """Pallas version of DinoTransformerEncoder.get_reference_points.

    spatial_shapes: static tuple of (H, W); valid_ratios: [B, L, 2] (x, y).
    Returns [B, sum(H*W), L, 2].
    """
    B = valid_ratios.shape[0]
    L = len(spatial_shapes)
    S = sum(h * w for h, w in spatial_shapes)

    gx, gy, vr_tok = [], [], []
    for lvl, (H, W) in enumerate(spatial_shapes):
        xs = (jnp.arange(W, dtype=jnp.float32) + 0.5) / W
        ys = (jnp.arange(H, dtype=jnp.float32) + 0.5) / H
        gx.append(jnp.tile(xs, H))
        gy.append(jnp.repeat(ys, W))
        vr_tok.append(jnp.broadcast_to(valid_ratios[:, lvl:lvl + 1, :], (B, H * W, 2)))
    base = jnp.stack([jnp.concatenate(gx), jnp.concatenate(gy)], axis=0)    # (2, S)
    vr_tok_t = jnp.transpose(jnp.concatenate(vr_tok, axis=1), (0, 2, 1))     # (B, 2, S)
    vr_rep = jnp.broadcast_to(valid_ratios.reshape(B, 2 * L, 1), (B, 2 * L, S))

    out_t = pl.pallas_call(
        _ref_points_kernel,
        out_shape=jax.ShapeDtypeStruct((B, 2 * L, S), jnp.float32),
        grid_spec=pltpu.PrefetchScalarGridSpec(
            num_scalar_prefetch=0,
            grid=(B,),
            in_specs=[pl.BlockSpec((2, S), lambda b: (0, 0)),
                      pl.BlockSpec((1, 2, S), lambda b: (b, 0, 0)),
                      pl.BlockSpec((1, 2 * L, S), lambda b: (b, 0, 0))],
            out_specs=pl.BlockSpec((1, 2 * L, S), lambda b: (b, 0, 0)),
        ),
        compiler_params=pltpu.CompilerParams(dimension_semantics=("parallel",)),
        cost_estimate=pl.CostEstimate(
            flops=4 * B * L * S, transcendentals=0,
            bytes_accessed=4 * (2 * S + 2 * B * S + 4 * B * L * S)),
    )(base, vr_tok_t, vr_rep)
    # (B, 2L, S) -> (B, L, 2, S) -> (B, S, L, 2)
    return jnp.transpose(out_t.reshape(B, L, 2, S), (0, 3, 1, 2))


# --------------------------------------------------------------------------
# deformable attention sampling (XLA glue: data-dependent gather)
# --------------------------------------------------------------------------
def ms_deform_attn_core(value, spatial_shapes, level_start, sampling_locations,
                        attention_weights):
    """Multi-scale deformable bilinear sampling (grid_sample, zeros padding).

    value: [B, S, M, Dh]; sampling_locations: [B, Lq, M, L, P, 2] (x, y in ~[0,1]);
    attention_weights: [B, Lq, M, L, P].  Returns [B, Lq, M*Dh].
    """
    # TODO(synk): the per-query irregular bilinear gather has no clean Pallas
    # equivalent on TPU; it stays in XLA (gathers at clipped corner indices).
    B, S, M, Dh = value.shape
    _, Lq, _, L, P, _ = sampling_locations.shape
    value_t = jnp.transpose(value, (0, 2, 1, 3))                # [B, M, S, Dh]
    out = jnp.zeros((B, M, Lq, Dh), jnp.float32)
    for lid, (H, W) in enumerate(spatial_shapes):
        start = level_start[lid]                                # static python int
        v_l = value_t[:, :, start:start + H * W, :]             # [B, M, HW, Dh]
        loc = jnp.transpose(sampling_locations[:, :, :, lid], (0, 2, 1, 3, 4))
        x = loc[..., 0] * W - 0.5                               # align_corners=False
        y = loc[..., 1] * H - 0.5
        x0 = jnp.floor(x)
        y0 = jnp.floor(y)
        lx, ly = x - x0, y - y0
        x0i, y0i = x0.astype(jnp.int32), y0.astype(jnp.int32)

        def corner(yi, xi, wgt):
            valid = (yi >= 0) & (yi < H) & (xi >= 0) & (xi < W)
            lin = (jnp.clip(yi, 0, H - 1) * W + jnp.clip(xi, 0, W - 1))
            idx = jnp.broadcast_to(lin.reshape(B, M, Lq * P)[..., None],
                                   (B, M, Lq * P, Dh))
            v = jnp.take_along_axis(v_l, idx, axis=2).reshape(B, M, Lq, P, Dh)
            return v * (wgt * valid.astype(jnp.float32))[..., None]

        samp = (corner(y0i, x0i, (1.0 - ly) * (1.0 - lx))
                + corner(y0i, x0i + 1, (1.0 - ly) * lx)
                + corner(y0i + 1, x0i, ly * (1.0 - lx))
                + corner(y0i + 1, x0i + 1, ly * lx))            # [B,M,Lq,P,Dh]
        aw = jnp.transpose(attention_weights[:, :, :, lid], (0, 2, 1, 3))
        out = out + jnp.sum(samp * aw[..., None], axis=3)
    return jnp.transpose(out, (0, 2, 1, 3)).reshape(B, Lq, M * Dh)


# --------------------------------------------------------------------------
# deformable encoder layer + encoder forward
# --------------------------------------------------------------------------
def _encoder_layer(p, src, pos, reference_points, spatial_shapes, level_start,
                   keep_mask, n_heads, n_points):
    B, S, D = src.shape
    L = len(spatial_shapes)
    M, P = n_heads, n_points
    Dh = D // M

    # ---- multi-scale deformable self-attention -----------------------------
    # value_proj + key_padding_mask zeroing in one kernel.
    value = pallas_linear_masked(src, keep_mask, p["value_w"], p["value_b"])
    value = value.reshape(B, S, M, Dh)

    # (src + pos) and the fused [sampling_offsets ; attention_weights]
    # projection in one kernel.
    off_attn = pallas_add_linear(src, pos, p["offattn_w"], p["offattn_b"])
    n_off = M * L * P * 2
    sampling_offsets = off_attn[..., :n_off].reshape(B, S, M, L, P, 2)
    # TODO(synk): the softmax over the tiny n_levels*n_points axis stays in XLA.
    attn = jax.nn.softmax(off_attn[..., n_off:].reshape(B, S, M, L * P), axis=-1)
    attn = attn.reshape(B, S, M, L, P)

    offset_normalizer = jnp.array([[w, h] for (h, w) in spatial_shapes], jnp.float32)
    sampling_locations = (reference_points[:, :, None, :, None, :]
                          + sampling_offsets
                          / offset_normalizer[None, None, None, :, None, :])

    attn_out = ms_deform_attn_core(value, spatial_shapes, level_start,
                                   sampling_locations, attn).astype(src.dtype)

    # output_proj + residual + LayerNorm1 in one kernel (dropout = identity).
    src = pallas_linear_add_ln(attn_out, p["out_w"], p["out_b"], src,
                               p["norm1_g"], p["norm1_b"])

    # ---- FFN: linear1 -> ReLU -> linear2 -> +residual -> LayerNorm2 --------
    src = pallas_ffn_ln(src, p["ffn_w1"], p["ffn_b1"], p["ffn_w2"], p["ffn_b2"],
                        p["norm2_g"], p["norm2_b"])
    return src


@functools.partial(jax.jit, static_argnames=("spatial_shapes", "n_heads", "n_points"))
def dino_transformer_encoder_forward(params, src, pos, valid_ratios,
                                     key_padding_mask, *, spatial_shapes,
                                     n_heads, n_points):
    """Mirrors DinoTransformerEncoder.forward (two_stage_type='standard',
    deformable_encoder=True, ref_token_index/coord=None).
    Returns (output, intermediate_output, intermediate_ref) = (output, None, None)."""
    level_start = []
    s0 = 0
    for (h, w) in spatial_shapes:
        level_start.append(s0)
        s0 += h * w

    keep_mask = (~key_padding_mask).astype(src.dtype)[..., None]   # [B, S, 1]

    output = src
    reference_points = get_reference_points(spatial_shapes, valid_ratios)
    for layer_params in params["layers"]:
        output = _encoder_layer(layer_params, output, pos, reference_points,
                                spatial_shapes, level_start, keep_mask,
                                n_heads, n_points)
    if params.get("norm") is not None:
        output = pallas_layer_norm(output, params["norm"]["g"], params["norm"]["b"])
    return output, None, None


# --------------------------------------------------------------------------
# parameter construction (encoder_layer is an injected module in the spec;
# this builds a standard DINO deformable encoder layer: MSDeformAttn + FFN)
# --------------------------------------------------------------------------
def init_encoder_params(key, num_layers, d_model, n_heads, n_levels, n_points, d_ffn):
    ks = jax.random.split(key, 5)

    def dense(k, din, dout, scale=0.02):
        return scale * jax.random.normal(k, (din, dout), jnp.float32)

    n_off = n_heads * n_levels * n_points * 2
    n_attn = n_heads * n_levels * n_points
    layer = dict(
        value_w=dense(ks[0], d_model, d_model),
        value_b=jnp.zeros((1, d_model), jnp.float32),
        offattn_w=dense(ks[1], d_model, n_off + n_attn),
        offattn_b=jnp.zeros((1, n_off + n_attn), jnp.float32),
        out_w=dense(ks[2], d_model, d_model),
        out_b=jnp.zeros((1, d_model), jnp.float32),
        norm1_g=jnp.ones((1, d_model), jnp.float32),
        norm1_b=jnp.zeros((1, d_model), jnp.float32),
        ffn_w1=dense(ks[3], d_model, d_ffn),
        ffn_b1=jnp.zeros((1, d_ffn), jnp.float32),
        ffn_w2=dense(ks[4], d_ffn, d_model),
        ffn_b2=jnp.zeros((1, d_model), jnp.float32),
        norm2_g=jnp.ones((1, d_model), jnp.float32),
        norm2_b=jnp.zeros((1, d_model), jnp.float32),
    )
    # _get_clones deepcopies the SAME initialized layer -> identical init weights.
    return dict(layers=tuple(layer for _ in range(num_layers)), norm=None)


# --------------------------------------------------------------------------
if __name__ == "__main__":
    key = jax.random.PRNGKey(0)
    k_src, k_pos, k_vr, k_par = jax.random.split(key, 4)

    # Small DINO-like configuration.
    B, d_model, n_heads, n_points, d_ffn, num_layers = 2, 32, 4, 2, 64, 2
    spatial_shapes = ((8, 8), (4, 4))          # 2 feature levels
    n_levels = len(spatial_shapes)
    S = sum(h * w for h, w in spatial_shapes)  # 80 tokens

    src = jax.random.normal(k_src, (B, S, d_model), jnp.float32)
    pos = jax.random.normal(k_pos, (B, S, d_model), jnp.float32)
    valid_ratios = jax.random.uniform(k_vr, (B, n_levels, 2), jnp.float32,
                                      minval=0.6, maxval=1.0)
    key_padding_mask = jnp.zeros((B, S), jnp.bool_).at[:, -5:].set(True)

    params = init_encoder_params(k_par, num_layers, d_model, n_heads,
                                 n_levels, n_points, d_ffn)

    out, inter_out, inter_ref = dino_transformer_encoder_forward(
        params, src, pos, valid_ratios, key_padding_mask,
        spatial_shapes=spatial_shapes, n_heads=n_heads, n_points=n_points)
    out = jax.block_until_ready(out)

    assert out.shape == (B, S, d_model), out.shape
    assert inter_out is None and inter_ref is None
    assert bool(jnp.all(jnp.isfinite(out))), "non-finite output"

    # --- sanity: reference-point kernel vs. pure-JAX reference --------------
    def ref_points_ref(shapes, vr):
        pts = []
        for lvl, (H, W) in enumerate(shapes):
            ys = jnp.arange(H, dtype=jnp.float32) + 0.5
            xs = jnp.arange(W, dtype=jnp.float32) + 0.5
            gy, gx = jnp.meshgrid(ys, xs, indexing="ij")
            ry = gy.reshape(-1)[None] / (vr[:, None, lvl, 1] * H)
            rx = gx.reshape(-1)[None] / (vr[:, None, lvl, 0] * W)
            pts.append(jnp.stack((rx, ry), -1))
        rp = jnp.concatenate(pts, 1)
        return rp[:, :, None] * vr[:, None]

    ref_pts = jax.block_until_ready(get_reference_points(spatial_shapes, valid_ratios))
    assert ref_pts.shape == (B, S, n_levels, 2)
    assert jnp.allclose(ref_pts, ref_points_ref(spatial_shapes, valid_ratios),
                        atol=1e-5, rtol=1e-5), "reference points mismatch"

    # --- sanity: fused kernels vs. jnp references ----------------------------
    p0 = params["layers"][0]
    keep = (~key_padding_mask).astype(jnp.float32)[..., None]

    y_pal = pallas_linear_masked(src, keep, p0["value_w"], p0["value_b"])
    y_ref = (src @ p0["value_w"] + p0["value_b"]) * keep
    assert jnp.allclose(y_pal, y_ref, atol=2e-2, rtol=2e-2), "masked linear mismatch"

    q_pal = pallas_add_linear(src, pos, p0["offattn_w"], p0["offattn_b"])
    q_ref = (src + pos) @ p0["offattn_w"] + p0["offattn_b"]
    assert jnp.allclose(q_pal, q_ref, atol=2e-2, rtol=2e-2), "add+linear mismatch"

    def ln_ref(x, g, b):
        mu = jnp.mean(x, -1, keepdims=True)
        var = jnp.mean(jnp.square(x - mu), -1, keepdims=True)
        return (x - mu) * jax.lax.rsqrt(var + 1e-5) * g + b

    z_pal = pallas_linear_add_ln(src, p0["out_w"], p0["out_b"], pos,
                                 p0["norm1_g"], p0["norm1_b"])
    z_ref = ln_ref(pos + src @ p0["out_w"] + p0["out_b"], p0["norm1_g"], p0["norm1_b"])
    assert jnp.allclose(z_pal, z_ref, atol=2e-2, rtol=2e-2), "proj+add+LN mismatch"

    f_pal = pallas_ffn_ln(src, p0["ffn_w1"], p0["ffn_b1"], p0["ffn_w2"],
                          p0["ffn_b2"], p0["norm2_g"], p0["norm2_b"])
    h_ref = jnp.maximum(src @ p0["ffn_w1"] + p0["ffn_b1"], 0.0)
    f_ref = ln_ref(src + h_ref @ p0["ffn_w2"] + p0["ffn_b2"],
                   p0["norm2_g"], p0["norm2_b"])
    assert jnp.allclose(f_pal, f_ref, atol=2e-2, rtol=2e-2), "FFN+LN mismatch"

    print("KERNEL_OK")
</pallas_src>

<mosaic_0001>
module attributes {stable_mosaic.version = 11 : i64} {
  func.func @_ref_points_kernel(%arg0: i32, %arg1: memref<2x80xf32, #tpu.memory_space<vmem>>, %arg2: memref<1x2x80xf32, #tpu.memory_space<vmem>>, %arg3: memref<1x4x80xf32, #tpu.memory_space<vmem>>, %arg4: memref<1x4x80xf32, #tpu.memory_space<vmem>>) attributes {dimension_semantics = [#tpu.dimension_semantics<parallel>], iteration_bounds = array<i64: 2>, scalar_prefetch = 0 : i64, scratch_operands = 0 : i64, tpu.core_type = #tpu.core_type<tc>, window_params = [{pipeline_mode = #tpu.pipeline_mode<synchronous>, transform_indices = @transform_0, window_bounds = array<i64: 2, 80>}, {transform_indices = @transform_1, window_bounds = array<i64: 1, 2, 80>}, {transform_indices = @transform_2, window_bounds = array<i64: 1, 4, 80>}, {transform_indices = @transform_3, window_bounds = array<i64: 1, 4, 80>}]} {
    %c0 = arith.constant 0 : index
    %c0_0 = arith.constant 0 : index
    %0 = vector.load %arg1[%c0, %c0_0] : memref<2x80xf32, #tpu.memory_space<vmem>>, vector<2x80xf32>
    %1 = vector.shape_cast %0 : vector<2x80xf32> to vector<1x2x80xf32>
    %c0_1 = arith.constant 0 : index
    %c0_2 = arith.constant 0 : index
    %c0_3 = arith.constant 0 : index
    %2 = vector.load %arg2[%c0_1, %c0_2, %c0_3] : memref<1x2x80xf32, #tpu.memory_space<vmem>>, vector<1x2x80xf32>
    %3 = arith.divf %1, %2 : vector<1x2x80xf32>
    %4 = tpu.concatenate %3, %3 in 1 : vector<1x2x80xf32>, vector<1x2x80xf32> -> vector<1x4x80xf32>
    %c0_4 = arith.constant 0 : index
    %c0_5 = arith.constant 0 : index
    %c0_6 = arith.constant 0 : index
    %5 = vector.load %arg3[%c0_4, %c0_5, %c0_6] : memref<1x4x80xf32, #tpu.memory_space<vmem>>, vector<1x4x80xf32>
    %6 = arith.mulf %4, %5 : vector<1x4x80xf32>
    %c0_7 = arith.constant 0 : index
    %c0_8 = arith.constant 0 : index
    %c0_9 = arith.constant 0 : index
    %7 = vector.load %arg4[%c0_7, %c0_8, %c0_9] : memref<1x4x80xf32, #tpu.memory_space<vmem>>, vector<1x4x80xf32>
    tpu.vector_store %arg4[%c0_7, %c0_8, %c0_9], %6 {strides = array<i32>} : memref<1x4x80xf32, #tpu.memory_space<vmem>>, vector<1x4x80xf32>,
    return
  }
  func.func @transform_0(%arg0: i32) -> (i32, i32) {
    %c0_i32 = arith.constant 0 : i32
    %c0_i32_0 = arith.constant 0 : i32
    %c0_i32_1 = arith.constant 0 : i32
    return %c0_i32, %c0_i32_0 : i32, i32
  }
  func.func @transform_1(%arg0: i32) -> (i32, i32, i32) {
    %c0_i32 = arith.constant 0 : i32
    %c0_i32_0 = arith.constant 0 : i32
    %c0_i32_1 = arith.constant 0 : i32
    return %arg0, %c0_i32, %c0_i32_0 : i32, i32, i32
  }
  func.func @transform_2(%arg0: i32) -> (i32, i32, i32) {
    %c0_i32 = arith.constant 0 : i32
    %c0_i32_0 = arith.constant 0 : i32
    %c0_i32_1 = arith.constant 0 : i32
    return %arg0, %c0_i32, %c0_i32_0 : i32, i32, i32
  }
  func.func @transform_3(%arg0: i32) -> (i32, i32, i32) {
    %c0_i32 = arith.constant 0 : i32
    %c0_i32_0 = arith.constant 0 : i32
    %c0_i32_1 = arith.constant 0 : i32
    return %arg0, %c0_i32, %c0_i32_0 : i32, i32, i32
  }
}

module attributes {stable_mosaic.version = 11 : i64} {
  func.func @_add_linear_kernel(%arg0: i32, %arg1: memref<160x32xf32, #tpu.memory_space<vmem>>, %arg2: memref<160x32xf32, #tpu.memory_space<vmem>>, %arg3: memref<32x48xf32, #tpu.memory_space<vmem>>, %arg4: memref<1x48xf32, #tpu.memory_space<vmem>>, %arg5: memref<160x48xf32, #tpu.memory_space<vmem>>) attributes {dimension_semantics = [#tpu.dimension_semantics<parallel>], iteration_bounds = array<i64: 1>, scalar_prefetch = 0 : i64, scratch_operands = 0 : i64, tpu.core_type = #tpu.core_type<tc>, window_params = [{transform_indices = @transform_0, window_bounds = array<i64: 160, 32>}, {transform_indices = @transform_1, window_bounds = array<i64: 160, 32>}, {pipeline_mode = #tpu.pipeline_mode<synchronous>, transform_indices = @transform_2, window_bounds = array<i64: 32, 48>}, {pipeline_mode = #tpu.pipeline_mode<synchronous>, transform_indices = @transform_3, window_bounds = array<i64: 1, 48>}, {transform_indices = @transform_4, window_bounds = array<i64: 160, 48>}]} {
    %c0 = arith.constant 0 : index
    %c0_0 = arith.constant 0 : index
    %0 = vector.load %arg1[%c0, %c0_0] : memref<160x32xf32, #tpu.memory_space<vmem>>, vector<160x32xf32>
    %c0_1 = arith.constant 0 : index
    %c0_2 = arith.constant 0 : index
    %1 = vector.load %arg2[%c0_1, %c0_2] : memref<160x32xf32, #tpu.memory_space<vmem>>, vector<160x32xf32>
    %2 = arith.addf %0, %1 : vector<160x32xf32>
    %c0_3 = arith.constant 0 : index
    %c0_4 = arith.constant 0 : index
    %3 = vector.load %arg3[%c0_3, %c0_4] : memref<32x48xf32, #tpu.memory_space<vmem>>, vector<32x48xf32>
    %cst = arith.constant dense<0.000000e+00> : vector<160x48xf32>
    %4 = tpu.matmul %2, %3, %cst {dimension_numbers = #tpu.dot_dimension_numbers<[1], [0], [0], [1], [0, 0, 1, 1], [], []>} : vector<160x32xf32>, vector<32x48xf32>, vector<160x48xf32> -> vector<160x48xf32>
    %c0_5 = arith.constant 0 : index
    %c0_6 = arith.constant 0 : index
    %5 = vector.load %arg4[%c0_5, %c0_6] : memref<1x48xf32, #tpu.memory_space<vmem>>, vector<1x48xf32>
    %6 = vector.broadcast %5 : vector<1x48xf32> to vector<160x48xf32>
    %7 = arith.addf %4, %6 : vector<160x48xf32>
    %c0_7 = arith.constant 0 : index
    %c0_8 = arith.constant 0 : index
    %8 = vector.load %arg5[%c0_7, %c0_8] : memref<160x48xf32, #tpu.memory_space<vmem>>, vector<160x48xf32>
    tpu.vector_store %arg5[%c0_7, %c0_8], %7 {strides = array<i32>} : memref<160x48xf32, #tpu.memory_space<vmem>>, vector<160x48xf32>,
    return
  }
  func.func @transform_0(%arg0: i32) -> (i32, i32) {
    %c0_i32 = arith.constant 0 : i32
    %c0_i32_0 = arith.constant 0 : i32
    return %arg0, %c0_i32 : i32, i32
  }
  func.func @transform_1(%arg0: i32) -> (i32, i32) {
    %c0_i32 = arith.constant 0 : i32
    %c0_i32_0 = arith.constant 0 : i32
    return %arg0, %c0_i32 : i32, i32
  }
  func.func @transform_2(%arg0: i32) -> (i32, i32) {
    %c0_i32 = arith.constant 0 : i32
    %c0_i32_0 = arith.constant 0 : i32
    %c0_i32_1 = arith.constant 0 : i32
    return %c0_i32, %c0_i32_0 : i32, i32
  }
  func.func @transform_3(%arg0: i32) -> (i32, i32) {
    %c0_i32 = arith.constant 0 : i32
    %c0_i32_0 = arith.constant 0 : i32
    %c0_i32_1 = arith.constant 0 : i32
    return %c0_i32, %c0_i32_0 : i32, i32
  }
  func.func @transform_4(%arg0: i32) -> (i32, i32) {
    %c0_i32 = arith.constant 0 : i32
    %c0_i32_0 = arith.constant 0 : i32
    return %arg0, %c0_i32 : i32, i32
  }
}

module attributes {stable_mosaic.version = 11 : i64} {
  func.func @_masked_linear_kernel(%arg0: i32, %arg1: memref<160x32xf32, #tpu.memory_space<vmem>>, %arg2: memref<160x1xf32, #tpu.memory_space<vmem>>, %arg3: memref<32x32xf32, #tpu.memory_space<vmem>>, %arg4: memref<1x32xf32, #tpu.memory_space<vmem>>, %arg5: memref<160x32xf32, #tpu.memory_space<vmem>>) attributes {dimension_semantics = [#tpu.dimension_semantics<parallel>], iteration_bounds = array<i64: 1>, scalar_prefetch = 0 : i64, scratch_operands = 0 : i64, tpu.core_type = #tpu.core_type<tc>, window_params = [{transform_indices = @transform_0, window_bounds = array<i64: 160, 32>}, {transform_indices = @transform_1, window_bounds = array<i64: 160, 1>}, {pipeline_mode = #tpu.pipeline_mode<synchronous>, transform_indices = @transform_2, window_bounds = array<i64: 32, 32>}, {pipeline_mode = #tpu.pipeline_mode<synchronous>, transform_indices = @transform_3, window_bounds = array<i64: 1, 32>}, {transform_indices = @transform_4, window_bounds = array<i64: 160, 32>}]} {
    %c0 = arith.constant 0 : index
    %c0_0 = arith.constant 0 : index
    %0 = vector.load %arg1[%c0, %c0_0] : memref<160x32xf32, #tpu.memory_space<vmem>>, vector<160x32xf32>
    %c0_1 = arith.constant 0 : index
    %c0_2 = arith.constant 0 : index
    %1 = vector.load %arg3[%c0_1, %c0_2] : memref<32x32xf32, #tpu.memory_space<vmem>>, vector<32x32xf32>
    %cst = arith.constant dense<0.000000e+00> : vector<160x32xf32>
    %2 = tpu.matmul %0, %1, %cst {dimension_numbers = #tpu.dot_dimension_numbers<[1], [0], [0], [1], [0, 0, 1, 1], [], []>} : vector<160x32xf32>, vector<32x32xf32>, vector<160x32xf32> -> vector<160x32xf32>
    %c0_3 = arith.constant 0 : index
    %c0_4 = arith.constant 0 : index
    %3 = vector.load %arg4[%c0_3, %c0_4] : memref<1x32xf32, #tpu.memory_space<vmem>>, vector<1x32xf32>
    %4 = vector.broadcast %3 : vector<1x32xf32> to vector<160x32xf32>
    %5 = arith.addf %2, %4 : vector<160x32xf32>
    %c0_5 = arith.constant 0 : index
    %c0_6 = arith.constant 0 : index
    %6 = vector.load %arg2[%c0_5, %c0_6] : memref<160x1xf32, #tpu.memory_space<vmem>>, vector<160x1xf32>
    %7 = vector.broadcast %6 : vector<160x1xf32> to vector<160x32xf32>
    %8 = arith.mulf %5, %7 : vector<160x32xf32>
    %c0_7 = arith.constant 0 : index
    %c0_8 = arith.constant 0 : index
    %9 = vector.load %arg5[%c0_7, %c0_8] : memref<160x32xf32, #tpu.memory_space<vmem>>, vector<160x32xf32>
    tpu.vector_store %arg5[%c0_7, %c0_8], %8 {strides = array<i32>} : memref<160x32xf32, #tpu.memory_space<vmem>>, vector<160x32xf32>,
    return
  }
  func.func @transform_0(%arg0: i32) -> (i32, i32) {
    %c0_i32 = arith.constant 0 : i32
    %c0_i32_0 = arith.constant 0 : i32
    return %arg0, %c0_i32 : i32, i32
  }
  func.func @transform_1(%arg0: i32) -> (i32, i32) {
    %c0_i32 = arith.constant 0 : i32
    %c0_i32_0 = arith.constant 0 : i32
    return %arg0, %c0_i32 : i32, i32
  }
  func.func @transform_2(%arg0: i32) -> (i32, i32) {
    %c0_i32 = arith.constant 0 : i32
    %c0_i32_0 = arith.constant 0 : i32
    %c0_i32_1 = arith.constant 0 : i32
    return %c0_i32, %c0_i32_0 : i32, i32
  }
  func.func @transform_3(%arg0: i32) -> (i32, i32) {
    %c0_i32 = arith.constant 0 : i32
    %c0_i32_0 = arith.constant 0 : i32
    %c0_i32_1 = arith.constant 0 : i32
    return %c0_i32, %c0_i32_0 : i32, i32
  }
  func.func @transform_4(%arg0: i32) -> (i32, i32) {
    %c0_i32 = arith.constant 0 : i32
    %c0_i32_0 = arith.constant 0 : i32
    return %arg0, %c0_i32 : i32, i32
  }
}

module attributes {stable_mosaic.version = 11 : i64} {
  func.func @_linear_add_ln_kernel(%arg0: i32, %arg1: memref<160x32xf32, #tpu.memory_space<vmem>>, %arg2: memref<32x32xf32, #tpu.memory_space<vmem>>, %arg3: memref<1x32xf32, #tpu.memory_space<vmem>>, %arg4: memref<160x32xf32, #tpu.memory_space<vmem>>, %arg5: memref<1x32xf32, #tpu.memory_space<vmem>>, %arg6: memref<1x32xf32, #tpu.memory_space<vmem>>, %arg7: memref<160x32xf32, #tpu.memory_space<vmem>>) attributes {dimension_semantics = [#tpu.dimension_semantics<parallel>], iteration_bounds = array<i64: 1>, scalar_prefetch = 0 : i64, scratch_operands = 0 : i64, tpu.core_type = #tpu.core_type<tc>, window_params = [{transform_indices = @transform_0, window_bounds = array<i64: 160, 32>}, {pipeline_mode = #tpu.pipeline_mode<synchronous>, transform_indices = @transform_1, window_bounds = array<i64: 32, 32>}, {pipeline_mode = #tpu.pipeline_mode<synchronous>, transform_indices = @transform_2, window_bounds = array<i64: 1, 32>}, {transform_indices = @transform_3, window_bounds = array<i64: 160, 32>}, {pipeline_mode = #tpu.pipeline_mode<synchronous>, transform_indices = @transform_4, window_bounds = array<i64: 1, 32>}, {pipeline_mode = #tpu.pipeline_mode<synchronous>, transform_indices = @transform_5, window_bounds = array<i64: 1, 32>}, {transform_indices = @transform_6, window_bounds = array<i64: 160, 32>}]} {
    %c0 = arith.constant 0 : index
    %c0_0 = arith.constant 0 : index
    %0 = vector.load %arg1[%c0, %c0_0] : memref<160x32xf32, #tpu.memory_space<vmem>>, vector<160x32xf32>
    %c0_1 = arith.constant 0 : index
    %c0_2 = arith.constant 0 : index
    %1 = vector.load %arg2[%c0_1, %c0_2] : memref<32x32xf32, #tpu.memory_space<vmem>>, vector<32x32xf32>
    %cst = arith.constant dense<0.000000e+00> : vector<160x32xf32>
    %2 = tpu.matmul %0, %1, %cst {dimension_numbers = #tpu.dot_dimension_numbers<[1], [0], [0], [1], [0, 0, 1, 1], [], []>} : vector<160x32xf32>, vector<32x32xf32>, vector<160x32xf32> -> vector<160x32xf32>
    %c0_3 = arith.constant 0 : index
    %c0_4 = arith.constant 0 : index
    %3 = vector.load %arg3[%c0_3, %c0_4] : memref<1x32xf32, #tpu.memory_space<vmem>>, vector<1x32xf32>
    %4 = vector.broadcast %3 : vector<1x32xf32> to vector<160x32xf32>
    %5 = arith.addf %2, %4 : vector<160x32xf32>
    %c0_5 = arith.constant 0 : index
    %c0_6 = arith.constant 0 : index
    %6 = vector.load %arg4[%c0_5, %c0_6] : memref<160x32xf32, #tpu.memory_space<vmem>>, vector<160x32xf32>
    %7 = arith.addf %6, %5 : vector<160x32xf32>
    %c0_7 = arith.constant 0 : index
    %c0_8 = arith.constant 0 : index
    %8 = vector.load %arg5[%c0_7, %c0_8] : memref<1x32xf32, #tpu.memory_space<vmem>>, vector<1x32xf32>
    %c0_9 = arith.constant 0 : index
    %c0_10 = arith.constant 0 : index
    %9 = vector.load %arg6[%c0_9, %c0_10] : memref<1x32xf32, #tpu.memory_space<vmem>>, vector<1x32xf32>
    %cst_11 = arith.constant dense<0.000000e+00> : vector<160xf32>
    %10 = vector.multi_reduction <add>, %7, %cst_11 [1] : vector<160x32xf32> to vector<160xf32>
    %11 = vector.shape_cast %10 : vector<160xf32> to vector<160x1xf32>
    %cst_12 = arith.constant 3.200000e+01 : f32
    %12 = vector.broadcast %cst_12 : f32 to vector<160x1xf32>
    %13 = arith.divf %11, %12 : vector<160x1xf32>
    %14 = vector.broadcast %13 : vector<160x1xf32> to vector<160x32xf32>
    %15 = arith.subf %7, %14 : vector<160x32xf32>
    %16 = arith.mulf %15, %15 : vector<160x32xf32>
    %cst_13 = arith.constant dense<0.000000e+00> : vector<160xf32>
    %17 = vector.multi_reduction <add>, %16, %cst_13 [1] : vector<160x32xf32> to vector<160xf32>
    %18 = vector.shape_cast %17 : vector<160xf32> to vector<160x1xf32>
    %cst_14 = arith.constant 3.200000e+01 : f32
    %19 = vector.broadcast %cst_14 : f32 to vector<160x1xf32>
    %20 = arith.divf %18, %19 : vector<160x1xf32>
    %cst_15 = arith.constant 9.99999974E-6 : f32
    %21 = vector.broadcast %cst_15 : f32 to vector<160x1xf32>
    %22 = arith.addf %20, %21 : vector<160x1xf32>
    %23 = math.rsqrt %22 : vector<160x1xf32>
    %24 = vector.broadcast %13 : vector<160x1xf32> to vector<160x32xf32>
    %25 = arith.subf %7, %24 : vector<160x32xf32>
    %26 = vector.broadcast %23 : vector<160x1xf32> to vector<160x32xf32>
    %27 = arith.mulf %25, %26 : vector<160x32xf32>
    %28 = vector.broadcast %8 : vector<1x32xf32> to vector<160x32xf32>
    %29 = arith.mulf %27, %28 : vector<160x32xf32>
    %30 = vector.broadcast %9 : vector<1x32xf32> to vector<160x32xf32>
    %31 = arith.addf %29, %30 : vector<160x32xf32>
    %c0_16 = arith.constant 0 : index
    %c0_17 = arith.constant 0 : index
    %32 = vector.load %arg7[%c0_16, %c0_17] : memref<160x32xf32, #tpu.memory_space<vmem>>, vector<160x32xf32>
    tpu.vector_store %arg7[%c0_16, %c0_17], %31 {strides = array<i32>} : memref<160x32xf32, #tpu.memory_space<vmem>>, vector<160x32xf32>,
    return
  }
  func.func @transform_0(%arg0: i32) -> (i32, i32) {
    %c0_i32 = arith.constant 0 : i32
    %c0_i32_0 = arith.constant 0 : i32
    return %arg0, %c0_i32 : i32, i32
  }
  func.func @transform_1(%arg0: i32) -> (i32, i32) {
    %c0_i32 = arith.constant 0 : i32
    %c0_i32_0 = arith.constant 0 : i32
    %c0_i32_1 = arith.constant 0 : i32
    return %c0_i32, %c0_i32_0 : i32, i32
  }
  func.func @transform_2(%arg0: i32) -> (i32, i32) {
    %c0_i32 = arith.constant 0 : i32
    %c0_i32_0 = arith.constant 0 : i32
    %c0_i32_1 = arith.constant 0 : i32
    return %c0_i32, %c0_i32_0 : i32, i32
  }
  func.func @transform_3(%arg0: i32) -> (i32, i32) {
    %c0_i32 = arith.constant 0 : i32
    %c0_i32_0 = arith.constant 0 : i32
    return %arg0, %c0_i32 : i32, i32
  }
  func.func @transform_4(%arg0: i32) -> (i32, i32) {
    %c0_i32 = arith.constant 0 : i32
    %c0_i32_0 = arith.constant 0 : i32
    %c0_i32_1 = arith.constant 0 : i32
    return %c0_i32, %c0_i32_0 : i32, i32
  }
  func.func @transform_5(%arg0: i32) -> (i32, i32) {
    %c0_i32 = arith.constant 0 : i32
    %c0_i32_0 = arith.constant 0 : i32
    %c0_i32_1 = arith.constant 0 : i32
    return %c0_i32, %c0_i32_0 : i32, i32
  }
  func.func @transform_6(%arg0: i32) -> (i32, i32) {
    %c0_i32 = arith.constant 0 : i32
    %c0_i32_0 = arith.constant 0 : i32
    return %arg0, %c0_i32 : i32, i32
  }
}

module attributes {stable_mosaic.version = 11 : i64} {
  func.func @_add_linear_kernel(%arg0: i32, %arg1: memref<160x32xf32, #tpu.memory_space<vmem>>, %arg2: memref<160x32xf32, #tpu.memory_space<vmem>>, %arg3: memref<32x48xf32, #tpu.memory_space<vmem>>, %arg4: memref<1x48xf32, #tpu.memory_space<vmem>>, %arg5: memref<160x48xf32, #tpu.memory_space<vmem>>) attributes {dimension_semantics = [#tpu.dimension_semantics<parallel>], iteration_bounds = array<i64: 1>, scalar_prefetch = 0 : i64, scratch_operands = 0 : i64, tpu.core_type = #tpu.core_type<tc>, window_params = [{transform_indices = @transform_0, window_bounds = array<i64: 160, 32>}, {transform_indices = @transform_1, window_bounds = array<i64: 160, 32>}, {pipeline_mode = #tpu.pipeline_mode<synchronous>, transform_indices = @transform_2, window_bounds = array<i64: 32, 48>}, {pipeline_mode = #tpu.pipeline_mode<synchronous>, transform_indices = @transform_3, window_bounds = array<i64: 1, 48>}, {transform_indices = @transform_4, window_bounds = array<i64: 160, 48>}]} {
    %c0 = arith.constant 0 : index
    %c0_0 = arith.constant 0 : index
    %0 = vector.load %arg1[%c0, %c0_0] : memref<160x32xf32, #tpu.memory_space<vmem>>, vector<160x32xf32>
    %c0_1 = arith.constant 0 : index
    %c0_2 = arith.constant 0 : index
    %1 = vector.load %arg2[%c0_1, %c0_2] : memref<160x32xf32, #tpu.memory_space<vmem>>, vector<160x32xf32>
    %2 = arith.addf %0, %1 : vector<160x32xf32>
    %c0_3 = arith.constant 0 : index
    %c0_4 = arith.constant 0 : index
    %3 = vector.load %arg3[%c0_3, %c0_4] : memref<32x48xf32, #tpu.memory_space<vmem>>, vector<32x48xf32>
    %cst = arith.constant dense<0.000000e+00> : vector<160x48xf32>
    %4 = tpu.matmul %2, %3, %cst {dimension_numbers = #tpu.dot_dimension_numbers<[1], [0], [0], [1], [0, 0, 1, 1], [], []>} : vector<160x32xf32>, vector<32x48xf32>, vector<160x48xf32> -> vector<160x48xf32>
    %c0_5 = arith.constant 0 : index
    %c0_6 = arith.constant 0 : index
    %5 = vector.load %arg4[%c0_5, %c0_6] : memref<1x48xf32, #tpu.memory_space<vmem>>, vector<1x48xf32>
    %6 = vector.broadcast %5 : vector<1x48xf32> to vector<160x48xf32>
    %7 = arith.addf %4, %6 : vector<160x48xf32>
    %c0_7 = arith.constant 0 : index
    %c0_8 = arith.constant 0 : index
    %8 = vector.load %arg5[%c0_7, %c0_8] : memref<160x48xf32, #tpu.memory_space<vmem>>, vector<160x48xf32>
    tpu.vector_store %arg5[%c0_7, %c0_8], %7 {strides = array<i32>} : memref<160x48xf32, #tpu.memory_space<vmem>>, vector<160x48xf32>,
    return
  }
  func.func @transform_0(%arg0: i32) -> (i32, i32) {
    %c0_i32 = arith.constant 0 : i32
    %c0_i32_0 = arith.constant 0 : i32
    return %arg0, %c0_i32 : i32, i32
  }
  func.func @transform_1(%arg0: i32) -> (i32, i32) {
    %c0_i32 = arith.constant 0 : i32
    %c0_i32_0 = arith.constant 0 : i32
    return %arg0, %c0_i32 : i32, i32
  }
  func.func @transform_2(%arg0: i32) -> (i32, i32) {
    %c0_i32 = arith.constant 0 : i32
    %c0_i32_0 = arith.constant 0 : i32
    %c0_i32_1 = arith.constant 0 : i32
    return %c0_i32, %c0_i32_0 : i32, i32
  }
  func.func @transform_3(%arg0: i32) -> (i32, i32) {
    %c0_i32 = arith.constant 0 : i32
    %c0_i32_0 = arith.constant 0 : i32
    %c0_i32_1 = arith.constant 0 : i32
    return %c0_i32, %c0_i32_0 : i32, i32
  }
  func.func @transform_4(%arg0: i32) -> (i32, i32) {
    %c0_i32 = arith.constant 0 : i32
    %c0_i32_0 = arith.constant 0 : i32
    return %arg0, %c0_i32 : i32, i32
  }
}

module attributes {stable_mosaic.version = 11 : i64} {
  func.func @_ffn_ln_kernel(%arg0: i32, %arg1: memref<160x32xf32, #tpu.memory_space<vmem>>, %arg2: memref<32x64xf32, #tpu.memory_space<vmem>>, %arg3: memref<1x64xf32, #tpu.memory_space<vmem>>, %arg4: memref<64x32xf32, #tpu.memory_space<vmem>>, %arg5: memref<1x32xf32, #tpu.memory_space<vmem>>, %arg6: memref<1x32xf32, #tpu.memory_space<vmem>>, %arg7: memref<1x32xf32, #tpu.memory_space<vmem>>, %arg8: memref<160x32xf32, #tpu.memory_space<vmem>>) attributes {dimension_semantics = [#tpu.dimension_semantics<parallel>], iteration_bounds = array<i64: 1>, scalar_prefetch = 0 : i64, scratch_operands = 0 : i64, tpu.core_type = #tpu.core_type<tc>, window_params = [{transform_indices = @transform_0, window_bounds = array<i64: 160, 32>}, {pipeline_mode = #tpu.pipeline_mode<synchronous>, transform_indices = @transform_1, window_bounds = array<i64: 32, 64>}, {pipeline_mode = #tpu.pipeline_mode<synchronous>, transform_indices = @transform_2, window_bounds = array<i64: 1, 64>}, {pipeline_mode = #tpu.pipeline_mode<synchronous>, transform_indices = @transform_3, window_bounds = array<i64: 64, 32>}, {pipeline_mode = #tpu.pipeline_mode<synchronous>, transform_indices = @transform_4, window_bounds = array<i64: 1, 32>}, {pipeline_mode = #tpu.pipeline_mode<synchronous>, transform_indices = @transform_5, window_bounds = array<i64: 1, 32>}, {pipeline_mode = #tpu.pipeline_mode<synchronous>, transform_indices = @transform_6, window_bounds = array<i64: 1, 32>}, {transform_indices = @transform_7, window_bounds = array<i64: 160, 32>}]} {
    %c0 = arith.constant 0 : index
    %c0_0 = arith.constant 0 : index
    %0 = vector.load %arg1[%c0, %c0_0] : memref<160x32xf32, #tpu.memory_space<vmem>>, vector<160x32xf32>
    %c0_1 = arith.constant 0 : index
    %c0_2 = arith.constant 0 : index
    %1 = vector.load %arg2[%c0_1, %c0_2] : memref<32x64xf32, #tpu.memory_space<vmem>>, vector<32x64xf32>
    %cst = arith.constant dense<0.000000e+00> : vector<160x64xf32>
    %2 = tpu.matmul %0, %1, %cst {dimension_numbers = #tpu.dot_dimension_numbers<[1], [0], [0], [1], [0, 0, 1, 1], [], []>} : vector<160x32xf32>, vector<32x64xf32>, vector<160x64xf32> -> vector<160x64xf32>
    %c0_3 = arith.constant 0 : index
    %c0_4 = arith.constant 0 : index
    %3 = vector.load %arg3[%c0_3, %c0_4] : memref<1x64xf32, #tpu.memory_space<vmem>>, vector<1x64xf32>
    %4 = vector.broadcast %3 : vector<1x64xf32> to vector<160x64xf32>
    %5 = arith.addf %2, %4 : vector<160x64xf32>
    %cst_5 = arith.constant 0.000000e+00 : f32
    %6 = vector.broadcast %cst_5 : f32 to vector<160x64xf32>
    %7 = arith.maximumf %5, %6 : vector<160x64xf32>
    %c0_6 = arith.constant 0 : index
    %c0_7 = arith.constant 0 : index
    %8 = vector.load %arg4[%c0_6, %c0_7] : memref<64x32xf32, #tpu.memory_space<vmem>>, vector<64x32xf32>
    %cst_8 = arith.constant dense<0.000000e+00> : vector<160x32xf32>
    %9 = tpu.matmul %7, %8, %cst_8 {dimension_numbers = #tpu.dot_dimension_numbers<[1], [0], [0], [1], [0, 0, 1, 1], [], []>} : vector<160x64xf32>, vector<64x32xf32>, vector<160x32xf32> -> vector<160x32xf32>
    %c0_9 = arith.constant 0 : index
    %c0_10 = arith.constant 0 : index
    %10 = vector.load %arg5[%c0_9, %c0_10] : memref<1x32xf32, #tpu.memory_space<vmem>>, vector<1x32xf32>
    %11 = vector.broadcast %10 : vector<1x32xf32> to vector<160x32xf32>
    %12 = arith.addf %9, %11 : vector<160x32xf32>
    %13 = arith.addf %0, %12 : vector<160x32xf32>
    %c0_11 = arith.constant 0 : index
    %c0_12 = arith.constant 0 : index
    %14 = vector.load %arg6[%c0_11, %c0_12] : memref<1x32xf32, #tpu.memory_space<vmem>>, vector<1x32xf32>
    %c0_13 = arith.constant 0 : index
    %c0_14 = arith.constant 0 : index
    %15 = vector.load %arg7[%c0_13, %c0_14] : memref<1x32xf32, #tpu.memory_space<vmem>>, vector<1x32xf32>
    %cst_15 = arith.constant dense<0.000000e+00> : vector<160xf32>
    %16 = vector.multi_reduction <add>, %13, %cst_15 [1] : vector<160x32xf32> to vector<160xf32>
    %17 = vector.shape_cast %16 : vector<160xf32> to vector<160x1xf32>
    %cst_16 = arith.constant 3.200000e+01 : f32
    %18 = vector.broadcast %cst_16 : f32 to vector<160x1xf32>
    %19 = arith.divf %17, %18 : vector<160x1xf32>
    %20 = vector.broadcast %19 : vector<160x1xf32> to vector<160x32xf32>
    %21 = arith.subf %13, %20 : vector<160x32xf32>
    %22 = arith.mulf %21, %21 : vector<160x32xf32>
    %cst_17 = arith.constant dense<0.000000e+00> : vector<160xf32>
    %23 = vector.multi_reduction <add>, %22, %cst_17 [1] : vector<160x32xf32> to vector<160xf32>
    %24 = vector.shape_cast %23 : vector<160xf32> to vector<160x1xf32>
    %cst_18 = arith.constant 3.200000e+01 : f32
    %25 = vector.broadcast %cst_18 : f32 to vector<160x1xf32>
    %26 = arith.divf %24, %25 : vector<160x1xf32>
    %cst_19 = arith.constant 9.99999974E-6 : f32
    %27 = vector.broadcast %cst_19 : f32 to vector<160x1xf32>
    %28 = arith.addf %26, %27 : vector<160x1xf32>
    %29 = math.rsqrt %28 : vector<160x1xf32>
    %30 = vector.broadcast %19 : vector<160x1xf32> to vector<160x32xf32>
    %31 = arith.subf %13, %30 : vector<160x32xf32>
    %32 = vector.broadcast %29 : vector<160x1xf32> to vector<160x32xf32>
    %33 = arith.mulf %31, %32 : vector<160x32xf32>
    %34 = vector.broadcast %14 : vector<1x32xf32> to vector<160x32xf32>
    %35 = arith.mulf %33, %34 : vector<160x32xf32>
    %36 = vector.broadcast %15 : vector<1x32xf32> to vector<160x32xf32>
    %37 = arith.addf %35, %36 : vector<160x32xf32>
    %c0_20 = arith.constant 0 : index
    %c0_21 = arith.constant 0 : index
    %38 = vector.load %arg8[%c0_20, %c0_21] : memref<160x32xf32, #tpu.memory_space<vmem>>, vector<160x32xf32>
    tpu.vector_store %arg8[%c0_20, %c0_21], %37 {strides = array<i32>} : memref<160x32xf32, #tpu.memory_space<vmem>>, vector<160x32xf32>,
    return
  }
  func.func @transform_0(%arg0: i32) -> (i32, i32) {
    %c0_i32 = arith.constant 0 : i32
    %c0_i32_0 = arith.constant 0 : i32
    return %arg0, %c0_i32 : i32, i32
  }
  func.func @transform_1(%arg0: i32) -> (i32, i32) {
    %c0_i32 = arith.constant 0 : i32
    %c0_i32_0 = arith.constant 0 : i32
    %c0_i32_1 = arith.constant 0 : i32
    return %c0_i32, %c0_i32_0 : i32, i32
  }
  func.func @transform_2(%arg0: i32) -> (i32, i32) {
    %c0_i32 = arith.constant 0 : i32
    %c0_i32_0 = arith.constant 0 : i32
    %c0_i32_1 = arith.constant 0 : i32
    return %c0_i32, %c0_i32_0 : i32, i32
  }
  func.func @transform_3(%arg0: i32) -> (i32, i32) {
    %c0_i32 = arith.constant 0 : i32
    %c0_i32_0 = arith.constant 0 : i32
    %c0_i32_1 = arith.constant 0 : i32
    return %c0_i32, %c0_i32_0 : i32, i32
  }
  func.func @transform_4(%arg0: i32) -> (i32, i32) {
    %c0_i32 = arith.constant 0 : i32
    %c0_i32_0 = arith.constant 0 : i32
    %c0_i32_1 = arith.constant 0 : i32
    return %c0_i32, %c0_i32_0 : i32, i32
  }
  func.func @transform_5(%arg0: i32) -> (i32, i32) {
    %c0_i32 = arith.constant 0 : i32
    %c0_i32_0 = arith.constant 0 : i32
    %c0_i32_1 = arith.constant 0 : i32
    return %c0_i32, %c0_i32_0 : i32, i32
  }
  func.func @transform_6(%arg0: i32) -> (i32, i32) {
    %c0_i32 = arith.constant 0 : i32
    %c0_i32_0 = arith.constant 0 : i32
    %c0_i32_1 = arith.constant 0 : i32
    return %c0_i32, %c0_i32_0 : i32, i32
  }
  func.func @transform_7(%arg0: i32) -> (i32, i32) {
    %c0_i32 = arith.constant 0 : i32
    %c0_i32_0 = arith.constant 0 : i32
    return %arg0, %c0_i32 : i32, i32
  }
}

</mosaic_0001>

<bundles_post_ra>
// kernel: tile.13
= control target key start
LH: loop header
LB: loop body
LE: loop exit
PB: predicated region body
PF: predicated region fallthrough
CT: control target
= control target key end

     0   :  { %s22_s0 = inlined_call_operand.vmem [shape: f32[8], index: 0, kind: input, shape index: {}]   ;;  %s23_s1 = inlined_call_operand.vmem [shape: f32[8,8], index: 1, kind: output, shape index: {}]  }
   0x1   :  { %v4_v0 = vld [vmem:[%s22_s0] ss:$0 sm:$0xff] }
   0x2   :  { %5 = vst [vmem:[%s23_s1] sm:$0xff] %v4_v0 }

// kernel: tile.18
= control target key start
LH: loop header
LB: loop body
LE: loop exit
PB: predicated region body
PF: predicated region fallthrough
CT: control target
= control target key end

     0   :  { %s22_s0 = inlined_call_operand.vmem [shape: f32[4], index: 0, kind: input, shape index: {}]   ;;  %s23_s1 = inlined_call_operand.vmem [shape: f32[4,4], index: 1, kind: output, shape index: {}]  }
   0x1   :  { %v4_v0 = vld [vmem:[%s22_s0] ss:$0 sm:$0xff] }
   0x2   :  { %5 = vst [vmem:[%s23_s1] sm:$0xf] %v4_v0 }

// kernel: dino_transformer_encoder_forward.9
= control target key start
LH: loop header
LB: loop body
LE: loop exit
PB: predicated region body
PF: predicated region fallthrough
CT: control target
= control target key end

     0   :  { %s309_s12 = smov 0   ;;  %s326_s0 = inlined_call_operand.vmem [shape: f32[2,80], index: 0, kind: input, shape index: {}]   ;;  %s327_s1 = inlined_call_operand.vmem [shape: f32[2,2,80], index: 1, kind: input, shape index: {}]   ;;  %s328_s2 = inlined_call_operand.vmem [shape: f32[2,4,80], index: 2, kind: input, shape index: {}]   ;;  %s329_s3 = inlined_call_operand.vmem [shape: f32[2,4,80], index: 3, kind: output, shape index: {}]  }
   0x1 LB: > { %s261_s13 = sadd.s32 4294967295, %s287_s12   ;;  %p265_p0 = scmp.ge.s32.totalorder %s287_s12, 1  ;;  %s287_s12 = sphi %s309_s12, %s13_s12  }
   0x2   : > { %p145_p1 = scmp.lt.s32.totalorder %s287_s12, 3 }
   0x4   : > { %p146_p2 = pnand %p265_p0, %p145_p1 }
   0x5   : > { %p171_p3 = scmp.lt.s32.totalorder (!%p146_p2), %s261_s13, 1  ;;  %v183_v1 = vld [vmem:[%s326_s0] sm:$0x3] (!%p146_p2)  ;;  %vm190_vm0 = vcmask (!%p146_p2), 1041408   ;;  %vm194_vm1 = vcmask (!%p146_p2), 650240  }
   0x6   : > { %149 = sbr.rel (%p146_p2) target bundleno = 36 (0x24), region = 32 }
   0xd   : > { %s331_s13 = smov (!%p171_p3, %s261_s13), 1 }
   0xe   : > { %s266_s14 = sshll.u32 %s331_s13, 1  ;;  %s267_s18 = sshll.u32 %s331_s13, 2 }
   0xf   : > { %s174_s17 = scalar_lea.vmem %s327_s1, %s266_s14  ;;  %s178_s23 = scalar_lea.vmem %s328_s2, %s267_s18 }
  0x10   : > { %v184_v0 = vld [vmem:[%s174_s17] sm:$0x3]  ;;  %s182_s26 = scalar_lea.vmem %s329_s3, %s267_s18 }
  0x11   : > { %279 = vrcp.f32 %v184_v0  ;;  %v192_v5 = vld [vmem:[%s178_s23] sm:$0xf] }
  0x1b   : > { %v280_v2 = vpop.eup %279 }
  0x1c   : > { %v186_v3 = vmul.f32 %v280_v2, %v183_v1 }
  0x1e   : > { %v188_v4 = vrot.slane %v186_v3, 6 }
  0x20   : > { %v191_v6 = vsel %vm190_vm0, %v186_v3, %v188_v4 }
  0x21   : > { %v193_v7 = vmul.f32 %v192_v5, %v191_v6 }
  0x23   : > { %195 = vst.msk [vmem:[%s182_s26] sm:$0xf] %vm194_vm1, %v193_v7 }
  0x24 PF: > { %s13_s12 = sadd.s32 1, %s287_s12  }
  0x25   : > { %p10_p4 = scmp.ge.s32.totalorder %s13_s12, 4  }
  0x27   :  { %12 = sbr.rel (!%p10_p4) target bundleno = 1 (0x1), region = 65 }

// kernel: dino_transformer_encoder_forward.11
= control target key start
LH: loop header
LB: loop body
LE: loop exit
PB: predicated region body
PF: predicated region fallthrough
CT: control target
= control target key end

     0   :  { %9 = vsyncpa [#allocation3], 0  ;;  %s787_s0 = inlined_call_operand.vmem [shape: f32[160,32], index: 0, kind: input, shape index: {}]   ;;  %s788_s1 = inlined_call_operand.vmem [shape: f32[160,32], index: 1, kind: input, shape index: {}]   ;;  %s789_s2 = inlined_call_operand.hbm [shape: f32[32,48], index: 2, kind: input, shape index: {}]   ;;  %s790_s3 = inlined_call_operand.hbm [shape: f32[1,48], index: 3, kind: input, shape index: {}]   ;;  %s791_s4 = inlined_call_operand.vmem [shape: f32[160,48], index: 4, kind: output, shape index: {}]  }
   0x1   :  { %10 = vsyncpa [#allocation5], 0  ;;  %s514_s15 = smov [#allocation2]   ;;  %s466_s19 = scalar_lea.hbm %s789_s2, 512 }
   0x2   :  { %s20_s16 = sshll.u32 %s514_s15, 4  ;;  %p467_p0 = scmp.ne.s32.totalorder %s789_s2, %s466_s19  ;;  %s21_s16 = int_to_ptr.vmem [resolvable:$true] %s20_s16 }
   0x3   :  { %p470_p1 = scmp.lt.u32.totalorder %s466_s19, %s789_s2 }
   0x5   :  { %p472_p2 = pnand %p470_p1, %p467_p0 }
   0x7   :  { %475 = shalt.err (!%p472_p2)
}
   0x8   :  { %s476_s24 = scalar_lea.vmem %s21_s16, 512  ;;  %p481_p4 = scmp.lt.s32.totalorder %s21_s16, %s21_s16 }
   0x9   :  { %p477_p3 = scmp.ne.s32.totalorder %s21_s16, %s476_s24  ;;  %p482_p5 = scmp.lt.s32.totalorder %s476_s24, %s476_s24 }
   0xb   :  { %p483_p6 = por %p482_p5, %p481_p4 }
   0xd   :  { %p484_p7 = pnand %p483_p6, %p477_p3 }
   0xf   :  { %487 = shalt.err (!%p484_p7)
}
  0x10   :  { %s515_s25 = smov 128   ;;  %s516_s26 = smov 8  }
  0x11   :  { %26 = dma.hbm_to_vmem [thread:$0]  %s789_s2, 512, %s21_s16, [#allocation3], %s515_s25, %s515_s25, %s516_s26  }
  0x12   :  { %s517_s29 = smov [#allocation4]   ;;  %s488_s7 = scalar_lea.hbm %s790_s3, 16 }
  0x13   :  { %s33_s30 = sshll.u32 %s517_s29, 4  ;;  %p489_p8 = scmp.ne.s32.totalorder %s790_s3, %s488_s7  ;;  %s34_s30 = int_to_ptr.vmem [resolvable:$true] %s33_s30 }
  0x14   :  { %p492_p9 = scmp.lt.u32.totalorder %s488_s7, %s790_s3 }
  0x16   :  { %p494_p10 = pnand %p492_p9, %p489_p8 }
  0x18   :  { %497 = shalt.err (!%p494_p10)
}
  0x19   :  { %s498_s12 = scalar_lea.vmem %s34_s30, 16  ;;  %s502_s2 = scalar_lea.vmem %s34_s30, 32 }
  0x1a   :  { %p499_p11 = scmp.ne.s32.totalorder %s34_s30, %s498_s12  ;;  %p503_p12 = scmp.lt.s32.totalorder %s34_s30, %s34_s30 }
  0x1b   :  { %p504_p13 = scmp.lt.s32.totalorder %s502_s2, %s498_s12 }
  0x1d   :  { %p505_p0 = por %p504_p13, %p503_p12 }
  0x1f   :  { %p506_p1 = pnand %p505_p0, %p499_p11 }
  0x21   :  { %509 = shalt.err (!%p506_p1)
}
  0x22   :  { %36 = dma.hbm_to_vmem [thread:$0]  %s790_s3, 16, %s34_s30, [#allocation5]  }
  0x23   :  { %510 = dma.done.wait [#allocation3], 512  }
  0x24   :  { %511 = vsyncadd [#allocation3], 4294966784 }
  0x25   :  { %512 = dma.done.wait [#allocation5], 16  }
  0x26   :  { %513 = vsyncadd [#allocation5], 4294967280  ;;  %v103_v0 = vld [vmem:[#allocation2] sm:$0xff]  ;;  %v104_v1 = vld [vmem:[#allocation2 + $0x8] sm:$0xff]  ;;  %vm114_vm0 = vcmask 261120   ;;  %vm340_vm1 = vcmask 392192  }
  0x27   :  { %v105_v2 = vld [vmem:[#allocation2 + $0x10] sm:$0xff]  ;;  %v450_v3 = vpack.c.bf16 %v104_v1, %v103_v0  ;;  %v106_v4 = vld [vmem:[#allocation2 + $0x18] sm:$0xff]  ;;  %v43_v5 = vld [vmem:[%s787_s0] sm:$0xff] }
  0x28   :  { %v63_v6 = vld [vmem:[%s788_s1] sm:$0xff]  ;;  %v454_v7 = vpack.c.bf16 %v106_v4, %v105_v2  ;;  %v53_v9 = vld [vmem:[%s787_s0 + $0x50] sm:$0xff]  ;;  %v44_v12 = vld [vmem:[%s787_s0 + $0x8] sm:$0xff] }
  0x29   :  { %v83_v8 = vadd.f32 %v63_v6, %v43_v5  ;;  %v73_v10 = vld [vmem:[%s788_s1 + $0x50] sm:$0xff]  ;;  %451 = vmatprep.subr.bf16.mxu0 %v450_v3  ;;  %458 = vmatprep.subr.bf16.mxu1 %v450_v3  ;;  %v64_v13 = vld [vmem:[%s788_s1 + $0x8] sm:$0xff]  ;;  %v54_v14 = vld [vmem:[%s787_s0 + $0x58] sm:$0xff] }
  0x2a   :  { %v93_v11 = vadd.f32 %v73_v10, %v53_v9  ;;  %453 = vmatpush3.bf16.msra.mxu0 %v450_v3  ;;  %460 = vmatpush3.bf16.msra.mxu1 %v450_v3  ;;  %v74_v15 = vld [vmem:[%s788_s1 + $0x58] sm:$0xff]  ;;  %v45_v16 = vld [vmem:[%s787_s0 + $0x10] sm:$0xff]  ;;  %v55_v18 = vld [vmem:[%s787_s0 + $0x60] sm:$0xff]  ;;  %v84_v20 = vadd.f32 %v64_v13, %v44_v12 }
  0x2b   :  { %455 = vmatprep.subr.bf16.mxu0 %v454_v7  ;;  %459 = vmatprep.subr.bf16.mxu1 %v454_v7  ;;  %v65_v17 = vld [vmem:[%s788_s1 + $0x10] sm:$0xff]  ;;  %v75_v19 = vld [vmem:[%s788_s1 + $0x60] sm:$0xff]  ;;  %v94_v21 = vadd.f32 %v74_v15, %v54_v14  ;;  %v46_v22 = vld [vmem:[%s787_s0 + $0x18] sm:$0xff] }
  0x2c   :  { %420 = vmatprep.mubr.msk.f32.mxu0 %vm114_vm0, %v83_v8  ;;  %435 = vmatprep.mubr.msk.f32.mxu1 %vm114_vm0, %v93_v11  ;;  %v66_v23 = vld [vmem:[%s788_s1 + $0x18] sm:$0xff]  ;;  %v85_v24 = vadd.f32 %v65_v17, %v45_v16  ;;  %v95_v25 = vadd.f32 %v75_v19, %v55_v18  ;;  %v56_v26 = vld [vmem:[%s787_s0 + $0x68] sm:$0xff]  ;;  %v47_v28 = vld [vmem:[%s787_s0 + $0x20] sm:$0xff] }
  0x2d   :  { %v76_v27 = vld [vmem:[%s788_s1 + $0x68] sm:$0xff]  ;;  %v67_v29 = vld [vmem:[%s788_s1 + $0x20] sm:$0xff]  ;;  %v57_v30 = vld [vmem:[%s787_s0 + $0x70] sm:$0xff]  ;;  %v86_v32 = vadd.f32 %v66_v23, %v46_v22 }
  0x2e   :  { %457 = vmatpush3.bf16.msra.mxu0 %v454_v7  ;;  %461 = vmatpush3.bf16.msra.mxu1 %v454_v7  ;;  %v77_v31 = vld [vmem:[%s788_s1 + $0x70] sm:$0xff]  ;;  %v96_v33 = vadd.f32 %v76_v27, %v56_v26  ;;  %v48_v34 = vld [vmem:[%s787_s0 + $0x28] sm:$0xff]  ;;  %v87_v36 = vadd.f32 %v67_v29, %v47_v28  ;;  %v58_v38 = vld [vmem:[%s787_s0 + $0x78] sm:$0xff] }
  0x2f   :  { %v68_v35 = vld [vmem:[%s788_s1 + $0x28] sm:$0xff]  ;;  %v97_v37 = vadd.f32 %v77_v31, %v57_v30  ;;  %v78_v39 = vld [vmem:[%s788_s1 + $0x78] sm:$0xff]  ;;  %v49_v40 = vld [vmem:[%s787_s0 + $0x30] sm:$0xff] }
  0x30   :  { %v69_v41 = vld [vmem:[%s788_s1 + $0x30] sm:$0xff]  ;;  %v59_v42 = vld [vmem:[%s787_s0 + $0x80] sm:$0xff]  ;;  %v88_v44 = vadd.f32 %v68_v35, %v48_v34  ;;  %v98_v45 = vadd.f32 %v78_v39, %v58_v38  ;;  %v50_v46 = vld [vmem:[%s787_s0 + $0x38] sm:$0xff] }
  0x31   :  { %421 = vmatmul.mubr.msk.f32.vlgmr.msra.gmra.mrb[0].mxu0 %vm114_vm0, %v84_v20  ;;  %436 = vmatmul.mubr.msk.f32.vlgmr.msra.gmra.mrb[0].mxu1 %vm114_vm0, %v94_v21  ;;  %v79_v43 = vld [vmem:[%s788_s1 + $0x80] sm:$0xff]  ;;  %v70_v47 = vld [vmem:[%s788_s1 + $0x38] sm:$0xff]  ;;  %v89_v48 = vadd.f32 %v69_v41, %v49_v40  ;;  %v60_v50 = vld [vmem:[%s787_s0 + $0x88] sm:$0xff] }
  0x32   :  { %423 = vmatprep.mubr.msk.f32.mxu0 %vm114_vm0, %v85_v24  ;;  %438 = vmatprep.mubr.msk.f32.mxu1 %vm114_vm0, %v95_v25  ;;  %v99_v49 = vadd.f32 %v79_v43, %v59_v42  ;;  %v80_v51 = vld [vmem:[%s788_s1 + $0x88] sm:$0xff]  ;;  %v51_v52 = vld [vmem:[%s787_s0 + $0x40] sm:$0xff]  ;;  %v61_v54 = vld [vmem:[%s787_s0 + $0x90] sm:$0xff]  ;;  %v90_v56 = vadd.f32 %v70_v47, %v50_v46 }
  0x33   :  { %v71_v53 = vld [vmem:[%s788_s1 + $0x40] sm:$0xff]  ;;  %v81_v55 = vld [vmem:[%s788_s1 + $0x90] sm:$0xff]  ;;  %v100_v57 = vadd.f32 %v80_v51, %v60_v50  ;;  %v52_v58 = vld [vmem:[%s787_s0 + $0x48] sm:$0xff] }
  0x34   :  { %v91_v59 = vadd.f32 %v71_v53, %v51_v52  ;;  %v101_v60 = vadd.f32 %v81_v55, %v61_v54  ;;  %v72_v61 = vld [vmem:[%s788_s1 + $0x48] sm:$0xff]  ;;  %v62_v62 = vld [vmem:[%s787_s0 + $0x98] sm:$0xff]  ;;  %v367_v2 = vld [vmem:[#allocation4] ss:$0 sm:$0xff] }
  0x35   :  { %424 = vmatmul.mubr.msk.f32.gmra.mrb[2].mxu0 %vm114_vm0, %v86_v32  ;;  %439 = vmatmul.mubr.msk.f32.gmra.mrb[2].mxu1 %vm114_vm0, %v96_v33  ;;  %v82_v63 = vld [vmem:[%s788_s1 + $0x98] sm:$0xff]  ;;  %v92_v0 = vadd.f32 %v72_v61, %v52_v58 }
  0x36   :  { %426 = vmatprep.mubr.msk.f32.mxu0 %vm114_vm0, %v87_v36  ;;  %441 = vmatprep.mubr.msk.f32.mxu1 %vm114_vm0, %v97_v37  ;;  %v102_v1 = vadd.f32 %v82_v63, %v62_v62 }
  0x39   :  { %427 = vmatmul.mubr.msk.f32.gmra.mrb[4].mxu0 %vm114_vm0, %v88_v44  ;;  %442 = vmatmul.mubr.msk.f32.gmra.mrb[4].mxu1 %vm114_vm0, %v98_v45 }
  0x3a   :  { %429 = vmatprep.mubr.msk.f32.mxu0 %vm114_vm0, %v89_v48  ;;  %444 = vmatprep.mubr.msk.f32.mxu1 %vm114_vm0, %v99_v49 }
  0x3d   :  { %430 = vmatmul.mubr.msk.f32.gmra.mrb[6].mxu0 %vm114_vm0, %v90_v56  ;;  %445 = vmatmul.mubr.msk.f32.gmra.mrb[6].mxu1 %vm114_vm0, %v100_v57 }
  0x3e   :  { %432 = vmatprep.mubr.msk.f32.mxu0 %vm114_vm0, %v91_v59  ;;  %447 = vmatprep.mubr.msk.f32.mxu1 %vm114_vm0, %v101_v60 }
  0x41   :  { %433 = vmatmul.mubr.msk.f32.gmra.mrb[8].mxu0 %vm114_vm0, %v92_v0  ;;  %448 = vmatmul.mubr.msk.f32.gmra.mrb[8].mxu1 %vm114_vm0, %v102_v1 }
 0x104   :  { %v422_v3 = vpop.f32.mrb[0].mxu0  ;;  %v437_v4 = vpop.f32.mrb[0].mxu1 }
 0x105   :  { %v247_v5 = vadd.f32 %v422_v3, %v367_v2  ;;  %v297_v6 = vadd.f32 %v437_v4, %v367_v2  ;;  %v241_v7 = vpop.f32.mrb[1].mxu0  ;;  %v291_v8 = vpop.f32.mrb[1].mxu1 }
 0x106   :  { %v242_v9 = vadd.f32 %v367_v2, %v241_v7  ;;  %v292_v10 = vadd.f32 %v367_v2, %v291_v8 }
 0x107   :  { %342 = vst.msk [vmem:[%s791_s4 + $0x8] sm:$0xff] %vm340_vm1, %v247_v5  ;;  %352 = vst.msk [vmem:[%s791_s4 + $0x58] sm:$0xff] %vm340_vm1, %v297_v6 }
 0x108   :  { %341 = vst.msk [vmem:[%s791_s4] sm:$0xff] %vm340_vm1, %v242_v9  ;;  %351 = vst.msk [vmem:[%s791_s4 + $0x50] sm:$0xff] %vm340_vm1, %v292_v10  ;;  %v425_v11 = vpop.f32.mrb[2].mxu0  ;;  %v440_v12 = vpop.f32.mrb[2].mxu1 }
 0x109   :  { %v257_v13 = vadd.f32 %v425_v11, %v367_v2  ;;  %v307_v14 = vadd.f32 %v440_v12, %v367_v2  ;;  %v251_v15 = vpop.f32.mrb[3].mxu0  ;;  %v301_v16 = vpop.f32.mrb[3].mxu1 }
 0x10a   :  { %v252_v17 = vadd.f32 %v367_v2, %v251_v15  ;;  %v302_v18 = vadd.f32 %v367_v2, %v301_v16 }
 0x10b   :  { %344 = vst.msk [vmem:[%s791_s4 + $0x18] sm:$0xff] %vm340_vm1, %v257_v13  ;;  %354 = vst.msk [vmem:[%s791_s4 + $0x68] sm:$0xff] %vm340_vm1, %v307_v14 }
 0x10c   :  { %343 = vst.msk [vmem:[%s791_s4 + $0x10] sm:$0xff] %vm340_vm1, %v252_v17  ;;  %353 = vst.msk [vmem:[%s791_s4 + $0x60] sm:$0xff] %vm340_vm1, %v302_v18  ;;  %v428_v19 = vpop.f32.mrb[4].mxu0  ;;  %v443_v20 = vpop.f32.mrb[4].mxu1 }
 0x10d   :  { %v267_v21 = vadd.f32 %v428_v19, %v367_v2  ;;  %v317_v22 = vadd.f32 %v443_v20, %v367_v2  ;;  %v261_v23 = vpop.f32.mrb[5].mxu0  ;;  %v311_v24 = vpop.f32.mrb[5].mxu1 }
 0x10e   :  { %v262_v25 = vadd.f32 %v367_v2, %v261_v23  ;;  %v312_v26 = vadd.f32 %v367_v2, %v311_v24 }
 0x10f   :  { %346 = vst.msk [vmem:[%s791_s4 + $0x28] sm:$0xff] %vm340_vm1, %v267_v21  ;;  %356 = vst.msk [vmem:[%s791_s4 + $0x78] sm:$0xff] %vm340_vm1, %v317_v22 }
 0x110   :  { %345 = vst.msk [vmem:[%s791_s4 + $0x20] sm:$0xff] %vm340_vm1, %v262_v25  ;;  %355 = vst.msk [vmem:[%s791_s4 + $0x70] sm:$0xff] %vm340_vm1, %v312_v26  ;;  %v431_v27 = vpop.f32.mrb[6].mxu0  ;;  %v446_v28 = vpop.f32.mrb[6].mxu1 }
 0x111   :  { %v277_v29 = vadd.f32 %v431_v27, %v367_v2  ;;  %v327_v30 = vadd.f32 %v446_v28, %v367_v2  ;;  %v271_v31 = vpop.f32.mrb[7].mxu0  ;;  %v321_v32 = vpop.f32.mrb[7].mxu1 }
 0x112   :  { %v272_v33 = vadd.f32 %v367_v2, %v271_v31  ;;  %v322_v34 = vadd.f32 %v367_v2, %v321_v32 }
 0x113   :  { %348 = vst.msk [vmem:[%s791_s4 + $0x38] sm:$0xff] %vm340_vm1, %v277_v29  ;;  %358 = vst.msk [vmem:[%s791_s4 + $0x88] sm:$0xff] %vm340_vm1, %v327_v30 }
 0x114   :  { %347 = vst.msk [vmem:[%s791_s4 + $0x30] sm:$0xff] %vm340_vm1, %v272_v33  ;;  %357 = vst.msk [vmem:[%s791_s4 + $0x80] sm:$0xff] %vm340_vm1, %v322_v34  ;;  %v434_v35 = vpop.f32.mrb[8].mxu0  ;;  %v449_v36 = vpop.f32.mrb[8].mxu1 }
 0x115   :  { %v287_v37 = vadd.f32 %v434_v35, %v367_v2  ;;  %v337_v38 = vadd.f32 %v449_v36, %v367_v2  ;;  %v281_v39 = vpop.f32.mrb[9].mxu0  ;;  %v331_v40 = vpop.f32.mrb[9].mxu1 }
 0x116   :  { %v282_v41 = vadd.f32 %v367_v2, %v281_v39  ;;  %v332_v42 = vadd.f32 %v367_v2, %v331_v40 }
 0x117   :  { %350 = vst.msk [vmem:[%s791_s4 + $0x48] sm:$0xff] %vm340_vm1, %v287_v37  ;;  %360 = vst.msk [vmem:[%s791_s4 + $0x98] sm:$0xff] %vm340_vm1, %v337_v38 }
 0x118   :  { %349 = vst.msk [vmem:[%s791_s4 + $0x40] sm:$0xff] %vm340_vm1, %v282_v41  ;;  %359 = vst.msk [vmem:[%s791_s4 + $0x90] sm:$0xff] %vm340_vm1, %v332_v42 }
 0x119   :  { %365 = vsyncpa [#allocation3], 1 }
 0x11a   :  { %366 = vsyncpa [#allocation5], 1 }

// kernel: dino_transformer_encoder_forward.10
= control target key start
LH: loop header
LB: loop body
LE: loop exit
PB: predicated region body
PF: predicated region fallthrough
CT: control target
= control target key end

     0   :  { %vm48_vm0 = vcmask 261120   ;;  %v536_v3 = vmov 0   ;;  %s831_s2 = inlined_call_operand.vmem [shape: f32[32,32], index: 2, kind: input, shape index: {}]   ;;  %s832_s0 = inlined_call_operand.vmem [shape: f32[160,32], index: 0, kind: input, shape index: {}]   ;;  %s833_s1 = inlined_call_operand.vmem [shape: f32[160,1], index: 1, kind: input, shape index: {}]   ;;  %s834_s3 = inlined_call_operand.vmem [shape: f32[1,32], index: 3, kind: input, shape index: {}]   ;;  %s835_s4 = inlined_call_operand.vmem [shape: f32[160,32], index: 4, kind: output, shape index: {}]  }
   0x1   :  { %v37_v0 = vld [vmem:[%s831_s2] sm:$0xff]  ;;  %v38_v1 = vld [vmem:[%s831_s2 + $0x8] sm:$0xff]  ;;  %v39_v2 = vld [vmem:[%s831_s2 + $0x10] sm:$0xff]  ;;  %535 = vset.pattern.permute.xlu1 %v536_v3  ;;  %534 = vset.pattern.permute.xlu0 %v536_v3 }
   0x2   :  { %v521_v4 = vpack.c.bf16 %v38_v1, %v37_v0  ;;  %v40_v5 = vld [vmem:[%s831_s2 + $0x18] sm:$0xff]  ;;  %v17_v6 = vld [vmem:[%s832_s0] sm:$0xff]  ;;  %v27_v7 = vld [vmem:[%s832_s0 + $0x50] sm:$0xff] }
   0x3   :  { %v525_v8 = vpack.c.bf16 %v40_v5, %v39_v2  ;;  %491 = vmatprep.mubr.msk.f32.mxu0 %vm48_vm0, %v17_v6  ;;  %506 = vmatprep.mubr.msk.f32.mxu1 %vm48_vm0, %v27_v7  ;;  %v18_v9 = vld [vmem:[%s832_s0 + $0x8] sm:$0xff]  ;;  %v28_v10 = vld [vmem:[%s832_s0 + $0x58] sm:$0xff]  ;;  %v276_v11 = vld [vmem:[%s833_s1 + $0x10] sm:$0xff] }
   0x4   :  { %522 = vmatprep.subr.bf16.mxu0 %v521_v4  ;;  %529 = vmatprep.subr.bf16.mxu1 %v521_v4  ;;  %v274_v12 = vld [vmem:[%s833_s1] sm:$0xff]  ;;  %v19_v13 = vld [vmem:[%s832_s0 + $0x10] sm:$0xff]  ;;  %v277_v15 = vld [vmem:[%s833_s1 + $0x18] sm:$0xff] }
   0x5   :  { %524 = vmatpush3.bf16.msra.mxu0 %v521_v4  ;;  %531 = vmatpush3.bf16.msra.mxu1 %v521_v4  ;;  %v29_v14 = vld [vmem:[%s832_s0 + $0x60] sm:$0xff]  ;;  %v275_v16 = vld [vmem:[%s833_s1 + $0x8] sm:$0xff]  ;;  %v20_v17 = vld [vmem:[%s832_s0 + $0x18] sm:$0xff] }
   0x6   :  { %526 = vmatprep.subr.bf16.mxu0 %v525_v8  ;;  %530 = vmatprep.subr.bf16.mxu1 %v525_v8  ;;  %v30_v18 = vld [vmem:[%s832_s0 + $0x68] sm:$0xff]  ;;  %v21_v19 = vld [vmem:[%s832_s0 + $0x20] sm:$0xff]  ;;  %v31_v20 = vld [vmem:[%s832_s0 + $0x70] sm:$0xff] }
   0x7   :  { %306 = vperm.xlu1 %535, %v276_v11   ;;  %296 = vperm.xlu0 %534, %v274_v12   ;;  %v279_v21 = vld [vmem:[%s833_s1 + $0x28] sm:$0xff]  ;;  %v278_v22 = vld [vmem:[%s833_s1 + $0x20] sm:$0xff]  ;;  %v32_v24 = vld [vmem:[%s832_s0 + $0x78] sm:$0xff] }
   0x8   :  { %v22_v23 = vld [vmem:[%s832_s0 + $0x28] sm:$0xff]  ;;  %v23_v25 = vld [vmem:[%s832_s0 + $0x30] sm:$0xff]  ;;  %v33_v26 = vld [vmem:[%s832_s0 + $0x80] sm:$0xff] }
   0x9   :  { %528 = vmatpush3.bf16.msra.mxu0 %v525_v8  ;;  %532 = vmatpush3.bf16.msra.mxu1 %v525_v8  ;;  %v281_v27 = vld [vmem:[%s833_s1 + $0x38] sm:$0xff]  ;;  %v280_v28 = vld [vmem:[%s833_s1 + $0x30] sm:$0xff]  ;;  %v34_v30 = vld [vmem:[%s832_s0 + $0x88] sm:$0xff] }
   0xa   :  { %v24_v29 = vld [vmem:[%s832_s0 + $0x38] sm:$0xff]  ;;  %v25_v31 = vld [vmem:[%s832_s0 + $0x40] sm:$0xff]  ;;  %v35_v32 = vld [vmem:[%s832_s0 + $0x90] sm:$0xff] }
   0xb   :  { %311 = vperm.xlu1 %535, %v277_v15   ;;  %301 = vperm.xlu0 %534, %v275_v16   ;;  %v283_v33 = vld [vmem:[%s833_s1 + $0x48] sm:$0xff]  ;;  %v282_v34 = vld [vmem:[%s833_s1 + $0x40] sm:$0xff]  ;;  %v36_v36 = vld [vmem:[%s832_s0 + $0x98] sm:$0xff] }
   0xc   :  { %492 = vmatmul.mubr.msk.f32.vlgmr.msra.gmra.mrb[0].mxu0 %vm48_vm0, %v18_v9  ;;  %507 = vmatmul.mubr.msk.f32.vlgmr.msra.gmra.mrb[0].mxu1 %vm48_vm0, %v28_v10  ;;  %v26_v35 = vld [vmem:[%s832_s0 + $0x48] sm:$0xff]  ;;  %v285_v37 = vld [vmem:[%s833_s1 + $0x58] sm:$0xff]  ;;  %v284_v38 = vld [vmem:[%s833_s1 + $0x50] sm:$0xff] }
   0xd   :  { %494 = vmatprep.mubr.msk.f32.mxu0 %vm48_vm0, %v19_v13  ;;  %509 = vmatprep.mubr.msk.f32.mxu1 %vm48_vm0, %v29_v14  ;;  %v287_v39 = vld [vmem:[%s833_s1 + $0x68] sm:$0xff]  ;;  %v286_v40 = vld [vmem:[%s833_s1 + $0x60] sm:$0xff]  ;;  %v289_v41 = vld [vmem:[%s833_s1 + $0x78] sm:$0xff] }
   0xe   :  { %v288_v42 = vld [vmem:[%s833_s1 + $0x70] sm:$0xff]  ;;  %v291_v43 = vld [vmem:[%s833_s1 + $0x88] sm:$0xff]  ;;  %v290_v44 = vld [vmem:[%s833_s1 + $0x80] sm:$0xff] }
   0xf   :  { %321 = vperm.xlu1 %535, %v279_v21   ;;  %316 = vperm.xlu0 %534, %v278_v22   ;;  %v293_v45 = vld [vmem:[%s833_s1 + $0x98] sm:$0xff]  ;;  %v292_v46 = vld [vmem:[%s833_s1 + $0x90] sm:$0xff]  ;;  %v725_v61 = vld [vmem:[%s834_s3] ss:$0 sm:$0xff] }
  0x10   :  { %495 = vmatmul.mubr.msk.f32.gmra.mrb[2].mxu0 %vm48_vm0, %v20_v17  ;;  %510 = vmatmul.mubr.msk.f32.gmra.mrb[2].mxu1 %vm48_vm0, %v30_v18 }
  0x11   :  { %497 = vmatprep.mubr.msk.f32.mxu0 %vm48_vm0, %v21_v19  ;;  %512 = vmatprep.mubr.msk.f32.mxu1 %vm48_vm0, %v31_v20 }
  0x13   :  { %331 = vperm.xlu1 %535, %v281_v27   ;;  %326 = vperm.xlu0 %534, %v280_v28  }
  0x14   :  { %498 = vmatmul.mubr.msk.f32.gmra.mrb[4].mxu0 %vm48_vm0, %v22_v23  ;;  %513 = vmatmul.mubr.msk.f32.gmra.mrb[4].mxu1 %vm48_vm0, %v32_v24 }
  0x15   :  { %500 = vmatprep.mubr.msk.f32.mxu0 %vm48_vm0, %v23_v25  ;;  %515 = vmatprep.mubr.msk.f32.mxu1 %vm48_vm0, %v33_v26 }
  0x17   :  { %341 = vperm.xlu1 %535, %v283_v33   ;;  %336 = vperm.xlu0 %534, %v282_v34  }
  0x18   :  { %501 = vmatmul.mubr.msk.f32.gmra.mrb[6].mxu0 %vm48_vm0, %v24_v29  ;;  %516 = vmatmul.mubr.msk.f32.gmra.mrb[6].mxu1 %vm48_vm0, %v34_v30 }
  0x19   :  { %503 = vmatprep.mubr.msk.f32.mxu0 %vm48_vm0, %v25_v31  ;;  %518 = vmatprep.mubr.msk.f32.mxu1 %vm48_vm0, %v35_v32 }
  0x1b   :  { %351 = vperm.xlu1 %535, %v285_v37   ;;  %346 = vperm.xlu0 %534, %v284_v38  }
  0x1c   :  { %504 = vmatmul.mubr.msk.f32.gmra.mrb[8].mxu0 %vm48_vm0, %v26_v35  ;;  %519 = vmatmul.mubr.msk.f32.gmra.mrb[8].mxu1 %vm48_vm0, %v36_v36 }
  0x1f   :  { %361 = vperm.xlu1 %535, %v287_v39   ;;  %356 = vperm.xlu0 %534, %v286_v40  }
  0x23   :  { %371 = vperm.xlu1 %535, %v289_v41   ;;  %366 = vperm.xlu0 %534, %v288_v42  }
  0x27   :  { %381 = vperm.xlu1 %535, %v291_v43   ;;  %376 = vperm.xlu0 %534, %v290_v44  }
  0x2b   :  { %391 = vperm.xlu1 %535, %v293_v45   ;;  %386 = vperm.xlu0 %534, %v292_v46  }
  0x86   :  { %v307_v47 = vpop.permute.xlu1 %306  ;;  %v297_v48 = vpop.permute.xlu0 %296 }
  0x8a   :  { %v312_v49 = vpop.permute.xlu1 %311  ;;  %v302_v50 = vpop.permute.xlu0 %301 }
  0x8e   :  { %v322_v51 = vpop.permute.xlu1 %321  ;;  %v317_v52 = vpop.permute.xlu0 %316 }
  0x92   :  { %v714_v53 = vpop.permute.xlu1 %331  ;;  %v716_v54 = vpop.permute.xlu0 %326 }
  0x96   :  { %v718_v55 = vpop.permute.xlu1 %341  ;;  %v720_v56 = vpop.permute.xlu0 %336 }
  0x9a   :  { %v352_v57 = vpop.permute.xlu1 %351  ;;  %v347_v58 = vpop.permute.xlu0 %346 }
  0x9e   :  { %v362_v59 = vpop.permute.xlu1 %361  ;;  %v357_v60 = vpop.permute.xlu0 %356 }
  0xa2   :  { %v372_v6 = vpop.permute.xlu1 %371  ;;  %v367_v7 = vpop.permute.xlu0 %366 }
  0xa6   :  { %v382_v32 = vpop.permute.xlu1 %381  ;;  %v377_v33 = vpop.permute.xlu0 %376 }
  0xdf   :  { %v493_v62 = vpop.f32.mrb[0].mxu0  ;;  %v508_v63 = vpop.f32.mrb[0].mxu1 }
  0xe0   :  { %v181_v0 = vadd.f32 %v493_v62, %v725_v61  ;;  %v231_v1 = vadd.f32 %v508_v63, %v725_v61  ;;  %v175_v2 = vpop.f32.mrb[1].mxu0  ;;  %v225_v3 = vpop.f32.mrb[1].mxu1 }
  0xe1   :  { %v176_v4 = vadd.f32 %v725_v61, %v175_v2  ;;  %v226_v5 = vadd.f32 %v725_v61, %v225_v3  ;;  %v387_v62 = vpop.permute.xlu0 %386 }
  0xe2   :  { %v395_v8 = vmul.f32 %v302_v50, %v181_v0  ;;  %v405_v9 = vmul.f32 %v352_v57, %v231_v1 }
  0xe3   :  { %v394_v10 = vmul.f32 %v297_v48, %v176_v4  ;;  %v404_v11 = vmul.f32 %v347_v58, %v226_v5  ;;  %v496_v12 = vpop.f32.mrb[2].mxu0  ;;  %v511_v13 = vpop.f32.mrb[2].mxu1 }
  0xe4   :  { %415 = vst.msk [vmem:[%s835_s4 + $0x8] sm:$0xff] %vm48_vm0, %v395_v8  ;;  %425 = vst.msk [vmem:[%s835_s4 + $0x58] sm:$0xff] %vm48_vm0, %v405_v9  ;;  %v191_v14 = vadd.f32 %v496_v12, %v725_v61  ;;  %v241_v15 = vadd.f32 %v511_v13, %v725_v61  ;;  %v185_v16 = vpop.f32.mrb[3].mxu0  ;;  %v235_v17 = vpop.f32.mrb[3].mxu1 }
  0xe5   :  { %414 = vst.msk [vmem:[%s835_s4] sm:$0xff] %vm48_vm0, %v394_v10  ;;  %424 = vst.msk [vmem:[%s835_s4 + $0x50] sm:$0xff] %vm48_vm0, %v404_v11  ;;  %v186_v18 = vadd.f32 %v725_v61, %v185_v16  ;;  %v236_v19 = vadd.f32 %v725_v61, %v235_v17 }
  0xe6   :  { %v397_v20 = vmul.f32 %v312_v49, %v191_v14  ;;  %v407_v21 = vmul.f32 %v362_v59, %v241_v15 }
  0xe7   :  { %v396_v22 = vmul.f32 %v307_v47, %v186_v18  ;;  %v406_v23 = vmul.f32 %v357_v60, %v236_v19  ;;  %v499_v24 = vpop.f32.mrb[4].mxu0  ;;  %v514_v25 = vpop.f32.mrb[4].mxu1 }
  0xe8   :  { %417 = vst.msk [vmem:[%s835_s4 + $0x18] sm:$0xff] %vm48_vm0, %v397_v20  ;;  %427 = vst.msk [vmem:[%s835_s4 + $0x68] sm:$0xff] %vm48_vm0, %v407_v21  ;;  %v201_v26 = vadd.f32 %v499_v24, %v725_v61  ;;  %v251_v27 = vadd.f32 %v514_v25, %v725_v61  ;;  %v195_v28 = vpop.f32.mrb[5].mxu0  ;;  %v245_v29 = vpop.f32.mrb[5].mxu1 }
  0xe9   :  { %416 = vst.msk [vmem:[%s835_s4 + $0x10] sm:$0xff] %vm48_vm0, %v396_v22  ;;  %426 = vst.msk [vmem:[%s835_s4 + $0x60] sm:$0xff] %vm48_vm0, %v406_v23  ;;  %v196_v30 = vadd.f32 %v725_v61, %v195_v28  ;;  %v246_v31 = vadd.f32 %v725_v61, %v245_v29 }
  0xea   :  { %v399_v34 = vmul.f32 %v322_v51, %v201_v26  ;;  %v409_v35 = vmul.f32 %v372_v6, %v251_v27 }
  0xeb   :  { %v398_v36 = vmul.f32 %v317_v52, %v196_v30  ;;  %v408_v37 = vmul.f32 %v367_v7, %v246_v31  ;;  %v502_v38 = vpop.f32.mrb[6].mxu0  ;;  %v517_v39 = vpop.f32.mrb[6].mxu1 }
  0xec   :  { %419 = vst.msk [vmem:[%s835_s4 + $0x28] sm:$0xff] %vm48_vm0, %v399_v34  ;;  %429 = vst.msk [vmem:[%s835_s4 + $0x78] sm:$0xff] %vm48_vm0, %v409_v35  ;;  %v211_v40 = vadd.f32 %v502_v38, %v725_v61  ;;  %v261_v41 = vadd.f32 %v517_v39, %v725_v61  ;;  %v205_v42 = vpop.f32.mrb[7].mxu0  ;;  %v255_v43 = vpop.f32.mrb[7].mxu1 }
  0xed   :  { %418 = vst.msk [vmem:[%s835_s4 + $0x20] sm:$0xff] %vm48_vm0, %v398_v36  ;;  %428 = vst.msk [vmem:[%s835_s4 + $0x70] sm:$0xff] %vm48_vm0, %v408_v37  ;;  %v206_v44 = vadd.f32 %v725_v61, %v205_v42  ;;  %v256_v45 = vadd.f32 %v725_v61, %v255_v43 }
  0xee   :  { %v401_v46 = vmul.f32 %v714_v53, %v211_v40  ;;  %v411_v47 = vmul.f32 %v382_v32, %v261_v41 }
  0xef   :  { %v400_v48 = vmul.f32 %v716_v54, %v206_v44  ;;  %v410_v49 = vmul.f32 %v377_v33, %v256_v45  ;;  %v505_v50 = vpop.f32.mrb[8].mxu0  ;;  %v520_v51 = vpop.f32.mrb[8].mxu1 }
  0xf0   :  { %421 = vst.msk [vmem:[%s835_s4 + $0x38] sm:$0xff] %vm48_vm0, %v401_v46  ;;  %431 = vst.msk [vmem:[%s835_s4 + $0x88] sm:$0xff] %vm48_vm0, %v411_v47  ;;  %v221_v52 = vadd.f32 %v505_v50, %v725_v61  ;;  %v271_v53 = vadd.f32 %v520_v51, %v725_v61  ;;  %v215_v57 = vpop.f32.mrb[9].mxu0  ;;  %v265_v58 = vpop.f32.mrb[9].mxu1 }
  0xf1   :  { %v392_v54 = vpop.permute.xlu1 %391  ;;  %420 = vst.msk [vmem:[%s835_s4 + $0x30] sm:$0xff] %vm48_vm0, %v400_v48  ;;  %430 = vst.msk [vmem:[%s835_s4 + $0x80] sm:$0xff] %vm48_vm0, %v410_v49  ;;  %v216_v59 = vadd.f32 %v725_v61, %v215_v57  ;;  %v266_v60 = vadd.f32 %v725_v61, %v265_v58 }
  0xf2   :  { %v403_v63 = vmul.f32 %v718_v55, %v221_v52  ;;  %v413_v0 = vmul.f32 %v392_v54, %v271_v53 }
  0xf3   :  { %v402_v1 = vmul.f32 %v720_v56, %v216_v59  ;;  %v412_v2 = vmul.f32 %v387_v62, %v266_v60 }
  0xf4   :  { %423 = vst.msk [vmem:[%s835_s4 + $0x48] sm:$0xff] %vm48_vm0, %v403_v63  ;;  %433 = vst.msk [vmem:[%s835_s4 + $0x98] sm:$0xff] %vm48_vm0, %v413_v0 }
  0xf5   :  { %422 = vst.msk [vmem:[%s835_s4 + $0x40] sm:$0xff] %vm48_vm0, %v402_v1  ;;  %432 = vst.msk [vmem:[%s835_s4 + $0x90] sm:$0xff] %vm48_vm0, %v412_v2 }

// kernel: dino_transformer_encoder_forward.12
= control target key start
LH: loop header
LB: loop body
LE: loop exit
PB: predicated region body
PF: predicated region fallthrough
CT: control target
= control target key end

     0   :  { %vm54_vm0 = vcmask 261120   ;;  %s1358_s1 = inlined_call_operand.vmem [shape: f32[32,32], index: 1, kind: input, shape index: {}]   ;;  %s1359_s0 = inlined_call_operand.vmem [shape: f32[160,32], index: 0, kind: input, shape index: {}]   ;;  %s1360_s2 = inlined_call_operand.vmem [shape: f32[1,32], index: 2, kind: input, shape index: {}]   ;;  %s1361_s3 = inlined_call_operand.vmem [shape: f32[160,32], index: 3, kind: input, shape index: {}]   ;;  %s1362_s4 = inlined_call_operand.vmem [shape: f32[1,32], index: 4, kind: input, shape index: {}]   ;;  %s1363_s5 = inlined_call_operand.vmem [shape: f32[1,32], index: 5, kind: input, shape index: {}]   ;;  %s1364_s6 = inlined_call_operand.vmem [shape: f32[160,32], index: 6, kind: output, shape index: {}]  }
   0x1   :  { %v43_v0 = vld [vmem:[%s1358_s1] sm:$0xff]  ;;  %v44_v1 = vld [vmem:[%s1358_s1 + $0x8] sm:$0xff]  ;;  %v45_v2 = vld [vmem:[%s1358_s1 + $0x10] sm:$0xff] }
   0x2   :  { %v744_v3 = vpack.c.bf16 %v44_v1, %v43_v0  ;;  %v46_v4 = vld [vmem:[%s1358_s1 + $0x18] sm:$0xff]  ;;  %v23_v5 = vld [vmem:[%s1359_s0] sm:$0xff]  ;;  %v33_v6 = vld [vmem:[%s1359_s0 + $0x50] sm:$0xff] }
   0x3   :  { %v748_v7 = vpack.c.bf16 %v46_v4, %v45_v2  ;;  %714 = vmatprep.mubr.msk.f32.mxu0 %vm54_vm0, %v23_v5  ;;  %729 = vmatprep.mubr.msk.f32.mxu1 %vm54_vm0, %v33_v6  ;;  %v24_v8 = vld [vmem:[%s1359_s0 + $0x8] sm:$0xff]  ;;  %v34_v9 = vld [vmem:[%s1359_s0 + $0x58] sm:$0xff]  ;;  %v25_v10 = vld [vmem:[%s1359_s0 + $0x10] sm:$0xff] }
   0x4   :  { %745 = vmatprep.subr.bf16.mxu0 %v744_v3  ;;  %752 = vmatprep.subr.bf16.mxu1 %v744_v3  ;;  %v35_v11 = vld [vmem:[%s1359_s0 + $0x60] sm:$0xff]  ;;  %v26_v12 = vld [vmem:[%s1359_s0 + $0x18] sm:$0xff]  ;;  %v36_v13 = vld [vmem:[%s1359_s0 + $0x68] sm:$0xff] }
   0x5   :  { %747 = vmatpush3.bf16.msra.mxu0 %v744_v3  ;;  %754 = vmatpush3.bf16.msra.mxu1 %v744_v3  ;;  %v27_v14 = vld [vmem:[%s1359_s0 + $0x20] sm:$0xff]  ;;  %v37_v15 = vld [vmem:[%s1359_s0 + $0x70] sm:$0xff]  ;;  %v28_v16 = vld [vmem:[%s1359_s0 + $0x28] sm:$0xff] }
   0x6   :  { %749 = vmatprep.subr.bf16.mxu0 %v748_v7  ;;  %753 = vmatprep.subr.bf16.mxu1 %v748_v7  ;;  %v38_v17 = vld [vmem:[%s1359_s0 + $0x78] sm:$0xff]  ;;  %v29_v18 = vld [vmem:[%s1359_s0 + $0x30] sm:$0xff]  ;;  %v39_v19 = vld [vmem:[%s1359_s0 + $0x80] sm:$0xff] }
   0x7   :  { %v30_v20 = vld [vmem:[%s1359_s0 + $0x38] sm:$0xff]  ;;  %v40_v21 = vld [vmem:[%s1359_s0 + $0x88] sm:$0xff]  ;;  %v31_v22 = vld [vmem:[%s1359_s0 + $0x40] sm:$0xff] }
   0x8   :  { %v41_v23 = vld [vmem:[%s1359_s0 + $0x90] sm:$0xff]  ;;  %v32_v24 = vld [vmem:[%s1359_s0 + $0x48] sm:$0xff]  ;;  %v42_v25 = vld [vmem:[%s1359_s0 + $0x98] sm:$0xff] }
   0x9   :  { %751 = vmatpush3.bf16.msra.mxu0 %v748_v7  ;;  %755 = vmatpush3.bf16.msra.mxu1 %v748_v7  ;;  %v926_v26 = vld [vmem:[%s1360_s2] ss:$0 sm:$0xff]  ;;  %v291_v29 = vld [vmem:[%s1361_s3 + $0x58] sm:$0xff]  ;;  %v281_v30 = vld [vmem:[%s1361_s3 + $0x8] sm:$0xff] }
   0xa   :  { %v280_v35 = vld [vmem:[%s1361_s3] sm:$0xff]  ;;  %v283_v42 = vld [vmem:[%s1361_s3 + $0x18] sm:$0xff]  ;;  %v293_v44 = vld [vmem:[%s1361_s3 + $0x68] sm:$0xff] }
   0xb   :  { %v290_v51 = vld [vmem:[%s1361_s3 + $0x50] sm:$0xff]  ;;  %v292_v0 = vld [vmem:[%s1361_s3 + $0x60] sm:$0xff]  ;;  %v285_v4 = vld [vmem:[%s1361_s3 + $0x28] sm:$0xff] }
   0xc   :  { %715 = vmatmul.mubr.msk.f32.vlgmr.msra.gmra.mrb[0].mxu0 %vm54_vm0, %v24_v8  ;;  %730 = vmatmul.mubr.msk.f32.vlgmr.msra.gmra.mrb[0].mxu1 %vm54_vm0, %v34_v9  ;;  %v282_v63 = vld [vmem:[%s1361_s3 + $0x10] sm:$0xff]  ;;  %v284_v5 = vld [vmem:[%s1361_s3 + $0x20] sm:$0xff] }
   0xd   :  { %717 = vmatprep.mubr.msk.f32.mxu0 %vm54_vm0, %v25_v10  ;;  %732 = vmatprep.mubr.msk.f32.mxu1 %vm54_vm0, %v35_v11 }
  0x10   :  { %718 = vmatmul.mubr.msk.f32.gmra.mrb[2].mxu0 %vm54_vm0, %v26_v12  ;;  %733 = vmatmul.mubr.msk.f32.gmra.mrb[2].mxu1 %vm54_vm0, %v36_v13 }
  0x11   :  { %720 = vmatprep.mubr.msk.f32.mxu0 %vm54_vm0, %v27_v14  ;;  %735 = vmatprep.mubr.msk.f32.mxu1 %vm54_vm0, %v37_v15 }
  0x14   :  { %721 = vmatmul.mubr.msk.f32.gmra.mrb[4].mxu0 %vm54_vm0, %v28_v16  ;;  %736 = vmatmul.mubr.msk.f32.gmra.mrb[4].mxu1 %vm54_vm0, %v38_v17  ;;  %v295_v17 = vld [vmem:[%s1361_s3 + $0x78] sm:$0xff] }
  0x15   :  { %723 = vmatprep.mubr.msk.f32.mxu0 %vm54_vm0, %v29_v18  ;;  %738 = vmatprep.mubr.msk.f32.mxu1 %vm54_vm0, %v39_v19  ;;  %v294_v18 = vld [vmem:[%s1361_s3 + $0x70] sm:$0xff] }
  0x18   :  { %724 = vmatmul.mubr.msk.f32.gmra.mrb[6].mxu0 %vm54_vm0, %v30_v20  ;;  %739 = vmatmul.mubr.msk.f32.gmra.mrb[6].mxu1 %vm54_vm0, %v40_v21 }
  0x19   :  { %726 = vmatprep.mubr.msk.f32.mxu0 %vm54_vm0, %v31_v22  ;;  %741 = vmatprep.mubr.msk.f32.mxu1 %vm54_vm0, %v41_v23 }
  0x1c   :  { %727 = vmatmul.mubr.msk.f32.gmra.mrb[8].mxu0 %vm54_vm0, %v32_v24  ;;  %742 = vmatmul.mubr.msk.f32.gmra.mrb[8].mxu1 %vm54_vm0, %v42_v25 }
  0xdf   :  { %v716_v27 = vpop.f32.mrb[0].mxu0  ;;  %v731_v28 = vpop.f32.mrb[0].mxu1 }
  0xe0   :  { %v187_v31 = vadd.f32 %v716_v27, %v926_v26  ;;  %v237_v32 = vadd.f32 %v731_v28, %v926_v26  ;;  %v181_v33 = vpop.f32.mrb[1].mxu0  ;;  %v231_v34 = vpop.f32.mrb[1].mxu1 }
  0xe1   :  { %v182_v36 = vadd.f32 %v926_v26, %v181_v33  ;;  %v232_v39 = vadd.f32 %v926_v26, %v231_v34  ;;  %v286_v33 = vld [vmem:[%s1361_s3 + $0x30] sm:$0xff] }
  0xe2   :  { %v940_v37 = vadd.f32 %v291_v29, %v237_v32  ;;  %v942_v38 = vadd.f32 %v281_v30, %v187_v31  ;;  %v287_v32 = vld [vmem:[%s1361_s3 + $0x38] sm:$0xff] }
  0xe3   :  { %v719_v40 = vpop.f32.mrb[2].mxu0  ;;  %v734_v41 = vpop.f32.mrb[2].mxu1  ;;  %v948_v43 = vadd.f32 %v280_v35, %v182_v36  ;;  %v966_v54 = vadd.f32 %v290_v51, %v232_v39  ;;  %v289_v51 = vld [vmem:[%s1361_s3 + $0x48] sm:$0xff] }
  0xe4   :  { %v197_v45 = vadd.f32 %v719_v40, %v926_v26  ;;  %v191_v46 = vpop.f32.mrb[3].mxu0  ;;  %v355_v47 = vsel %vm54_vm0, %v940_v37, 0.0  ;;  %v325_v48 = vsel %vm54_vm0, %v942_v38, 0.0  ;;  %v247_v49 = vadd.f32 %v734_v41, %v926_v26  ;;  %v241_v50 = vpop.f32.mrb[3].mxu1 }
  0xe5   :  { %356 = vadd.xlane.f32.xlu1 %v355_v47  ;;  %326 = vadd.xlane.f32.xlu0 %v325_v48  ;;  %v192_v57 = vadd.f32 %v926_v26, %v191_v46  ;;  %v242_v58 = vadd.f32 %v926_v26, %v241_v50  ;;  %v322_v60 = vsel %vm54_vm0, %v948_v43, 0.0  ;;  %v352_v8 = vsel %vm54_vm0, %v966_v54, 0.0 }
  0xe6   :  { %v962_v52 = vadd.f32 %v283_v42, %v197_v45  ;;  %v964_v53 = vadd.f32 %v293_v44, %v247_v49  ;;  %v297_v42 = vld [vmem:[%s1361_s3 + $0x88] sm:$0xff]  ;;  %v296_v44 = vld [vmem:[%s1361_s3 + $0x80] sm:$0xff] }
  0xe7   :  { %v722_v55 = vpop.f32.mrb[4].mxu0  ;;  %v737_v56 = vpop.f32.mrb[4].mxu1  ;;  %v992_v9 = vadd.f32 %v282_v63, %v192_v57  ;;  %v994_v10 = vadd.f32 %v292_v0, %v242_v58  ;;  %v298_v63 = vld [vmem:[%s1361_s3 + $0x90] sm:$0xff] }
  0xe8   :  { %v331_v59 = vsel %vm54_vm0, %v962_v52, 0.0  ;;  %v201_v61 = vpop.f32.mrb[5].mxu0  ;;  %v251_v62 = vpop.f32.mrb[5].mxu1  ;;  %v361_v1 = vsel %vm54_vm0, %v964_v53, 0.0  ;;  %v207_v2 = vadd.f32 %v722_v55, %v926_v26  ;;  %v257_v13 = vadd.f32 %v737_v56, %v926_v26  ;;  %v288_v55 = vld [vmem:[%s1361_s3 + $0x40] sm:$0xff] }
  0xe9   :  { %332 = vadd.xlane.f32.xlu1 %v331_v59  ;;  %323 = vadd.xlane.f32.xlu0 %v322_v60  ;;  %v202_v3 = vadd.f32 %v926_v26, %v201_v61  ;;  %v252_v14 = vadd.f32 %v926_v26, %v251_v62  ;;  %v328_v21 = vsel %vm54_vm0, %v992_v9, 0.0  ;;  %v358_v22 = vsel %vm54_vm0, %v994_v10, 0.0  ;;  %v299_v62 = vld [vmem:[%s1361_s3 + $0x98] sm:$0xff] }
  0xea   :  { %v998_v15 = vadd.f32 %v285_v4, %v207_v2  ;;  %v1012_v25 = vadd.f32 %v295_v17, %v257_v13 }
  0xeb   :  { %v725_v6 = vpop.f32.mrb[6].mxu0  ;;  %v740_v7 = vpop.f32.mrb[6].mxu1  ;;  %v1000_v16 = vadd.f32 %v284_v5, %v202_v3  ;;  %v1014_v27 = vadd.f32 %v294_v18, %v252_v14 }
  0xec   :  { %v211_v11 = vpop.f32.mrb[7].mxu0  ;;  %v261_v12 = vpop.f32.mrb[7].mxu1  ;;  %v337_v28 = vsel %vm54_vm0, %v998_v15, 0.0  ;;  %v217_v30 = vadd.f32 %v725_v6, %v926_v26  ;;  %v267_v34 = vadd.f32 %v740_v7, %v926_v26  ;;  %v367_v36 = vsel %vm54_vm0, %v1012_v25, 0.0 }
  0xed   :  { %362 = vadd.xlane.f32.xlu1 %v361_v1  ;;  %353 = vadd.xlane.f32.xlu0 %v352_v8  ;;  %v334_v29 = vsel %vm54_vm0, %v1000_v16, 0.0  ;;  %v212_v31 = vadd.f32 %v926_v26, %v211_v11  ;;  %v262_v35 = vadd.f32 %v926_v26, %v261_v12  ;;  %v364_v39 = vsel %vm54_vm0, %v1014_v27, 0.0 }
  0xee   :  { %v1034_v40 = vadd.f32 %v287_v32, %v217_v30  ;;  %v1044_v45 = vadd.f32 %v297_v42, %v267_v34 }
  0xef   :  { %v728_v19 = vpop.f32.mrb[8].mxu0  ;;  %v743_v20 = vpop.f32.mrb[8].mxu1  ;;  %v1036_v41 = vadd.f32 %v286_v33, %v212_v31  ;;  %v1046_v46 = vadd.f32 %v296_v44, %v262_v35 }
  0xf0   :  { %v221_v23 = vpop.f32.mrb[9].mxu0  ;;  %v271_v24 = vpop.f32.mrb[9].mxu1  ;;  %v343_v47 = vsel %vm54_vm0, %v1034_v40, 0.0  ;;  %v227_v49 = vadd.f32 %v728_v19, %v926_v26  ;;  %v373_v56 = vsel %vm54_vm0, %v1044_v45, 0.0  ;;  %v277_v57 = vadd.f32 %v743_v20, %v926_v26 }
  0xf1   :  { %329 = vadd.xlane.f32.xlu1 %v328_v21  ;;  %359 = vadd.xlane.f32.xlu0 %v358_v22  ;;  %v340_v48 = vsel %vm54_vm0, %v1036_v41, 0.0  ;;  %v222_v50 = vadd.f32 %v926_v26, %v221_v23  ;;  %v370_v58 = vsel %vm54_vm0, %v1046_v46, 0.0  ;;  %v272_v59 = vadd.f32 %v926_v26, %v271_v24 }
  0xf2   :  { %v1066_v60 = vadd.f32 %v289_v51, %v227_v49  ;;  %v1080_v1 = vadd.f32 %v299_v62, %v277_v57 }
  0xf3   :  { %v1068_v61 = vadd.f32 %v288_v55, %v222_v50  ;;  %v1082_v2 = vadd.f32 %v298_v63, %v272_v59 }
  0xf4   :  { %v349_v0 = vsel %vm54_vm0, %v1066_v60, 0.0  ;;  %v379_v3 = vsel %vm54_vm0, %v1080_v1, 0.0 }
  0xf5   :  { %338 = vadd.xlane.f32.xlu1 %v337_v28  ;;  %335 = vadd.xlane.f32.xlu0 %v334_v29  ;;  %v346_v26 = vsel %vm54_vm0, %v1068_v61, 0.0  ;;  %v376_v4 = vsel %vm54_vm0, %v1082_v2, 0.0 }
  0xf9   :  { %368 = vadd.xlane.f32.xlu1 %v367_v36  ;;  %365 = vadd.xlane.f32.xlu0 %v364_v39 }
  0xfd   :  { %344 = vadd.xlane.f32.xlu1 %v343_v47  ;;  %341 = vadd.xlane.f32.xlu0 %v340_v48 }
 0x101   :  { %374 = vadd.xlane.f32.xlu1 %v373_v56  ;;  %371 = vadd.xlane.f32.xlu0 %v370_v58 }
 0x105   :  { %350 = vadd.xlane.f32.xlu1 %v349_v0  ;;  %347 = vadd.xlane.f32.xlu0 %v346_v26 }
 0x109   :  { %380 = vadd.xlane.f32.xlu1 %v379_v3  ;;  %377 = vadd.xlane.f32.xlu0 %v376_v4 }
 0x172   :  { %v357_v5 = vpop.xlane.xlu1 %356  ;;  %v327_v6 = vpop.xlane.xlu0 %326 }
 0x173   :  { %v394_v7 = vmul.f32 0.03125, %v357_v5  ;;  %v384_v8 = vmul.f32 0.03125, %v327_v6 }
 0x175   :  { %v1089_v11 = vsub.f32 %v940_v37, %v394_v7  ;;  %v1092_v12 = vsub.f32 %v942_v38, %v384_v8 }
 0x176   :  { %v333_v13 = vpop.xlane.xlu1 %332  ;;  %v324_v14 = vpop.xlane.xlu0 %323 }
 0x177   :  { %v386_v17 = vmul.f32 0.03125, %v333_v13  ;;  %v383_v18 = vmul.f32 0.03125, %v324_v14  ;;  %v424_v19 = vmul.f32 %v1092_v12, %v1092_v12  ;;  %v434_v37 = vmul.f32 %v1089_v11, %v1089_v11 }
 0x179   :  { %v1097_v20 = vsub.f32 %v962_v52, %v386_v17  ;;  %v1100_v21 = vsub.f32 %v948_v43, %v383_v18  ;;  %v446_v22 = vsel %vm54_vm0, %v424_v19, 0.0  ;;  %v476_v31 = vsel %vm54_vm0, %v434_v37, 0.0 }
 0x17a   :  { %v363_v38 = vpop.xlane.xlu1 %362  ;;  %447 = vadd.xlane.f32.xlu1 %v446_v22  ;;  %v354_v23 = vpop.xlane.xlu0 %353 }
 0x17b   :  { %v396_v24 = vmul.f32 0.03125, %v363_v38  ;;  %v393_v28 = vmul.f32 0.03125, %v354_v23  ;;  %v423_v29 = vmul.f32 %v1100_v21, %v1100_v21  ;;  %v426_v52 = vmul.f32 %v1097_v20, %v1097_v20 }
 0x17d   :  { %v1110_v30 = vsub.f32 %v964_v53, %v396_v24  ;;  %v1113_v43 = vsub.f32 %v966_v54, %v393_v28  ;;  %v443_v32 = vsel %vm54_vm0, %v423_v29, 0.0  ;;  %v452_v42 = vsel %vm54_vm0, %v426_v52, 0.0 }
 0x17e   :  { %477 = vadd.xlane.f32.xlu1 %v476_v31  ;;  %v330_v33 = vpop.xlane.xlu1 %329  ;;  %444 = vadd.xlane.f32.xlu0 %v443_v32  ;;  %v360_v34 = vpop.xlane.xlu0 %359 }
 0x17f   :  { %v385_v35 = vmul.f32 0.03125, %v330_v33  ;;  %v395_v36 = vmul.f32 0.03125, %v360_v34  ;;  %v433_v39 = vmul.f32 %v1113_v43, %v1113_v43  ;;  %v436_v47 = vmul.f32 %v1110_v30, %v1110_v30 }
 0x181   :  { %v1121_v53 = vsub.f32 %v992_v9, %v385_v35  ;;  %v1124_v54 = vsub.f32 %v994_v10, %v395_v36  ;;  %v473_v44 = vsel %vm54_vm0, %v433_v39, 0.0  ;;  %v482_v57 = vsel %vm54_vm0, %v436_v47, 0.0 }
 0x182   :  { %453 = vadd.xlane.f32.xlu1 %v452_v42  ;;  %v339_v48 = vpop.xlane.xlu1 %338  ;;  %474 = vadd.xlane.f32.xlu0 %v473_v44  ;;  %v336_v49 = vpop.xlane.xlu0 %335 }
 0x183   :  { %v388_v50 = vmul.f32 0.03125, %v339_v48  ;;  %v387_v51 = vmul.f32 0.03125, %v336_v49  ;;  %v425_v55 = vmul.f32 %v1121_v53, %v1121_v53  ;;  %v435_v9 = vmul.f32 %v1124_v54, %v1124_v54 }
 0x185   :  { %v1134_v10 = vsub.f32 %v998_v15, %v388_v50  ;;  %v1137_v56 = vsub.f32 %v1000_v16, %v387_v51  ;;  %v449_v58 = vsel %vm54_vm0, %v425_v55, 0.0  ;;  %v479_v3 = vsel %vm54_vm0, %v435_v9, 0.0 }
 0x186   :  { %483 = vadd.xlane.f32.xlu1 %v482_v57  ;;  %v369_v59 = vpop.xlane.xlu1 %368  ;;  %450 = vadd.xlane.f32.xlu0 %v449_v58  ;;  %v366_v62 = vpop.xlane.xlu0 %365 }
 0x187   :  { %v398_v63 = vmul.f32 0.03125, %v369_v59  ;;  %v397_v0 = vmul.f32 0.03125, %v366_v62  ;;  %v428_v26 = vmul.f32 %v1134_v10, %v1134_v10  ;;  %v427_v5 = vmul.f32 %v1137_v56, %v1137_v56 }
 0x189   :  { %v1145_v15 = vsub.f32 %v1012_v25, %v398_v63  ;;  %v1148_v16 = vsub.f32 %v1014_v27, %v397_v0  ;;  %v458_v4 = vsel %vm54_vm0, %v428_v26, 0.0  ;;  %v455_v19 = vsel %vm54_vm0, %v427_v5, 0.0 }
 0x18a   :  { %459 = vadd.xlane.f32.xlu1 %v458_v4  ;;  %v345_v6 = vpop.xlane.xlu1 %344  ;;  %480 = vadd.xlane.f32.xlu0 %v479_v3  ;;  %v342_v7 = vpop.xlane.xlu0 %341 }
 0x18b   :  { %v390_v8 = vmul.f32 0.03125, %v345_v6  ;;  %v389_v13 = vmul.f32 0.03125, %v342_v7  ;;  %v438_v14 = vmul.f32 %v1145_v15, %v1145_v15  ;;  %v437_v25 = vmul.f32 %v1148_v16, %v1148_v16 }
 0x18d   :  { %v1158_v27 = vsub.f32 %v1034_v40, %v390_v8  ;;  %v1161_v17 = vsub.f32 %v1036_v41, %v389_v13  ;;  %v488_v18 = vsel %vm54_vm0, %v438_v14, 0.0  ;;  %v485_v28 = vsel %vm54_vm0, %v437_v25, 0.0 }
 0x18e   :  { %489 = vadd.xlane.f32.xlu1 %v488_v18  ;;  %v375_v22 = vpop.xlane.xlu1 %374  ;;  %456 = vadd.xlane.f32.xlu0 %v455_v19  ;;  %v372_v37 = vpop.xlane.xlu0 %371 }
 0x18f   :  { %v400_v38 = vmul.f32 0.03125, %v375_v22  ;;  %v399_v23 = vmul.f32 0.03125, %v372_v37  ;;  %v430_v24 = vmul.f32 %v1158_v27, %v1158_v27  ;;  %v429_v52 = vmul.f32 %v1161_v17, %v1161_v17 }
 0x191   :  { %v1169_v40 = vsub.f32 %v1044_v45, %v400_v38  ;;  %v1172_v41 = vsub.f32 %v1046_v46, %v399_v23  ;;  %v464_v29 = vsel %vm54_vm0, %v430_v24, 0.0  ;;  %v461_v42 = vsel %vm54_vm0, %v429_v52, 0.0 }
 0x192   :  { %465 = vadd.xlane.f32.xlu1 %v464_v29  ;;  %v351_v31 = vpop.xlane.xlu1 %350  ;;  %486 = vadd.xlane.f32.xlu0 %v485_v28  ;;  %v348_v32 = vpop.xlane.xlu0 %347  ;;  %v1211_v28 = vld [vmem:[%s1362_s4] ss:$0 sm:$0xff] }
 0x193   :  { %v392_v33 = vmul.f32 0.03125, %v351_v31  ;;  %v391_v34 = vmul.f32 0.03125, %v348_v32  ;;  %v440_v35 = vmul.f32 %v1169_v40, %v1169_v40  ;;  %v439_v45 = vmul.f32 %v1172_v41, %v1172_v41 }
 0x195   :  { %v1182_v46 = vsub.f32 %v1066_v60, %v392_v33  ;;  %v1185_v36 = vsub.f32 %v1068_v61, %v391_v34  ;;  %v494_v39 = vsel %vm54_vm0, %v440_v35, 0.0  ;;  %v491_v51 = vsel %vm54_vm0, %v439_v45, 0.0  ;;  %v1217_v34 = vld [vmem:[%s1363_s5] ss:$0 sm:$0xff] }
 0x196   :  { %495 = vadd.xlane.f32.xlu1 %v494_v39  ;;  %v381_v44 = vpop.xlane.xlu1 %380  ;;  %462 = vadd.xlane.f32.xlu0 %v461_v42  ;;  %v378_v47 = vpop.xlane.xlu0 %377 }
 0x197   :  { %v402_v48 = vmul.f32 0.03125, %v381_v44  ;;  %v401_v49 = vmul.f32 0.03125, %v378_v47  ;;  %v432_v50 = vmul.f32 %v1182_v46, %v1182_v46  ;;  %v431_v9 = vmul.f32 %v1185_v36, %v1185_v36 }
 0x199   :  { %v1193_v60 = vsub.f32 %v1080_v1, %v402_v48  ;;  %v1196_v61 = vsub.f32 %v1082_v2, %v401_v49  ;;  %v470_v55 = vsel %vm54_vm0, %v432_v50, 0.0  ;;  %v467_v59 = vsel %vm54_vm0, %v431_v9, 0.0 }
 0x19a   :  { %471 = vadd.xlane.f32.xlu1 %v470_v55  ;;  %492 = vadd.xlane.f32.xlu0 %v491_v51 }
 0x19b   :  { %v442_v57 = vmul.f32 %v1193_v60, %v1193_v60  ;;  %v441_v1 = vmul.f32 %v1196_v61, %v1196_v61 }
 0x19d   :  { %v500_v58 = vsel %vm54_vm0, %v442_v57, 0.0  ;;  %v497_v2 = vsel %vm54_vm0, %v441_v1, 0.0 }
 0x19e   :  { %501 = vadd.xlane.f32.xlu1 %v500_v58  ;;  %468 = vadd.xlane.f32.xlu0 %v467_v59 }
 0x1a2   :  { %498 = vadd.xlane.f32.xlu0 %v497_v2 }
 0x207   :  { %v448_v62 = vpop.xlane.xlu1 %447 }
 0x208   :  { %v504_v63 = vmul.f32 0.03125, %v448_v62 }
 0x20a   :  { %v524_v0 = vadd.f32 1e-05, %v504_v63 }
 0x20b   :  { %v478_v26 = vpop.xlane.xlu1 %477  ;;  %v445_v3 = vpop.xlane.xlu0 %444 }
 0x20c   :  { %756 = vrsqrt.f32 %v524_v0  ;;  %v514_v4 = vmul.f32 0.03125, %v478_v26  ;;  %v503_v5 = vmul.f32 0.03125, %v445_v3 }
 0x20e   :  { %v534_v6 = vadd.f32 1e-05, %v514_v4  ;;  %v523_v7 = vadd.f32 1e-05, %v503_v5 }
 0x20f   :  { %v454_v8 = vpop.xlane.xlu1 %453  ;;  %v475_v13 = vpop.xlane.xlu0 %474 }
 0x210   :  { %758 = vrsqrt.f32 %v534_v6  ;;  %v506_v14 = vmul.f32 0.03125, %v454_v8  ;;  %v513_v25 = vmul.f32 0.03125, %v475_v13 }
 0x211   :  { %760 = vrsqrt.f32 %v523_v7 }
 0x212   :  { %v526_v18 = vadd.f32 1e-05, %v506_v14  ;;  %v533_v19 = vadd.f32 1e-05, %v513_v25 }
 0x213   :  { %v484_v22 = vpop.xlane.xlu1 %483  ;;  %v451_v37 = vpop.xlane.xlu0 %450 }
 0x214   :  { %762 = vrsqrt.f32 %v526_v18  ;;  %v516_v38 = vmul.f32 0.03125, %v484_v22  ;;  %v505_v23 = vmul.f32 0.03125, %v451_v37 }
 0x215   :  { %764 = vrsqrt.f32 %v533_v19 }
 0x216   :  { %v757_v24 = vpop.eup %756  ;;  %v536_v29 = vadd.f32 1e-05, %v516_v38  ;;  %v525_v52 = vadd.f32 1e-05, %v505_v23 }
 0x217   :  { %v564_v31 = vmul.f32 %v757_v24, %v1092_v12  ;;  %v460_v32 = vpop.xlane.xlu1 %459  ;;  %v481_v33 = vpop.xlane.xlu0 %480 }
 0x218   :  { %766 = vrsqrt.f32 %v536_v29  ;;  %v508_v35 = vmul.f32 0.03125, %v460_v32  ;;  %v515_v45 = vmul.f32 0.03125, %v481_v33 }
 0x219   :  { %v590_v39 = vmul.f32 %v1211_v28, %v564_v31  ;;  %768 = vrsqrt.f32 %v525_v52 }
 0x21a   :  { %v759_v42 = vpop.eup %758  ;;  %v528_v44 = vadd.f32 1e-05, %v508_v35  ;;  %v535_v47 = vadd.f32 1e-05, %v515_v45 }
 0x21b   :  { %v761_v48 = vpop.eup %760  ;;  %v616_v49 = vadd.f32 %v1217_v34, %v590_v39  ;;  %v574_v12 = vmul.f32 %v759_v42, %v1089_v11  ;;  %v490_v50 = vpop.xlane.xlu1 %489 }
 0x21c   :  { %v457_v51 = vpop.xlane.xlu0 %456  ;;  %v563_v55 = vmul.f32 %v761_v48, %v1100_v21  ;;  %770 = vrsqrt.f32 %v528_v44  ;;  %v518_v9 = vmul.f32 0.03125, %v490_v50 }
 0x21d   :  { %v507_v57 = vmul.f32 0.03125, %v457_v51  ;;  %636 = vst.msk [vmem:[%s1364_s6 + $0x8] sm:$0xff] %vm54_vm0, %v616_v49  ;;  %v600_v58 = vmul.f32 %v1211_v28, %v574_v12  ;;  %772 = vrsqrt.f32 %v535_v47 }
 0x21e   :  { %v763_v59 = vpop.eup %762  ;;  %v589_v1 = vmul.f32 %v1211_v28, %v563_v55  ;;  %v538_v2 = vadd.f32 1e-05, %v518_v9 }
 0x21f   :  { %v527_v11 = vadd.f32 1e-05, %v507_v57  ;;  %v765_v62 = vpop.eup %764  ;;  %v626_v63 = vadd.f32 %v1217_v34, %v600_v58  ;;  %v566_v21 = vmul.f32 %v763_v59, %v1097_v20  ;;  %v466_v0 = vpop.xlane.xlu1 %465 }
 0x220   :  { %v487_v26 = vpop.xlane.xlu0 %486  ;;  %v615_v3 = vadd.f32 %v1217_v34, %v589_v1  ;;  %v573_v4 = vmul.f32 %v765_v62, %v1113_v43  ;;  %774 = vrsqrt.f32 %v538_v2  ;;  %v510_v5 = vmul.f32 0.03125, %v466_v0 }
 0x221   :  { %646 = vst.msk [vmem:[%s1364_s6 + $0x58] sm:$0xff] %vm54_vm0, %v626_v63  ;;  %v592_v6 = vmul.f32 %v1211_v28, %v566_v21  ;;  %776 = vrsqrt.f32 %v527_v11  ;;  %v517_v7 = vmul.f32 0.03125, %v487_v26 }
 0x222   :  { %v767_v8 = vpop.eup %766  ;;  %635 = vst.msk [vmem:[%s1364_s6] sm:$0xff] %vm54_vm0, %v615_v3  ;;  %v599_v20 = vmul.f32 %v1211_v28, %v573_v4  ;;  %v530_v43 = vadd.f32 1e-05, %v510_v5 }
 0x223   :  { %v769_v13 = vpop.eup %768  ;;  %v618_v14 = vadd.f32 %v1217_v34, %v592_v6  ;;  %v576_v25 = vmul.f32 %v767_v8, %v1110_v30  ;;  %v537_v18 = vadd.f32 1e-05, %v517_v7  ;;  %v496_v19 = vpop.xlane.xlu1 %495 }
 0x224   :  { %v463_v22 = vpop.xlane.xlu0 %462  ;;  %v625_v37 = vadd.f32 %v1217_v34, %v599_v20  ;;  %v565_v38 = vmul.f32 %v769_v13, %v1121_v53  ;;  %778 = vrsqrt.f32 %v530_v43  ;;  %v520_v23 = vmul.f32 0.03125, %v496_v19 }
 0x225   :  { %638 = vst.msk [vmem:[%s1364_s6 + $0x18] sm:$0xff] %vm54_vm0, %v618_v14  ;;  %v602_v24 = vmul.f32 %v1211_v28, %v576_v25  ;;  %780 = vrsqrt.f32 %v537_v18  ;;  %v509_v29 = vmul.f32 0.03125, %v463_v22 }
 0x226   :  { %v771_v52 = vpop.eup %770  ;;  %645 = vst.msk [vmem:[%s1364_s6 + $0x50] sm:$0xff] %vm54_vm0, %v625_v37  ;;  %v591_v30 = vmul.f32 %v1211_v28, %v565_v38  ;;  %v540_v53 = vadd.f32 1e-05, %v520_v23 }
 0x227   :  { %v773_v31 = vpop.eup %772  ;;  %v628_v32 = vadd.f32 %v1217_v34, %v602_v24  ;;  %v568_v33 = vmul.f32 %v771_v52, %v1134_v10  ;;  %v529_v35 = vadd.f32 1e-05, %v509_v29  ;;  %v472_v45 = vpop.xlane.xlu1 %471 }
 0x228   :  { %v493_v39 = vpop.xlane.xlu0 %492  ;;  %v617_v42 = vadd.f32 %v1217_v34, %v591_v30  ;;  %v575_v44 = vmul.f32 %v773_v31, %v1124_v54  ;;  %782 = vrsqrt.f32 %v540_v53  ;;  %v512_v47 = vmul.f32 0.03125, %v472_v45 }
 0x229   :  { %648 = vst.msk [vmem:[%s1364_s6 + $0x68] sm:$0xff] %vm54_vm0, %v628_v32  ;;  %v594_v48 = vmul.f32 %v1211_v28, %v568_v33  ;;  %784 = vrsqrt.f32 %v529_v35  ;;  %v519_v49 = vmul.f32 0.03125, %v493_v39 }
 0x22a   :  { %v775_v12 = vpop.eup %774  ;;  %637 = vst.msk [vmem:[%s1364_s6 + $0x10] sm:$0xff] %vm54_vm0, %v617_v42  ;;  %v601_v10 = vmul.f32 %v1211_v28, %v575_v44  ;;  %v532_v54 = vadd.f32 1e-05, %v512_v47 }
 0x22b   :  { %v777_v50 = vpop.eup %776  ;;  %v620_v51 = vadd.f32 %v1217_v34, %v594_v48  ;;  %v578_v55 = vmul.f32 %v775_v12, %v1145_v15  ;;  %v539_v9 = vadd.f32 1e-05, %v519_v49  ;;  %v502_v57 = vpop.xlane.xlu1 %501 }
 0x22c   :  { %v469_v58 = vpop.xlane.xlu0 %468  ;;  %v627_v59 = vadd.f32 %v1217_v34, %v601_v10  ;;  %v567_v1 = vmul.f32 %v777_v50, %v1137_v56  ;;  %786 = vrsqrt.f32 %v532_v54  ;;  %v522_v2 = vmul.f32 0.03125, %v502_v57 }
 0x22d   :  { %640 = vst.msk [vmem:[%s1364_s6 + $0x28] sm:$0xff] %vm54_vm0, %v620_v51  ;;  %v604_v11 = vmul.f32 %v1211_v28, %v578_v55  ;;  %788 = vrsqrt.f32 %v539_v9  ;;  %v511_v62 = vmul.f32 0.03125, %v469_v58 }
 0x22e   :  { %v779_v63 = vpop.eup %778  ;;  %647 = vst.msk [vmem:[%s1364_s6 + $0x60] sm:$0xff] %vm54_vm0, %v627_v59  ;;  %v593_v15 = vmul.f32 %v1211_v28, %v567_v1  ;;  %v542_v56 = vadd.f32 1e-05, %v522_v2 }
 0x22f   :  { %v781_v21 = vpop.eup %780  ;;  %v630_v0 = vadd.f32 %v1217_v34, %v604_v11  ;;  %v570_v26 = vmul.f32 %v779_v63, %v1158_v27  ;;  %v531_v3 = vadd.f32 1e-05, %v511_v62 }
 0x230   :  { %v499_v4 = vpop.xlane.xlu0 %498  ;;  %v619_v5 = vadd.f32 %v1217_v34, %v593_v15  ;;  %v577_v6 = vmul.f32 %v781_v21, %v1148_v16  ;;  %790 = vrsqrt.f32 %v542_v56 }
 0x231   :  { %v521_v7 = vmul.f32 0.03125, %v499_v4  ;;  %650 = vst.msk [vmem:[%s1364_s6 + $0x78] sm:$0xff] %vm54_vm0, %v630_v0  ;;  %v596_v8 = vmul.f32 %v1211_v28, %v570_v26  ;;  %792 = vrsqrt.f32 %v531_v3 }
 0x232   :  { %v783_v20 = vpop.eup %782  ;;  %639 = vst.msk [vmem:[%s1364_s6 + $0x20] sm:$0xff] %vm54_vm0, %v619_v5  ;;  %v603_v27 = vmul.f32 %v1211_v28, %v577_v6 }
 0x233   :  { %v541_v43 = vadd.f32 1e-05, %v521_v7  ;;  %v785_v16 = vpop.eup %784  ;;  %v622_v13 = vadd.f32 %v1217_v34, %v596_v8  ;;  %v580_v14 = vmul.f32 %v783_v20, %v1169_v40 }
 0x234   :  { %v629_v25 = vadd.f32 %v1217_v34, %v603_v27  ;;  %v569_v18 = vmul.f32 %v785_v16, %v1161_v17 }
 0x235   :  { %794 = vrsqrt.f32 %v541_v43  ;;  %642 = vst.msk [vmem:[%s1364_s6 + $0x38] sm:$0xff] %vm54_vm0, %v622_v13  ;;  %v606_v19 = vmul.f32 %v1211_v28, %v580_v14 }
 0x236   :  { %v787_v22 = vpop.eup %786  ;;  %649 = vst.msk [vmem:[%s1364_s6 + $0x70] sm:$0xff] %vm54_vm0, %v629_v25  ;;  %v595_v40 = vmul.f32 %v1211_v28, %v569_v18 }
 0x237   :  { %v789_v37 = vpop.eup %788  ;;  %v632_v38 = vadd.f32 %v1217_v34, %v606_v19  ;;  %v572_v17 = vmul.f32 %v787_v22, %v1182_v46 }
 0x238   :  { %v621_v23 = vadd.f32 %v1217_v34, %v595_v40  ;;  %v579_v24 = vmul.f32 %v789_v37, %v1172_v41 }
 0x239   :  { %652 = vst.msk [vmem:[%s1364_s6 + $0x88] sm:$0xff] %vm54_vm0, %v632_v38  ;;  %v598_v29 = vmul.f32 %v1211_v28, %v572_v17 }
 0x23a   :  { %v791_v52 = vpop.eup %790  ;;  %641 = vst.msk [vmem:[%s1364_s6 + $0x30] sm:$0xff] %vm54_vm0, %v621_v23  ;;  %v605_v30 = vmul.f32 %v1211_v28, %v579_v24 }
 0x23b   :  { %v793_v46 = vpop.eup %792  ;;  %v624_v53 = vadd.f32 %v1217_v34, %v598_v29  ;;  %v582_v41 = vmul.f32 %v791_v52, %v1193_v60 }
 0x23c   :  { %v631_v31 = vadd.f32 %v1217_v34, %v605_v30  ;;  %v571_v32 = vmul.f32 %v793_v46, %v1185_v36 }
 0x23d   :  { %644 = vst.msk [vmem:[%s1364_s6 + $0x48] sm:$0xff] %vm54_vm0, %v624_v53  ;;  %v608_v33 = vmul.f32 %v1211_v28, %v582_v41 }
 0x23e   :  { %651 = vst.msk [vmem:[%s1364_s6 + $0x80] sm:$0xff] %vm54_vm0, %v631_v31  ;;  %v597_v45 = vmul.f32 %v1211_v28, %v571_v32 }
 0x23f   :  { %v795_v35 = vpop.eup %794  ;;  %v634_v60 = vadd.f32 %v1217_v34, %v608_v33 }
 0x240   :  { %v581_v39 = vmul.f32 %v795_v35, %v1196_v61  ;;  %v623_v36 = vadd.f32 %v1217_v34, %v597_v45 }
 0x241   :  { %654 = vst.msk [vmem:[%s1364_s6 + $0x98] sm:$0xff] %vm54_vm0, %v634_v60 }
 0x242   :  { %v607_v42 = vmul.f32 %v1211_v28, %v581_v39  ;;  %643 = vst.msk [vmem:[%s1364_s6 + $0x40] sm:$0xff] %vm54_vm0, %v623_v36 }
 0x244   :  { %v633_v44 = vadd.f32 %v1217_v34, %v607_v42 }
 0x246   :  { %653 = vst.msk [vmem:[%s1364_s6 + $0x90] sm:$0xff] %vm54_vm0, %v633_v44 }

// kernel: dino_transformer_encoder_forward.15
= control target key start
LH: loop header
LB: loop body
LE: loop exit
PB: predicated region body
PF: predicated region fallthrough
CT: control target
= control target key end

     0   :  { %vm88_vm0 = vcmask 261120   ;;  %vm314_vm1 = vcmask 392192   ;;  %s694_s2 = inlined_call_operand.vmem [shape: f32[32,48], index: 2, kind: input, shape index: {}]   ;;  %s695_s0 = inlined_call_operand.vmem [shape: f32[160,32], index: 0, kind: input, shape index: {}]   ;;  %s696_s1 = inlined_call_operand.vmem [shape: f32[160,32], index: 1, kind: input, shape index: {}]   ;;  %s697_s3 = inlined_call_operand.vmem [shape: f32[1,48], index: 3, kind: input, shape index: {}]   ;;  %s698_s4 = inlined_call_operand.vmem [shape: f32[160,48], index: 4, kind: output, shape index: {}]  }
   0x1   :  { %v77_v0 = vld [vmem:[%s694_s2] sm:$0xff]  ;;  %v78_v1 = vld [vmem:[%s694_s2 + $0x8] sm:$0xff]  ;;  %v79_v2 = vld [vmem:[%s694_s2 + $0x10] sm:$0xff] }
   0x2   :  { %v422_v3 = vpack.c.bf16 %v78_v1, %v77_v0  ;;  %v80_v4 = vld [vmem:[%s694_s2 + $0x18] sm:$0xff]  ;;  %v17_v5 = vld [vmem:[%s695_s0] sm:$0xff]  ;;  %v27_v9 = vld [vmem:[%s695_s0 + $0x50] sm:$0xff] }
   0x3   :  { %v37_v6 = vld [vmem:[%s696_s1] sm:$0xff]  ;;  %v426_v7 = vpack.c.bf16 %v80_v4, %v79_v2  ;;  %v47_v10 = vld [vmem:[%s696_s1 + $0x50] sm:$0xff]  ;;  %v18_v12 = vld [vmem:[%s695_s0 + $0x8] sm:$0xff] }
   0x4   :  { %v57_v8 = vadd.f32 %v37_v6, %v17_v5  ;;  %423 = vmatprep.subr.bf16.mxu0 %v422_v3  ;;  %430 = vmatprep.subr.bf16.mxu1 %v422_v3  ;;  %v67_v11 = vadd.f32 %v47_v10, %v27_v9  ;;  %v38_v13 = vld [vmem:[%s696_s1 + $0x8] sm:$0xff]  ;;  %v28_v14 = vld [vmem:[%s695_s0 + $0x58] sm:$0xff]  ;;  %v19_v16 = vld [vmem:[%s695_s0 + $0x10] sm:$0xff] }
   0x5   :  { %425 = vmatpush3.bf16.msra.mxu0 %v422_v3  ;;  %432 = vmatpush3.bf16.msra.mxu1 %v422_v3  ;;  %v48_v15 = vld [vmem:[%s696_s1 + $0x58] sm:$0xff]  ;;  %v39_v17 = vld [vmem:[%s696_s1 + $0x10] sm:$0xff]  ;;  %v29_v18 = vld [vmem:[%s695_s0 + $0x60] sm:$0xff]  ;;  %v58_v20 = vadd.f32 %v38_v13, %v18_v12 }
   0x6   :  { %427 = vmatprep.subr.bf16.mxu0 %v426_v7  ;;  %431 = vmatprep.subr.bf16.mxu1 %v426_v7  ;;  %v49_v19 = vld [vmem:[%s696_s1 + $0x60] sm:$0xff]  ;;  %v68_v21 = vadd.f32 %v48_v15, %v28_v14  ;;  %v20_v22 = vld [vmem:[%s695_s0 + $0x18] sm:$0xff]  ;;  %v59_v24 = vadd.f32 %v39_v17, %v19_v16  ;;  %v30_v26 = vld [vmem:[%s695_s0 + $0x68] sm:$0xff] }
   0x7   :  { %392 = vmatprep.mubr.msk.f32.mxu0 %vm88_vm0, %v57_v8  ;;  %407 = vmatprep.mubr.msk.f32.mxu1 %vm88_vm0, %v67_v11  ;;  %v40_v23 = vld [vmem:[%s696_s1 + $0x18] sm:$0xff]  ;;  %v69_v25 = vadd.f32 %v49_v19, %v29_v18  ;;  %v50_v27 = vld [vmem:[%s696_s1 + $0x68] sm:$0xff]  ;;  %v21_v28 = vld [vmem:[%s695_s0 + $0x20] sm:$0xff] }
   0x8   :  { %v41_v29 = vld [vmem:[%s696_s1 + $0x20] sm:$0xff]  ;;  %v31_v30 = vld [vmem:[%s695_s0 + $0x70] sm:$0xff]  ;;  %v60_v32 = vadd.f32 %v40_v23, %v20_v22  ;;  %v70_v33 = vadd.f32 %v50_v27, %v30_v26  ;;  %v22_v34 = vld [vmem:[%s695_s0 + $0x28] sm:$0xff] }
   0x9   :  { %429 = vmatpush3.bf16.msra.mxu0 %v426_v7  ;;  %433 = vmatpush3.bf16.msra.mxu1 %v426_v7  ;;  %v51_v31 = vld [vmem:[%s696_s1 + $0x70] sm:$0xff]  ;;  %v42_v35 = vld [vmem:[%s696_s1 + $0x28] sm:$0xff]  ;;  %v61_v36 = vadd.f32 %v41_v29, %v21_v28  ;;  %v32_v38 = vld [vmem:[%s695_s0 + $0x78] sm:$0xff] }
   0xa   :  { %v71_v37 = vadd.f32 %v51_v31, %v31_v30  ;;  %v52_v39 = vld [vmem:[%s696_s1 + $0x78] sm:$0xff]  ;;  %v23_v40 = vld [vmem:[%s695_s0 + $0x30] sm:$0xff]  ;;  %v33_v42 = vld [vmem:[%s695_s0 + $0x80] sm:$0xff]  ;;  %v62_v44 = vadd.f32 %v42_v35, %v22_v34 }
   0xb   :  { %v43_v41 = vld [vmem:[%s696_s1 + $0x30] sm:$0xff]  ;;  %v53_v43 = vld [vmem:[%s696_s1 + $0x80] sm:$0xff]  ;;  %v72_v45 = vadd.f32 %v52_v39, %v32_v38  ;;  %v24_v46 = vld [vmem:[%s695_s0 + $0x38] sm:$0xff] }
   0xc   :  { %393 = vmatmul.mubr.msk.f32.vlgmr.msra.gmra.mrb[0].mxu0 %vm88_vm0, %v58_v20  ;;  %408 = vmatmul.mubr.msk.f32.vlgmr.msra.gmra.mrb[0].mxu1 %vm88_vm0, %v68_v21  ;;  %v44_v47 = vld [vmem:[%s696_s1 + $0x38] sm:$0xff]  ;;  %v63_v48 = vadd.f32 %v43_v41, %v23_v40  ;;  %v73_v49 = vadd.f32 %v53_v43, %v33_v42  ;;  %v34_v50 = vld [vmem:[%s695_s0 + $0x88] sm:$0xff]  ;;  %v25_v52 = vld [vmem:[%s695_s0 + $0x40] sm:$0xff] }
   0xd   :  { %395 = vmatprep.mubr.msk.f32.mxu0 %vm88_vm0, %v59_v24  ;;  %410 = vmatprep.mubr.msk.f32.mxu1 %vm88_vm0, %v69_v25  ;;  %v54_v51 = vld [vmem:[%s696_s1 + $0x88] sm:$0xff]  ;;  %v45_v53 = vld [vmem:[%s696_s1 + $0x40] sm:$0xff]  ;;  %v35_v54 = vld [vmem:[%s695_s0 + $0x90] sm:$0xff]  ;;  %v64_v56 = vadd.f32 %v44_v47, %v24_v46 }
   0xe   :  { %v55_v55 = vld [vmem:[%s696_s1 + $0x90] sm:$0xff]  ;;  %v74_v57 = vadd.f32 %v54_v51, %v34_v50  ;;  %v26_v58 = vld [vmem:[%s695_s0 + $0x48] sm:$0xff]  ;;  %v65_v59 = vadd.f32 %v45_v53, %v25_v52  ;;  %v36_v62 = vld [vmem:[%s695_s0 + $0x98] sm:$0xff] }
   0xf   :  { %v75_v60 = vadd.f32 %v55_v55, %v35_v54  ;;  %v46_v61 = vld [vmem:[%s696_s1 + $0x48] sm:$0xff]  ;;  %v56_v63 = vld [vmem:[%s696_s1 + $0x98] sm:$0xff]  ;;  %v339_v2 = vld [vmem:[%s697_s3] ss:$0 sm:$0xff] }
  0x10   :  { %396 = vmatmul.mubr.msk.f32.gmra.mrb[2].mxu0 %vm88_vm0, %v60_v32  ;;  %411 = vmatmul.mubr.msk.f32.gmra.mrb[2].mxu1 %vm88_vm0, %v70_v33  ;;  %v66_v0 = vadd.f32 %v46_v61, %v26_v58  ;;  %v76_v1 = vadd.f32 %v56_v63, %v36_v62 }
  0x11   :  { %398 = vmatprep.mubr.msk.f32.mxu0 %vm88_vm0, %v61_v36  ;;  %413 = vmatprep.mubr.msk.f32.mxu1 %vm88_vm0, %v71_v37 }
  0x14   :  { %399 = vmatmul.mubr.msk.f32.gmra.mrb[4].mxu0 %vm88_vm0, %v62_v44  ;;  %414 = vmatmul.mubr.msk.f32.gmra.mrb[4].mxu1 %vm88_vm0, %v72_v45 }
  0x15   :  { %401 = vmatprep.mubr.msk.f32.mxu0 %vm88_vm0, %v63_v48  ;;  %416 = vmatprep.mubr.msk.f32.mxu1 %vm88_vm0, %v73_v49 }
  0x18   :  { %402 = vmatmul.mubr.msk.f32.gmra.mrb[6].mxu0 %vm88_vm0, %v64_v56  ;;  %417 = vmatmul.mubr.msk.f32.gmra.mrb[6].mxu1 %vm88_vm0, %v74_v57 }
  0x19   :  { %404 = vmatprep.mubr.msk.f32.mxu0 %vm88_vm0, %v65_v59  ;;  %419 = vmatprep.mubr.msk.f32.mxu1 %vm88_vm0, %v75_v60 }
  0x1c   :  { %405 = vmatmul.mubr.msk.f32.gmra.mrb[8].mxu0 %vm88_vm0, %v66_v0  ;;  %420 = vmatmul.mubr.msk.f32.gmra.mrb[8].mxu1 %vm88_vm0, %v76_v1 }
  0xdf   :  { %v394_v3 = vpop.f32.mrb[0].mxu0  ;;  %v409_v4 = vpop.f32.mrb[0].mxu1 }
  0xe0   :  { %v221_v5 = vadd.f32 %v394_v3, %v339_v2  ;;  %v271_v6 = vadd.f32 %v409_v4, %v339_v2  ;;  %v215_v7 = vpop.f32.mrb[1].mxu0  ;;  %v265_v8 = vpop.f32.mrb[1].mxu1 }
  0xe1   :  { %v216_v9 = vadd.f32 %v339_v2, %v215_v7  ;;  %v266_v10 = vadd.f32 %v339_v2, %v265_v8 }
  0xe2   :  { %316 = vst.msk [vmem:[%s698_s4 + $0x8] sm:$0xff] %vm314_vm1, %v221_v5  ;;  %326 = vst.msk [vmem:[%s698_s4 + $0x58] sm:$0xff] %vm314_vm1, %v271_v6 }
  0xe3   :  { %315 = vst.msk [vmem:[%s698_s4] sm:$0xff] %vm314_vm1, %v216_v9  ;;  %325 = vst.msk [vmem:[%s698_s4 + $0x50] sm:$0xff] %vm314_vm1, %v266_v10  ;;  %v397_v11 = vpop.f32.mrb[2].mxu0  ;;  %v412_v12 = vpop.f32.mrb[2].mxu1 }
  0xe4   :  { %v231_v13 = vadd.f32 %v397_v11, %v339_v2  ;;  %v281_v14 = vadd.f32 %v412_v12, %v339_v2  ;;  %v225_v15 = vpop.f32.mrb[3].mxu0  ;;  %v275_v16 = vpop.f32.mrb[3].mxu1 }
  0xe5   :  { %v226_v17 = vadd.f32 %v339_v2, %v225_v15  ;;  %v276_v18 = vadd.f32 %v339_v2, %v275_v16 }
  0xe6   :  { %318 = vst.msk [vmem:[%s698_s4 + $0x18] sm:$0xff] %vm314_vm1, %v231_v13  ;;  %328 = vst.msk [vmem:[%s698_s4 + $0x68] sm:$0xff] %vm314_vm1, %v281_v14 }
  0xe7   :  { %317 = vst.msk [vmem:[%s698_s4 + $0x10] sm:$0xff] %vm314_vm1, %v226_v17  ;;  %327 = vst.msk [vmem:[%s698_s4 + $0x60] sm:$0xff] %vm314_vm1, %v276_v18  ;;  %v400_v19 = vpop.f32.mrb[4].mxu0  ;;  %v415_v20 = vpop.f32.mrb[4].mxu1 }
  0xe8   :  { %v241_v21 = vadd.f32 %v400_v19, %v339_v2  ;;  %v291_v22 = vadd.f32 %v415_v20, %v339_v2  ;;  %v235_v23 = vpop.f32.mrb[5].mxu0  ;;  %v285_v24 = vpop.f32.mrb[5].mxu1 }
  0xe9   :  { %v236_v25 = vadd.f32 %v339_v2, %v235_v23  ;;  %v286_v26 = vadd.f32 %v339_v2, %v285_v24 }
  0xea   :  { %320 = vst.msk [vmem:[%s698_s4 + $0x28] sm:$0xff] %vm314_vm1, %v241_v21  ;;  %330 = vst.msk [vmem:[%s698_s4 + $0x78] sm:$0xff] %vm314_vm1, %v291_v22 }
  0xeb   :  { %319 = vst.msk [vmem:[%s698_s4 + $0x20] sm:$0xff] %vm314_vm1, %v236_v25  ;;  %329 = vst.msk [vmem:[%s698_s4 + $0x70] sm:$0xff] %vm314_vm1, %v286_v26  ;;  %v403_v27 = vpop.f32.mrb[6].mxu0  ;;  %v418_v28 = vpop.f32.mrb[6].mxu1 }
  0xec   :  { %v251_v29 = vadd.f32 %v403_v27, %v339_v2  ;;  %v301_v30 = vadd.f32 %v418_v28, %v339_v2  ;;  %v245_v31 = vpop.f32.mrb[7].mxu0  ;;  %v295_v32 = vpop.f32.mrb[7].mxu1 }
  0xed   :  { %v246_v33 = vadd.f32 %v339_v2, %v245_v31  ;;  %v296_v34 = vadd.f32 %v339_v2, %v295_v32 }
  0xee   :  { %322 = vst.msk [vmem:[%s698_s4 + $0x38] sm:$0xff] %vm314_vm1, %v251_v29  ;;  %332 = vst.msk [vmem:[%s698_s4 + $0x88] sm:$0xff] %vm314_vm1, %v301_v30 }
  0xef   :  { %321 = vst.msk [vmem:[%s698_s4 + $0x30] sm:$0xff] %vm314_vm1, %v246_v33  ;;  %331 = vst.msk [vmem:[%s698_s4 + $0x80] sm:$0xff] %vm314_vm1, %v296_v34  ;;  %v406_v35 = vpop.f32.mrb[8].mxu0  ;;  %v421_v36 = vpop.f32.mrb[8].mxu1 }
  0xf0   :  { %v261_v37 = vadd.f32 %v406_v35, %v339_v2  ;;  %v311_v38 = vadd.f32 %v421_v36, %v339_v2  ;;  %v255_v39 = vpop.f32.mrb[9].mxu0  ;;  %v305_v40 = vpop.f32.mrb[9].mxu1 }
  0xf1   :  { %v256_v41 = vadd.f32 %v339_v2, %v255_v39  ;;  %v306_v42 = vadd.f32 %v339_v2, %v305_v40 }
  0xf2   :  { %324 = vst.msk [vmem:[%s698_s4 + $0x48] sm:$0xff] %vm314_vm1, %v261_v37  ;;  %334 = vst.msk [vmem:[%s698_s4 + $0x98] sm:$0xff] %vm314_vm1, %v311_v38 }
  0xf3   :  { %323 = vst.msk [vmem:[%s698_s4 + $0x40] sm:$0xff] %vm314_vm1, %v256_v41  ;;  %333 = vst.msk [vmem:[%s698_s4 + $0x90] sm:$0xff] %vm314_vm1, %v306_v42 }

// kernel: dino_transformer_encoder_forward.13
= control target key start
LH: loop header
LB: loop body
LE: loop exit
PB: predicated region body
PF: predicated region fallthrough
CT: control target
= control target key end

     0   :  { %vm57_vm0 = vcmask 261120   ;;  %vm318_vm1 = vcmask 523264   ;;  %s1811_s1 = inlined_call_operand.vmem [shape: f32[32,64], index: 1, kind: input, shape index: {}]   ;;  %s1812_s0 = inlined_call_operand.vmem [shape: f32[160,32], index: 0, kind: input, shape index: {}]   ;;  %s1813_s3 = inlined_call_operand.vmem [shape: f32[64,32], index: 3, kind: input, shape index: {}]   ;;  %s1814_s2 = inlined_call_operand.vmem [shape: f32[1,64], index: 2, kind: input, shape index: {}]   ;;  %s1815_s4 = inlined_call_operand.vmem [shape: f32[1,32], index: 4, kind: input, shape index: {}]   ;;  %s1816_s5 = inlined_call_operand.vmem [shape: f32[1,32], index: 5, kind: input, shape index: {}]   ;;  %s1817_s6 = inlined_call_operand.vmem [shape: f32[1,32], index: 6, kind: input, shape index: {}]   ;;  %s1818_s7 = inlined_call_operand.vmem [shape: f32[160,32], index: 7, kind: output, shape index: {}]  }
   0x1   :  { %v46_v0 = vld [vmem:[%s1811_s1] sm:$0xff]  ;;  %v47_v1 = vld [vmem:[%s1811_s1 + $0x8] sm:$0xff]  ;;  %v48_v2 = vld [vmem:[%s1811_s1 + $0x10] sm:$0xff] }
   0x2   :  { %v1083_v3 = vpack.c.bf16 %v47_v1, %v46_v0  ;;  %v49_v4 = vld [vmem:[%s1811_s1 + $0x18] sm:$0xff]  ;;  %v1210_v5 = vld [vmem:[%s1812_s0] sm:$0xff]  ;;  %v1217_v7 = vld [vmem:[%s1812_s0 + $0x8] sm:$0xff] }
   0x3   :  { %v1087_v6 = vpack.c.bf16 %v49_v4, %v48_v2  ;;  %1007 = vmatprep.mubr.msk.f32.mxu0 %vm57_vm0, %v1210_v5  ;;  %v303_v8 = vld [vmem:[%s1813_s3] sm:$0xff]  ;;  %v304_v9 = vld [vmem:[%s1813_s3 + $0x8] sm:$0xff]  ;;  %v305_v10 = vld [vmem:[%s1813_s3 + $0x10] sm:$0xff] }
   0x4   :  { %1084 = vmatprep.subr.bf16.mxu0 %v1083_v3  ;;  %v1231_v11 = vld [vmem:[%s1812_s0 + $0x10] sm:$0xff]  ;;  %v1091_v12 = vpack.c.bf16 %v304_v9, %v303_v8  ;;  %v306_v13 = vld [vmem:[%s1813_s3 + $0x18] sm:$0xff]  ;;  %v307_v15 = vld [vmem:[%s1813_s3 + $0x20] sm:$0xff] }
   0x5   :  { %1086 = vmatpush3.bf16.msra.mxu0 %v1083_v3  ;;  %v1095_v14 = vpack.c.bf16 %v306_v13, %v305_v10  ;;  %v308_v16 = vld [vmem:[%s1813_s3 + $0x28] sm:$0xff]  ;;  %v1249_v17 = vld [vmem:[%s1812_s0 + $0x18] sm:$0xff]  ;;  %v1254_v18 = vld [vmem:[%s1812_s0 + $0x20] sm:$0xff] }
   0x6   :  { %1088 = vmatprep.subr.bf16.mxu0 %v1087_v6  ;;  %v1099_v19 = vpack.c.bf16 %v308_v16, %v307_v15  ;;  %1107 = vmatprep.subr.bf16.mxu1 %v1091_v12  ;;  %v309_v20 = vld [vmem:[%s1813_s3 + $0x30] sm:$0xff]  ;;  %v310_v21 = vld [vmem:[%s1813_s3 + $0x38] sm:$0xff]  ;;  %v1269_v22 = vld [vmem:[%s1812_s0 + $0x28] sm:$0xff] }
   0x7   :  { %1111 = vmatpush3.bf16.msra.mxu1 %v1091_v12  ;;  %v1274_v23 = vld [vmem:[%s1812_s0 + $0x30] sm:$0xff]  ;;  %v1103_v24 = vpack.c.bf16 %v310_v21, %v309_v20  ;;  %v1283_v25 = vld [vmem:[%s1812_s0 + $0x38] sm:$0xff]  ;;  %v1288_v26 = vld [vmem:[%s1812_s0 + $0x40] sm:$0xff] }
   0x8   :  { %1108 = vmatprep.subr.bf16.mxu1 %v1095_v14  ;;  %v1297_v27 = vld [vmem:[%s1812_s0 + $0x48] sm:$0xff]  ;;  %v1302_v28 = vld [vmem:[%s1812_s0 + $0x50] sm:$0xff]  ;;  %v1311_v29 = vld [vmem:[%s1812_s0 + $0x58] sm:$0xff] }
   0x9   :  { %1090 = vmatpush3.bf16.msra.mxu0 %v1087_v6  ;;  %v1316_v30 = vld [vmem:[%s1812_s0 + $0x60] sm:$0xff]  ;;  %v1325_v31 = vld [vmem:[%s1812_s0 + $0x68] sm:$0xff]  ;;  %v1330_v32 = vld [vmem:[%s1812_s0 + $0x70] sm:$0xff] }
   0xa   :  { %1092 = vmatprep.subr.bf16.mxu0 %v1091_v12  ;;  %v1339_v33 = vld [vmem:[%s1812_s0 + $0x78] sm:$0xff]  ;;  %v1344_v34 = vld [vmem:[%s1812_s0 + $0x80] sm:$0xff]  ;;  %v1353_v35 = vld [vmem:[%s1812_s0 + $0x88] sm:$0xff] }
   0xb   :  { %1112 = vmatpush3.bf16.msra.mxu1 %v1095_v14  ;;  %v1358_v36 = vld [vmem:[%s1812_s0 + $0x90] sm:$0xff]  ;;  %v1367_v37 = vld [vmem:[%s1812_s0 + $0x98] sm:$0xff]  ;;  %v1374_v38 = vld [vmem:[%s1814_s2] ss:$0 sm:$0xff] }
   0xc   :  { %1008 = vmatmul.mubr.msk.f32.vlgmr.msra.gmra.mrb[0].mxu0 %vm57_vm0, %v1217_v7  ;;  %1109 = vmatprep.subr.bf16.mxu1 %v1099_v19 }
   0xd   :  { %1010 = vmatprep.mubr.msk.f32.mxu0 %vm57_vm0, %v1231_v11  ;;  %1094 = vmatpush3.bf16.msra.mxu0 %v1091_v12 }
   0xe   :  { %1096 = vmatprep.subr.bf16.mxu0 %v1095_v14 }
   0xf   :  { %1113 = vmatpush3.bf16.msra.mxu1 %v1099_v19 }
  0x10   :  { %1011 = vmatmul.mubr.msk.f32.gmra.mrb[2].mxu0 %vm57_vm0, %v1249_v17  ;;  %1110 = vmatprep.subr.bf16.mxu1 %v1103_v24 }
  0x11   :  { %1013 = vmatprep.mubr.msk.f32.mxu0 %vm57_vm0, %v1254_v18  ;;  %1098 = vmatpush3.bf16.msra.mxu0 %v1095_v14 }
  0x12   :  { %1100 = vmatprep.subr.bf16.mxu0 %v1099_v19 }
  0x13   :  { %1114 = vmatpush3.bf16.msra.mxu1 %v1103_v24 }
  0x14   :  { %1014 = vmatmul.mubr.msk.f32.gmra.mrb[4].mxu0 %vm57_vm0, %v1269_v22 }
  0x15   :  { %1016 = vmatprep.mubr.msk.f32.mxu0 %vm57_vm0, %v1274_v23  ;;  %1102 = vmatpush3.bf16.msra.mxu0 %v1099_v19 }
  0x16   :  { %1104 = vmatprep.subr.bf16.mxu0 %v1103_v24 }
  0x18   :  { %1017 = vmatmul.mubr.msk.f32.gmra.mrb[6].mxu0 %vm57_vm0, %v1283_v25 }
  0x19   :  { %1019 = vmatprep.mubr.msk.f32.mxu0 %vm57_vm0, %v1288_v26  ;;  %1106 = vmatpush3.bf16.msra.mxu0 %v1103_v24 }
  0x1c   :  { %1020 = vmatmul.mubr.msk.f32.gmra.mrb[8].mxu0 %vm57_vm0, %v1297_v27 }
  0x1d   :  { %1022 = vmatprep.mubr.msk.f32.mxu0 %vm57_vm0, %v1302_v28 }
  0x20   :  { %1023 = vmatmul.mubr.msk.f32.gmra.mrb[10].mxu0 %vm57_vm0, %v1311_v29 }
  0x21   :  { %1025 = vmatprep.mubr.msk.f32.mxu0 %vm57_vm0, %v1316_v30 }
  0x24   :  { %1026 = vmatmul.mubr.msk.f32.gmra.mrb[12].mxu0 %vm57_vm0, %v1325_v31 }
  0x25   :  { %1028 = vmatprep.mubr.msk.f32.mxu0 %vm57_vm0, %v1330_v32 }
  0x28   :  { %1029 = vmatmul.mubr.msk.f32.gmra.mrb[14].mxu0 %vm57_vm0, %v1339_v33 }
  0x29   :  { %1031 = vmatprep.mubr.msk.f32.mxu0 %vm57_vm0, %v1344_v34 }
  0x2c   :  { %1032 = vmatmul.mubr.msk.f32.gmra.mrb[16].mxu0 %vm57_vm0, %v1353_v35 }
  0x2d   :  { %1034 = vmatprep.mubr.msk.f32.mxu0 %vm57_vm0, %v1358_v36 }
  0x30   :  { %1035 = vmatmul.mubr.msk.f32.gmra.mrb[18].mxu0 %vm57_vm0, %v1367_v37 }
  0xdf   :  { %v1009_v39 = vpop.f32.mrb[0].mxu0 }
  0xe0   :  { %v190_v40 = vadd.f32 %v1009_v39, %v1374_v38  ;;  %v184_v41 = vpop.f32.mrb[1].mxu0 }
  0xe1   :  { %v185_v42 = vadd.f32 %v1374_v38, %v184_v41 }
  0xe2   :  { %v284_v45 = vmax.f32 %v190_v40, 0.0 }
  0xe3   :  { %v283_v43 = vmax.f32 %v185_v42, 0.0  ;;  %v1012_v44 = vpop.f32.mrb[2].mxu0 }
  0xe4   :  { %v200_v46 = vadd.f32 %v1012_v44, %v1374_v38  ;;  %v194_v47 = vpop.f32.mrb[3].mxu0 }
  0xe5   :  { %v195_v48 = vadd.f32 %v1374_v38, %v194_v47  ;;  %1053 = vmatprep.mubr.msk.f32.mxu0 %vm318_vm1, %v283_v43 }
  0xe6   :  { %1054 = vmatmul.mubr.msk.f32.vlgmr.msra.gmra.mrb[20].mxu0 %vm318_vm1, %v284_v45  ;;  %v286_v51 = vmax.f32 %v200_v46, 0.0 }
  0xe7   :  { %v285_v49 = vmax.f32 %v195_v48, 0.0  ;;  %v1015_v50 = vpop.f32.mrb[4].mxu0 }
  0xe8   :  { %v210_v52 = vadd.f32 %v1015_v50, %v1374_v38  ;;  %v204_v53 = vpop.f32.mrb[5].mxu0 }
  0xe9   :  { %v205_v54 = vadd.f32 %v1374_v38, %v204_v53  ;;  %1056 = vmatprep.mubr.msk.f32.mxu1 %vm318_vm1, %v285_v49 }
  0xea   :  { %v288_v55 = vmax.f32 %v210_v52, 0.0  ;;  %1057 = vmatmul.mubr.msk.f32.vlgmr.msra.gmra.mrb[0].mxu1 %vm318_vm1, %v286_v51 }
  0xeb   :  { %v287_v56 = vmax.f32 %v205_v54, 0.0  ;;  %v1018_v57 = vpop.f32.mrb[6].mxu0 }
  0xec   :  { %v220_v58 = vadd.f32 %v1018_v57, %v1374_v38  ;;  %v214_v59 = vpop.f32.mrb[7].mxu0 }
  0xed   :  { %v215_v60 = vadd.f32 %v1374_v38, %v214_v59  ;;  %1059 = vmatprep.mubr.msk.f32.mxu1 %vm318_vm1, %v287_v56  ;;  %v1419_v56 = vld [vmem:[%s1815_s4] ss:$0 sm:$0xff] }
  0xee   :  { %v290_v61 = vmax.f32 %v220_v58, 0.0  ;;  %1060 = vmatmul.mubr.msk.f32.gmra.mrb[2].mxu1 %vm318_vm1, %v288_v55 }
  0xef   :  { %v289_v62 = vmax.f32 %v215_v60, 0.0  ;;  %v1021_v63 = vpop.f32.mrb[8].mxu0 }
  0xf0   :  { %v230_v0 = vadd.f32 %v1021_v63, %v1374_v38  ;;  %v224_v1 = vpop.f32.mrb[9].mxu0 }
  0xf1   :  { %v225_v2 = vadd.f32 %v1374_v38, %v224_v1  ;;  %1062 = vmatprep.mubr.msk.f32.mxu1 %vm318_vm1, %v289_v62 }
  0xf2   :  { %v292_v3 = vmax.f32 %v230_v0, 0.0  ;;  %1063 = vmatmul.mubr.msk.f32.gmra.mrb[4].mxu1 %vm318_vm1, %v290_v61 }
  0xf3   :  { %v291_v4 = vmax.f32 %v225_v2, 0.0  ;;  %v1024_v6 = vpop.f32.mrb[10].mxu0 }
  0xf4   :  { %v240_v8 = vadd.f32 %v1024_v6, %v1374_v38  ;;  %v234_v9 = vpop.f32.mrb[11].mxu0 }
  0xf5   :  { %v235_v10 = vadd.f32 %v1374_v38, %v234_v9  ;;  %1065 = vmatprep.mubr.msk.f32.mxu1 %vm318_vm1, %v291_v4 }
  0xf6   :  { %v294_v12 = vmax.f32 %v240_v8, 0.0  ;;  %1066 = vmatmul.mubr.msk.f32.gmra.mrb[6].mxu1 %vm318_vm1, %v292_v3 }
  0xf7   :  { %v293_v13 = vmax.f32 %v235_v10, 0.0  ;;  %v1027_v14 = vpop.f32.mrb[12].mxu0 }
  0xf8   :  { %v250_v15 = vadd.f32 %v1027_v14, %v1374_v38  ;;  %v244_v16 = vpop.f32.mrb[13].mxu0 }
  0xf9   :  { %v245_v19 = vadd.f32 %v1374_v38, %v244_v16  ;;  %1068 = vmatprep.mubr.msk.f32.mxu1 %vm318_vm1, %v293_v13 }
  0xfa   :  { %v296_v20 = vmax.f32 %v250_v15, 0.0  ;;  %1069 = vmatmul.mubr.msk.f32.gmra.mrb[8].mxu1 %vm318_vm1, %v294_v12 }
  0xfb   :  { %v295_v21 = vmax.f32 %v245_v19, 0.0  ;;  %v1030_v24 = vpop.f32.mrb[14].mxu0 }
  0xfc   :  { %v260_v39 = vadd.f32 %v1030_v24, %v1374_v38  ;;  %v254_v40 = vpop.f32.mrb[15].mxu0 }
  0xfd   :  { %v255_v41 = vadd.f32 %v1374_v38, %v254_v40  ;;  %1071 = vmatprep.mubr.msk.f32.mxu1 %vm318_vm1, %v295_v21 }
  0xfe   :  { %v298_v42 = vmax.f32 %v260_v39, 0.0  ;;  %1072 = vmatmul.mubr.msk.f32.gmra.mrb[10].mxu1 %vm318_vm1, %v296_v20 }
  0xff   :  { %v297_v43 = vmax.f32 %v255_v41, 0.0  ;;  %v1033_v44 = vpop.f32.mrb[16].mxu0 }
 0x100   :  { %v270_v45 = vadd.f32 %v1033_v44, %v1374_v38  ;;  %v264_v46 = vpop.f32.mrb[17].mxu0 }
 0x101   :  { %v265_v47 = vadd.f32 %v1374_v38, %v264_v46  ;;  %1074 = vmatprep.mubr.msk.f32.mxu1 %vm318_vm1, %v297_v43 }
 0x102   :  { %v300_v48 = vmax.f32 %v270_v45, 0.0  ;;  %1075 = vmatmul.mubr.msk.f32.gmra.mrb[12].mxu1 %vm318_vm1, %v298_v42 }
 0x103   :  { %v299_v49 = vmax.f32 %v265_v47, 0.0  ;;  %v1036_v50 = vpop.f32.mrb[18].mxu0 }
 0x104   :  { %v280_v51 = vadd.f32 %v1036_v50, %v1374_v38  ;;  %v274_v52 = vpop.f32.mrb[19].mxu0 }
 0x105   :  { %v275_v53 = vadd.f32 %v1374_v38, %v274_v52  ;;  %1077 = vmatprep.mubr.msk.f32.mxu1 %vm318_vm1, %v299_v49 }
 0x106   :  { %v302_v54 = vmax.f32 %v280_v51, 0.0  ;;  %1078 = vmatmul.mubr.msk.f32.gmra.mrb[14].mxu1 %vm318_vm1, %v300_v48 }
 0x107   :  { %v301_v55 = vmax.f32 %v275_v53, 0.0 }
 0x109   :  { %1080 = vmatprep.mubr.msk.f32.mxu1 %vm318_vm1, %v301_v55 }
 0x10a   :  { %1081 = vmatmul.mubr.msk.f32.gmra.mrb[16].mxu1 %vm318_vm1, %v302_v54 }
 0x1b9   :  { %v1055_v57 = vpop.f32.mrb[20].mxu0 }
 0x1ba   :  { %v451_v58 = vadd.f32 %v1055_v57, %v1419_v56  ;;  %v445_v59 = vpop.f32.mrb[21].mxu0 }
 0x1bb   :  { %v446_v38 = vadd.f32 %v1419_v56, %v445_v59 }
 0x1bc   :  { %v1424_v60 = vadd.f32 %v451_v58, %v1217_v7 }
 0x1bd   :  { %v1058_v61 = vpop.f32.mrb[0].mxu1  ;;  %v1430_v1 = vadd.f32 %v446_v38, %v1210_v5 }
 0x1be   :  { %v461_v62 = vadd.f32 %v1058_v61, %v1419_v56  ;;  %v455_v63 = vpop.f32.mrb[1].mxu1  ;;  %v569_v0 = vsel %vm57_vm0, %v1424_v60, 0.0 }
 0x1bf   :  { %v456_v2 = vadd.f32 %v1419_v56, %v455_v63  ;;  %570 = vadd.xlane.f32.xlu0 %v569_v0  ;;  %v566_v9 = vsel %vm57_vm0, %v1430_v1, 0.0 }
 0x1c0   :  { %v1434_v3 = vadd.f32 %v461_v62, %v1249_v17 }
 0x1c1   :  { %v1061_v4 = vpop.f32.mrb[2].mxu1  ;;  %v1442_v10 = vadd.f32 %v456_v2, %v1231_v11 }
 0x1c2   :  { %v471_v7 = vadd.f32 %v1061_v4, %v1419_v56  ;;  %v465_v6 = vpop.f32.mrb[3].mxu1  ;;  %v575_v8 = vsel %vm57_vm0, %v1434_v3, 0.0 }
 0x1c3   :  { %v466_v5 = vadd.f32 %v1419_v56, %v465_v6  ;;  %576 = vadd.xlane.f32.xlu1 %v575_v8  ;;  %567 = vadd.xlane.f32.xlu0 %v566_v9  ;;  %v572_v15 = vsel %vm57_vm0, %v1442_v10, 0.0 }
 0x1c4   :  { %v1452_v16 = vadd.f32 %v471_v7, %v1269_v22 }
 0x1c5   :  { %v1064_v12 = vpop.f32.mrb[4].mxu1  ;;  %v1446_v17 = vadd.f32 %v466_v5, %v1254_v18 }
 0x1c6   :  { %v481_v13 = vadd.f32 %v1064_v12, %v1419_v56  ;;  %v475_v14 = vpop.f32.mrb[5].mxu1  ;;  %v581_v39 = vsel %vm57_vm0, %v1452_v16, 0.0 }
 0x1c7   :  { %v476_v11 = vadd.f32 %v1419_v56, %v475_v14  ;;  %573 = vadd.xlane.f32.xlu1 %v572_v15  ;;  %v578_v19 = vsel %vm57_vm0, %v1446_v17, 0.0 }
 0x1c8   :  { %579 = vadd.xlane.f32.xlu0 %v578_v19  ;;  %v1464_v22 = vadd.f32 %v481_v13, %v1283_v25 }
 0x1c9   :  { %v1067_v20 = vpop.f32.mrb[6].mxu1  ;;  %v1458_v18 = vadd.f32 %v476_v11, %v1274_v23 }
 0x1ca   :  { %v491_v21 = vadd.f32 %v1067_v20, %v1419_v56  ;;  %v485_v24 = vpop.f32.mrb[7].mxu1  ;;  %v587_v45 = vsel %vm57_vm0, %v1464_v22, 0.0 }
 0x1cb   :  { %v486_v40 = vadd.f32 %v1419_v56, %v485_v24  ;;  %582 = vadd.xlane.f32.xlu1 %v581_v39  ;;  %v584_v41 = vsel %vm57_vm0, %v1458_v18, 0.0 }
 0x1cc   :  { %585 = vadd.xlane.f32.xlu0 %v584_v41  ;;  %v1476_v25 = vadd.f32 %v491_v21, %v1297_v27 }
 0x1cd   :  { %v1070_v42 = vpop.f32.mrb[8].mxu1  ;;  %v1470_v23 = vadd.f32 %v486_v40, %v1288_v26 }
 0x1ce   :  { %v501_v43 = vadd.f32 %v1070_v42, %v1419_v56  ;;  %v495_v44 = vpop.f32.mrb[9].mxu1  ;;  %v593_v51 = vsel %vm57_vm0, %v1476_v25, 0.0 }
 0x1cf   :  { %v496_v46 = vadd.f32 %v1419_v56, %v495_v44  ;;  %588 = vadd.xlane.f32.xlu1 %v587_v45  ;;  %v590_v47 = vsel %vm57_vm0, %v1470_v23, 0.0 }
 0x1d0   :  { %591 = vadd.xlane.f32.xlu0 %v590_v47  ;;  %v1488_v27 = vadd.f32 %v501_v43, %v1311_v29 }
 0x1d1   :  { %v1073_v48 = vpop.f32.mrb[10].mxu1  ;;  %v1482_v26 = vadd.f32 %v496_v46, %v1302_v28 }
 0x1d2   :  { %v511_v49 = vadd.f32 %v1073_v48, %v1419_v56  ;;  %v505_v50 = vpop.f32.mrb[11].mxu1  ;;  %v599_v58 = vsel %vm57_vm0, %v1488_v27, 0.0 }
 0x1d3   :  { %v506_v52 = vadd.f32 %v1419_v56, %v505_v50  ;;  %594 = vadd.xlane.f32.xlu1 %v593_v51  ;;  %v596_v53 = vsel %vm57_vm0, %v1482_v26, 0.0 }
 0x1d4   :  { %597 = vadd.xlane.f32.xlu0 %v596_v53  ;;  %v1500_v29 = vadd.f32 %v511_v49, %v1325_v31 }
 0x1d5   :  { %v1076_v54 = vpop.f32.mrb[12].mxu1  ;;  %v1494_v28 = vadd.f32 %v506_v52, %v1316_v30 }
 0x1d6   :  { %v521_v55 = vadd.f32 %v1076_v54, %v1419_v56  ;;  %v515_v57 = vpop.f32.mrb[13].mxu1  ;;  %v605_v0 = vsel %vm57_vm0, %v1500_v29, 0.0 }
 0x1d7   :  { %v516_v59 = vadd.f32 %v1419_v56, %v515_v57  ;;  %600 = vadd.xlane.f32.xlu1 %v599_v58  ;;  %v602_v38 = vsel %vm57_vm0, %v1494_v28, 0.0 }
 0x1d8   :  { %603 = vadd.xlane.f32.xlu0 %v602_v38  ;;  %v1512_v31 = vadd.f32 %v521_v55, %v1339_v33 }
 0x1d9   :  { %v1079_v61 = vpop.f32.mrb[14].mxu1  ;;  %v1506_v30 = vadd.f32 %v516_v59, %v1330_v32 }
 0x1da   :  { %v531_v62 = vadd.f32 %v1079_v61, %v1419_v56  ;;  %v525_v63 = vpop.f32.mrb[15].mxu1  ;;  %v611_v9 = vsel %vm57_vm0, %v1512_v31, 0.0 }
 0x1db   :  { %v526_v2 = vadd.f32 %v1419_v56, %v525_v63  ;;  %606 = vadd.xlane.f32.xlu1 %v605_v0  ;;  %v608_v4 = vsel %vm57_vm0, %v1506_v30, 0.0 }
 0x1dc   :  { %609 = vadd.xlane.f32.xlu0 %v608_v4  ;;  %v1524_v33 = vadd.f32 %v531_v62, %v1353_v35 }
 0x1dd   :  { %v1082_v7 = vpop.f32.mrb[16].mxu1  ;;  %v1518_v32 = vadd.f32 %v526_v2, %v1344_v34 }
 0x1de   :  { %v541_v6 = vadd.f32 %v1082_v7, %v1419_v56  ;;  %v535_v8 = vpop.f32.mrb[17].mxu1  ;;  %v617_v34 = vsel %vm57_vm0, %v1524_v33, 0.0 }
 0x1df   :  { %v536_v5 = vadd.f32 %v1419_v56, %v535_v8  ;;  %612 = vadd.xlane.f32.xlu1 %v611_v9  ;;  %v614_v12 = vsel %vm57_vm0, %v1518_v32, 0.0 }
 0x1e0   :  { %615 = vadd.xlane.f32.xlu0 %v614_v12  ;;  %v1535_v14 = vadd.f32 %v541_v6, %v1367_v37 }
 0x1e1   :  { %v1530_v13 = vadd.f32 %v536_v5, %v1358_v36 }
 0x1e2   :  { %v623_v56 = vsel %vm57_vm0, %v1535_v14, 0.0 }
 0x1e3   :  { %618 = vadd.xlane.f32.xlu1 %v617_v34  ;;  %v620_v35 = vsel %vm57_vm0, %v1530_v13, 0.0 }
 0x1e4   :  { %621 = vadd.xlane.f32.xlu0 %v620_v35 }
 0x1e7   :  { %624 = vadd.xlane.f32.xlu1 %v623_v56 }
 0x24c   :  { %v571_v15 = vpop.xlane.xlu0 %570 }
 0x24d   :  { %v628_v11 = vmul.f32 0.03125, %v571_v15 }
 0x24f   :  { %v1542_v36 = vsub.f32 %v1424_v60, %v628_v11 }
 0x250   :  { %v577_v19 = vpop.xlane.xlu1 %576  ;;  %v568_v20 = vpop.xlane.xlu0 %567 }
 0x251   :  { %v630_v21 = vmul.f32 0.03125, %v577_v19  ;;  %v627_v24 = vmul.f32 0.03125, %v568_v20  ;;  %v668_v37 = vmul.f32 %v1542_v36, %v1542_v36 }
 0x253   :  { %v1547_v39 = vsub.f32 %v1434_v3, %v630_v21  ;;  %v1550_v40 = vsub.f32 %v1430_v1, %v627_v24  ;;  %v690_v41 = vsel %vm57_vm0, %v668_v37, 0.0 }
 0x254   :  { %v574_v42 = vpop.xlane.xlu1 %573  ;;  %691 = vadd.xlane.f32.xlu1 %v690_v41 }
 0x255   :  { %v629_v43 = vmul.f32 0.03125, %v574_v42  ;;  %v580_v60 = vpop.xlane.xlu0 %579  ;;  %v670_v44 = vmul.f32 %v1547_v39, %v1547_v39  ;;  %v667_v45 = vmul.f32 %v1550_v40, %v1550_v40 }
 0x256   :  { %v631_v46 = vmul.f32 0.03125, %v580_v60 }
 0x257   :  { %v1558_v47 = vsub.f32 %v1442_v10, %v629_v43  ;;  %v696_v3 = vsel %vm57_vm0, %v670_v44, 0.0  ;;  %v687_v1 = vsel %vm57_vm0, %v667_v45, 0.0 }
 0x258   :  { %v1563_v48 = vsub.f32 %v1446_v17, %v631_v46  ;;  %v583_v49 = vpop.xlane.xlu1 %582  ;;  %697 = vadd.xlane.f32.xlu1 %v696_v3  ;;  %688 = vadd.xlane.f32.xlu0 %v687_v1 }
 0x259   :  { %v632_v50 = vmul.f32 0.03125, %v583_v49  ;;  %v586_v51 = vpop.xlane.xlu0 %585  ;;  %v669_v52 = vmul.f32 %v1558_v47, %v1558_v47 }
 0x25a   :  { %v633_v53 = vmul.f32 0.03125, %v586_v51  ;;  %v671_v55 = vmul.f32 %v1563_v48, %v1563_v48 }
 0x25b   :  { %v1568_v54 = vsub.f32 %v1452_v16, %v632_v50  ;;  %v693_v10 = vsel %vm57_vm0, %v669_v52, 0.0 }
 0x25c   :  { %v1574_v17 = vsub.f32 %v1458_v18, %v633_v53  ;;  %v589_v57 = vpop.xlane.xlu1 %588  ;;  %694 = vadd.xlane.f32.xlu0 %v693_v10  ;;  %v699_v63 = vsel %vm57_vm0, %v671_v55, 0.0 }
 0x25d   :  { %v634_v58 = vmul.f32 0.03125, %v589_v57  ;;  %v592_v59 = vpop.xlane.xlu0 %591  ;;  %v672_v38 = vmul.f32 %v1568_v54, %v1568_v54 }
 0x25e   :  { %v635_v61 = vmul.f32 0.03125, %v592_v59  ;;  %v673_v0 = vmul.f32 %v1574_v17, %v1574_v17 }
 0x25f   :  { %v1579_v62 = vsub.f32 %v1464_v22, %v634_v58  ;;  %v702_v16 = vsel %vm57_vm0, %v672_v38, 0.0 }
 0x260   :  { %v1586_v18 = vsub.f32 %v1470_v23, %v635_v61  ;;  %v595_v2 = vpop.xlane.xlu1 %594  ;;  %703 = vadd.xlane.f32.xlu1 %v702_v16  ;;  %700 = vadd.xlane.f32.xlu0 %v699_v63  ;;  %v705_v5 = vsel %vm57_vm0, %v673_v0, 0.0 }
 0x261   :  { %v636_v4 = vmul.f32 0.03125, %v595_v2  ;;  %v598_v7 = vpop.xlane.xlu0 %597  ;;  %v674_v6 = vmul.f32 %v1579_v62, %v1579_v62 }
 0x262   :  { %v637_v22 = vmul.f32 0.03125, %v598_v7  ;;  %v675_v23 = vmul.f32 %v1586_v18, %v1586_v18 }
 0x263   :  { %v1591_v8 = vsub.f32 %v1476_v25, %v636_v4  ;;  %v708_v9 = vsel %vm57_vm0, %v674_v6, 0.0 }
 0x264   :  { %v1598_v12 = vsub.f32 %v1482_v26, %v637_v22  ;;  %v601_v34 = vpop.xlane.xlu1 %600  ;;  %709 = vadd.xlane.f32.xlu1 %v708_v9  ;;  %706 = vadd.xlane.f32.xlu0 %v705_v5  ;;  %v711_v20 = vsel %vm57_vm0, %v675_v23, 0.0 }
 0x265   :  { %v638_v35 = vmul.f32 0.03125, %v601_v34  ;;  %v604_v56 = vpop.xlane.xlu0 %603  ;;  %v676_v15 = vmul.f32 %v1591_v8, %v1591_v8 }
 0x266   :  { %v639_v25 = vmul.f32 0.03125, %v604_v56  ;;  %v677_v26 = vmul.f32 %v1598_v12, %v1598_v12 }
 0x267   :  { %v1603_v11 = vsub.f32 %v1488_v27, %v638_v35  ;;  %v714_v19 = vsel %vm57_vm0, %v676_v15, 0.0 }
 0x268   :  { %v1610_v21 = vsub.f32 %v1494_v28, %v639_v25  ;;  %v607_v24 = vpop.xlane.xlu1 %606  ;;  %715 = vadd.xlane.f32.xlu1 %v714_v19  ;;  %712 = vadd.xlane.f32.xlu0 %v711_v20  ;;  %v717_v44 = vsel %vm57_vm0, %v677_v26, 0.0 }
 0x269   :  { %v640_v37 = vmul.f32 0.03125, %v607_v24  ;;  %v610_v41 = vpop.xlane.xlu0 %609  ;;  %v678_v42 = vmul.f32 %v1603_v11, %v1603_v11 }
 0x26a   :  { %v641_v27 = vmul.f32 0.03125, %v610_v41  ;;  %v679_v28 = vmul.f32 %v1610_v21, %v1610_v21 }
 0x26b   :  { %v1615_v43 = vsub.f32 %v1500_v29, %v640_v37  ;;  %v720_v60 = vsel %vm57_vm0, %v678_v42, 0.0 }
 0x26c   :  { %v1622_v45 = vsub.f32 %v1506_v30, %v641_v27  ;;  %v613_v46 = vpop.xlane.xlu1 %612  ;;  %721 = vadd.xlane.f32.xlu1 %v720_v60  ;;  %718 = vadd.xlane.f32.xlu0 %v717_v44  ;;  %v723_v52 = vsel %vm57_vm0, %v679_v28, 0.0  ;;  %v1664_v44 = vld [vmem:[%s1816_s5] ss:$0 sm:$0xff] }
 0x26d   :  { %v642_v3 = vmul.f32 0.03125, %v613_v46  ;;  %v616_v1 = vpop.xlane.xlu0 %615  ;;  %v680_v49 = vmul.f32 %v1615_v43, %v1615_v43 }
 0x26e   :  { %v643_v29 = vmul.f32 0.03125, %v616_v1  ;;  %v681_v30 = vmul.f32 %v1622_v45, %v1622_v45 }
 0x26f   :  { %v1627_v50 = vsub.f32 %v1512_v31, %v642_v3  ;;  %v726_v51 = vsel %vm57_vm0, %v680_v49, 0.0 }
 0x270   :  { %v1634_v53 = vsub.f32 %v1518_v32, %v643_v29  ;;  %v619_v10 = vpop.xlane.xlu1 %618  ;;  %727 = vadd.xlane.f32.xlu1 %v726_v51  ;;  %724 = vadd.xlane.f32.xlu0 %v723_v52  ;;  %v729_v61 = vsel %vm57_vm0, %v681_v30, 0.0  ;;  %v1670_v29 = vld [vmem:[%s1817_s6] ss:$0 sm:$0xff] }
 0x271   :  { %v644_v55 = vmul.f32 0.03125, %v619_v10  ;;  %v622_v57 = vpop.xlane.xlu0 %621  ;;  %v682_v58 = vmul.f32 %v1627_v50, %v1627_v50 }
 0x272   :  { %v645_v31 = vmul.f32 0.03125, %v622_v57  ;;  %v683_v32 = vmul.f32 %v1634_v53, %v1634_v53 }
 0x273   :  { %v1639_v59 = vsub.f32 %v1524_v33, %v644_v55  ;;  %v732_v38 = vsel %vm57_vm0, %v682_v58, 0.0 }
 0x274   :  { %v1646_v16 = vsub.f32 %v1530_v13, %v645_v31  ;;  %v625_v63 = vpop.xlane.xlu1 %624  ;;  %733 = vadd.xlane.f32.xlu1 %v732_v38  ;;  %730 = vadd.xlane.f32.xlu0 %v729_v61  ;;  %v735_v7 = vsel %vm57_vm0, %v683_v32, 0.0 }
 0x275   :  { %v646_v0 = vmul.f32 0.03125, %v625_v63  ;;  %v684_v2 = vmul.f32 %v1639_v59, %v1639_v59 }
 0x276   :  { %v685_v6 = vmul.f32 %v1646_v16, %v1646_v16 }
 0x277   :  { %v1651_v33 = vsub.f32 %v1535_v14, %v646_v0  ;;  %v738_v4 = vsel %vm57_vm0, %v684_v2, 0.0 }
 0x278   :  { %739 = vadd.xlane.f32.xlu1 %v738_v4  ;;  %736 = vadd.xlane.f32.xlu0 %v735_v7  ;;  %v741_v9 = vsel %vm57_vm0, %v685_v6, 0.0 }
 0x279   :  { %v686_v13 = vmul.f32 %v1651_v33, %v1651_v33 }
 0x27b   :  { %v744_v22 = vsel %vm57_vm0, %v686_v13, 0.0 }
 0x27c   :  { %745 = vadd.xlane.f32.xlu1 %v744_v22  ;;  %742 = vadd.xlane.f32.xlu0 %v741_v9 }
 0x2e1   :  { %v692_v14 = vpop.xlane.xlu1 %691 }
 0x2e2   :  { %v748_v5 = vmul.f32 0.03125, %v692_v14 }
 0x2e4   :  { %v768_v23 = vadd.f32 1e-05, %v748_v5 }
 0x2e5   :  { %v698_v34 = vpop.xlane.xlu1 %697  ;;  %v689_v35 = vpop.xlane.xlu0 %688 }
 0x2e6   :  { %1115 = vrsqrt.f32 %v768_v23  ;;  %v750_v56 = vmul.f32 0.03125, %v698_v34  ;;  %v747_v15 = vmul.f32 0.03125, %v689_v35 }
 0x2e8   :  { %v770_v25 = vadd.f32 1e-05, %v750_v56  ;;  %v767_v19 = vadd.f32 1e-05, %v747_v15 }
 0x2e9   :  { %v695_v20 = vpop.xlane.xlu0 %694 }
 0x2ea   :  { %1117 = vrsqrt.f32 %v770_v25  ;;  %v749_v26 = vmul.f32 0.03125, %v695_v20 }
 0x2eb   :  { %1119 = vrsqrt.f32 %v767_v19 }
 0x2ec   :  { %v769_v24 = vadd.f32 1e-05, %v749_v26 }
 0x2ed   :  { %v704_v37 = vpop.xlane.xlu1 %703  ;;  %v701_v41 = vpop.xlane.xlu0 %700 }
 0x2ee   :  { %1121 = vrsqrt.f32 %v769_v24  ;;  %v752_v42 = vmul.f32 0.03125, %v704_v37  ;;  %v751_v27 = vmul.f32 0.03125, %v701_v41 }
 0x2f0   :  { %v1116_v60 = vpop.eup %1115  ;;  %v772_v28 = vadd.f32 1e-05, %v752_v42  ;;  %v771_v46 = vadd.f32 1e-05, %v751_v27 }
 0x2f1   :  { %v808_v3 = vmul.f32 %v1116_v60, %v1542_v36  ;;  %v710_v1 = vpop.xlane.xlu1 %709  ;;  %v707_v49 = vpop.xlane.xlu0 %706 }
 0x2f2   :  { %1123 = vrsqrt.f32 %v772_v28  ;;  %v754_v51 = vmul.f32 0.03125, %v710_v1  ;;  %v753_v52 = vmul.f32 0.03125, %v707_v49 }
 0x2f3   :  { %v834_v30 = vmul.f32 %v1664_v44, %v808_v3  ;;  %1125 = vrsqrt.f32 %v771_v46 }
 0x2f4   :  { %v1118_v10 = vpop.eup %1117  ;;  %v774_v55 = vadd.f32 1e-05, %v754_v51  ;;  %v773_v57 = vadd.f32 1e-05, %v753_v52 }
 0x2f5   :  { %v1120_v58 = vpop.eup %1119  ;;  %v860_v31 = vadd.f32 %v1670_v29, %v834_v30  ;;  %v810_v36 = vmul.f32 %v1118_v10, %v1547_v39  ;;  %v716_v38 = vpop.xlane.xlu1 %715 }
 0x2f6   :  { %v713_v61 = vpop.xlane.xlu0 %712  ;;  %v807_v32 = vmul.f32 %v1120_v58, %v1550_v40  ;;  %1127 = vrsqrt.f32 %v774_v55  ;;  %v756_v63 = vmul.f32 0.03125, %v716_v38 }
 0x2f7   :  { %v755_v0 = vmul.f32 0.03125, %v713_v61  ;;  %880 = vst.msk [vmem:[%s1818_s7 + $0x8] sm:$0xff] %vm57_vm0, %v860_v31  ;;  %v836_v2 = vmul.f32 %v1664_v44, %v810_v36  ;;  %1129 = vrsqrt.f32 %v773_v57 }
 0x2f8   :  { %v1122_v4 = vpop.eup %1121  ;;  %v833_v7 = vmul.f32 %v1664_v44, %v807_v32  ;;  %v776_v6 = vadd.f32 1e-05, %v756_v63 }
 0x2f9   :  { %v775_v39 = vadd.f32 1e-05, %v755_v0  ;;  %v862_v13 = vadd.f32 %v1670_v29, %v836_v2  ;;  %v809_v40 = vmul.f32 %v1122_v4, %v1558_v47  ;;  %v722_v22 = vpop.xlane.xlu1 %721 }
 0x2fa   :  { %v719_v9 = vpop.xlane.xlu0 %718  ;;  %v859_v14 = vadd.f32 %v1670_v29, %v833_v7  ;;  %1131 = vrsqrt.f32 %v776_v6  ;;  %v758_v5 = vmul.f32 0.03125, %v722_v22 }
 0x2fb   :  { %v757_v23 = vmul.f32 0.03125, %v719_v9  ;;  %882 = vst.msk [vmem:[%s1818_s7 + $0x18] sm:$0xff] %vm57_vm0, %v862_v13  ;;  %v835_v34 = vmul.f32 %v1664_v44, %v809_v40  ;;  %1133 = vrsqrt.f32 %v775_v39 }
 0x2fc   :  { %v1124_v35 = vpop.eup %1123  ;;  %879 = vst.msk [vmem:[%s1818_s7] sm:$0xff] %vm57_vm0, %v859_v14  ;;  %v778_v47 = vadd.f32 1e-05, %v758_v5 }
 0x2fd   :  { %v777_v56 = vadd.f32 1e-05, %v757_v23  ;;  %v1126_v15 = vpop.eup %1125  ;;  %v861_v25 = vadd.f32 %v1670_v29, %v835_v34  ;;  %v812_v19 = vmul.f32 %v1124_v35, %v1568_v54  ;;  %v728_v20 = vpop.xlane.xlu1 %727 }
 0x2fe   :  { %v725_v26 = vpop.xlane.xlu0 %724  ;;  %v811_v24 = vmul.f32 %v1126_v15, %v1563_v48  ;;  %1135 = vrsqrt.f32 %v778_v47  ;;  %v760_v37 = vmul.f32 0.03125, %v728_v20 }
 0x2ff   :  { %v759_v41 = vmul.f32 0.03125, %v725_v26  ;;  %881 = vst.msk [vmem:[%s1818_s7 + $0x10] sm:$0xff] %vm57_vm0, %v861_v25  ;;  %v838_v42 = vmul.f32 %v1664_v44, %v812_v19  ;;  %1137 = vrsqrt.f32 %v777_v56 }
 0x300   :  { %v1128_v27 = vpop.eup %1127  ;;  %v837_v60 = vmul.f32 %v1664_v44, %v811_v24  ;;  %v780_v28 = vadd.f32 1e-05, %v760_v37 }
 0x301   :  { %v779_v54 = vadd.f32 1e-05, %v759_v41  ;;  %v1130_v46 = vpop.eup %1129  ;;  %v864_v3 = vadd.f32 %v1670_v29, %v838_v42  ;;  %v814_v48 = vmul.f32 %v1128_v27, %v1579_v62  ;;  %v734_v1 = vpop.xlane.xlu1 %733 }
 0x302   :  { %v731_v49 = vpop.xlane.xlu0 %730  ;;  %v863_v51 = vadd.f32 %v1670_v29, %v837_v60  ;;  %v813_v52 = vmul.f32 %v1130_v46, %v1574_v17  ;;  %1139 = vrsqrt.f32 %v780_v28  ;;  %v762_v30 = vmul.f32 0.03125, %v734_v1 }
 0x303   :  { %884 = vst.msk [vmem:[%s1818_s7 + $0x28] sm:$0xff] %vm57_vm0, %v864_v3  ;;  %v840_v10 = vmul.f32 %v1664_v44, %v814_v48  ;;  %1141 = vrsqrt.f32 %v779_v54  ;;  %v761_v55 = vmul.f32 0.03125, %v731_v49 }
 0x304   :  { %v1132_v57 = vpop.eup %1131  ;;  %883 = vst.msk [vmem:[%s1818_s7 + $0x20] sm:$0xff] %vm57_vm0, %v863_v51  ;;  %v839_v62 = vmul.f32 %v1664_v44, %v813_v52  ;;  %v782_v17 = vadd.f32 1e-05, %v762_v30 }
 0x305   :  { %v1134_v58 = vpop.eup %1133  ;;  %v866_v31 = vadd.f32 %v1670_v29, %v840_v10  ;;  %v816_v36 = vmul.f32 %v1132_v57, %v1591_v8  ;;  %v781_v38 = vadd.f32 1e-05, %v761_v55  ;;  %v740_v61 = vpop.xlane.xlu1 %739 }
 0x306   :  { %v737_v32 = vpop.xlane.xlu0 %736  ;;  %v865_v63 = vadd.f32 %v1670_v29, %v839_v62  ;;  %v815_v0 = vmul.f32 %v1134_v58, %v1586_v18  ;;  %1143 = vrsqrt.f32 %v782_v17  ;;  %v764_v2 = vmul.f32 0.03125, %v740_v61 }
 0x307   :  { %886 = vst.msk [vmem:[%s1818_s7 + $0x38] sm:$0xff] %vm57_vm0, %v866_v31  ;;  %v842_v4 = vmul.f32 %v1664_v44, %v816_v36  ;;  %1145 = vrsqrt.f32 %v781_v38  ;;  %v763_v7 = vmul.f32 0.03125, %v737_v32 }
 0x308   :  { %v1136_v6 = vpop.eup %1135  ;;  %885 = vst.msk [vmem:[%s1818_s7 + $0x30] sm:$0xff] %vm57_vm0, %v865_v63  ;;  %v841_v8 = vmul.f32 %v1664_v44, %v815_v0  ;;  %v784_v18 = vadd.f32 1e-05, %v764_v2 }
 0x309   :  { %v1138_v39 = vpop.eup %1137  ;;  %v868_v13 = vadd.f32 %v1670_v29, %v842_v4  ;;  %v818_v40 = vmul.f32 %v1136_v6, %v1603_v11  ;;  %v783_v22 = vadd.f32 1e-05, %v763_v7  ;;  %v746_v9 = vpop.xlane.xlu1 %745 }
 0x30a   :  { %v743_v14 = vpop.xlane.xlu0 %742  ;;  %v867_v5 = vadd.f32 %v1670_v29, %v841_v8  ;;  %v817_v23 = vmul.f32 %v1138_v39, %v1598_v12  ;;  %1147 = vrsqrt.f32 %v784_v18  ;;  %v766_v34 = vmul.f32 0.03125, %v746_v9 }
 0x30b   :  { %888 = vst.msk [vmem:[%s1818_s7 + $0x48] sm:$0xff] %vm57_vm0, %v868_v13  ;;  %v844_v35 = vmul.f32 %v1664_v44, %v818_v40  ;;  %1149 = vrsqrt.f32 %v783_v22  ;;  %v765_v47 = vmul.f32 0.03125, %v743_v14 }
 0x30c   :  { %v1140_v56 = vpop.eup %1139  ;;  %887 = vst.msk [vmem:[%s1818_s7 + $0x40] sm:$0xff] %vm57_vm0, %v867_v5  ;;  %v843_v11 = vmul.f32 %v1664_v44, %v817_v23  ;;  %v786_v12 = vadd.f32 1e-05, %v766_v34 }
 0x30d   :  { %v1142_v15 = vpop.eup %1141  ;;  %v870_v25 = vadd.f32 %v1670_v29, %v844_v35  ;;  %v820_v19 = vmul.f32 %v1140_v56, %v1615_v43  ;;  %v785_v20 = vadd.f32 1e-05, %v765_v47 }
 0x30e   :  { %v869_v26 = vadd.f32 %v1670_v29, %v843_v11  ;;  %v819_v24 = vmul.f32 %v1142_v15, %v1610_v21  ;;  %1151 = vrsqrt.f32 %v786_v12 }
 0x30f   :  { %890 = vst.msk [vmem:[%s1818_s7 + $0x58] sm:$0xff] %vm57_vm0, %v870_v25  ;;  %v846_v37 = vmul.f32 %v1664_v44, %v820_v19  ;;  %1153 = vrsqrt.f32 %v785_v20 }
 0x310   :  { %v1144_v41 = vpop.eup %1143  ;;  %889 = vst.msk [vmem:[%s1818_s7 + $0x50] sm:$0xff] %vm57_vm0, %v869_v26  ;;  %v845_v43 = vmul.f32 %v1664_v44, %v819_v24 }
 0x311   :  { %v1146_v42 = vpop.eup %1145  ;;  %v872_v21 = vadd.f32 %v1670_v29, %v846_v37  ;;  %v822_v27 = vmul.f32 %v1144_v41, %v1627_v50 }
 0x312   :  { %v871_v60 = vadd.f32 %v1670_v29, %v845_v43  ;;  %v821_v28 = vmul.f32 %v1146_v42, %v1622_v45 }
 0x313   :  { %892 = vst.msk [vmem:[%s1818_s7 + $0x68] sm:$0xff] %vm57_vm0, %v872_v21  ;;  %v848_v54 = vmul.f32 %v1664_v44, %v822_v27 }
 0x314   :  { %v1148_v46 = vpop.eup %1147  ;;  %891 = vst.msk [vmem:[%s1818_s7 + $0x60] sm:$0xff] %vm57_vm0, %v871_v60  ;;  %v847_v3 = vmul.f32 %v1664_v44, %v821_v28 }
 0x315   :  { %v1150_v50 = vpop.eup %1149  ;;  %v874_v48 = vadd.f32 %v1670_v29, %v848_v54  ;;  %v824_v45 = vmul.f32 %v1148_v46, %v1639_v59 }
 0x316   :  { %v873_v1 = vadd.f32 %v1670_v29, %v847_v3  ;;  %v823_v49 = vmul.f32 %v1150_v50, %v1634_v53 }
 0x317   :  { %894 = vst.msk [vmem:[%s1818_s7 + $0x78] sm:$0xff] %vm57_vm0, %v874_v48  ;;  %v850_v51 = vmul.f32 %v1664_v44, %v824_v45 }
 0x318   :  { %v1152_v52 = vpop.eup %1151  ;;  %893 = vst.msk [vmem:[%s1818_s7 + $0x70] sm:$0xff] %vm57_vm0, %v873_v1  ;;  %v849_v30 = vmul.f32 %v1664_v44, %v823_v49 }
 0x319   :  { %v1154_v59 = vpop.eup %1153  ;;  %v876_v10 = vadd.f32 %v1670_v29, %v850_v51  ;;  %v826_v53 = vmul.f32 %v1152_v52, %v1651_v33 }
 0x31a   :  { %v875_v55 = vadd.f32 %v1670_v29, %v849_v30  ;;  %v825_v57 = vmul.f32 %v1154_v59, %v1646_v16 }
 0x31b   :  { %896 = vst.msk [vmem:[%s1818_s7 + $0x88] sm:$0xff] %vm57_vm0, %v876_v10  ;;  %v852_v62 = vmul.f32 %v1664_v44, %v826_v53 }
 0x31c   :  { %895 = vst.msk [vmem:[%s1818_s7 + $0x80] sm:$0xff] %vm57_vm0, %v875_v55  ;;  %v851_v17 = vmul.f32 %v1664_v44, %v825_v57 }
 0x31d   :  { %v878_v33 = vadd.f32 %v1670_v29, %v852_v62 }
 0x31e   :  { %v877_v58 = vadd.f32 %v1670_v29, %v851_v17 }
 0x31f   :  { %898 = vst.msk [vmem:[%s1818_s7 + $0x98] sm:$0xff] %vm57_vm0, %v878_v33 }
 0x320   :  { %897 = vst.msk [vmem:[%s1818_s7 + $0x90] sm:$0xff] %vm57_vm0, %v877_v58 }

</bundles_post_ra>
